<compile_context>
chip_gen: v7x
topology: tpu7x:2x2x1
jax: 0.10.0
libtpu: 0.0.40
codegen_flags: <defaults>
</compile_context>

<pallas_src>
import math
import functools

import jax
import jax.numpy as jnp
from jax.experimental import pallas as pl
from jax.experimental.pallas import tpu as pltpu


# Scoped-VMEM budget: big enough for 512-class tiles on v5e/v6e, still <= ~48 MiB so a
# v7x TensorCore (64 MiB physical VMEM) does not OOM / spill.
_VMEM_LIMIT = 48 * 1024 * 1024
_TINY_ROWS = 16                  # below this, a pallas_call is pure launch overhead


# --------------------------------------------------------------------------- #
# Small helpers
# --------------------------------------------------------------------------- #
def _round_up(x, m):
    return (x + m - 1) // m * m


def _pick_tile(dim, pref, floor):
    """Tile size (and padded dim): prefer big tiles; shrink only down to `floor`
    if that divides the dim exactly, otherwise keep `pref` and pad the dim."""
    if dim <= pref:
        return dim, dim                      # single full-dim block (no constraint)
    t = pref
    while t > floor and dim % t != 0:
        t //= 2
    if dim % t == 0:
        return t, dim
    return pref, _round_up(dim, pref)


def _pad2(x, M, N):
    m, n = x.shape
    if m == M and n == N:
        return x
    return jnp.pad(x, ((0, M - m), (0, N - n)))


def _pad_seq(x, T):
    t = x.shape[1]
    if t == T:
        return x
    return jnp.pad(x, ((0, 0), (0, T - t), (0, 0)))


def _act(y, activation):
    if activation == "gelu":
        return jax.nn.gelu(y, approximate=True)
    if activation == "relu":
        return jnp.maximum(y, 0.0)
    return y


# --------------------------------------------------------------------------- #
# Pallas kernels
# --------------------------------------------------------------------------- #
def _linear(x, w, b, activation=None, residual=None, x_add=None,
            out_dtype=jnp.bfloat16):
    """out = act((x [+ x_add]) @ w + b) (+ residual).   x:(M,K) w:(K,N) b:(N,).

    bf16 MXU operands, f32 accumulation.  Single-K problems (the common case here)
    write dot+bias+act+residual straight to the output block (no VMEM accumulator).
    Tiny problems (M < 16, e.g. the 7-token decoder path) go to XLA directly.
    """
    M, K = x.shape
    N = w.shape[1]

    if M < _TINY_ROWS:
        xv = x.astype(jnp.float32)
        if x_add is not None:
            xv = xv + x_add.astype(jnp.float32)
        y = xv @ w.astype(jnp.float32) + b.astype(jnp.float32)
        y = _act(y, activation)
        if residual is not None:
            y = y + residual.astype(jnp.float32)
        return y.astype(out_dtype)

    tm, Mp = _pick_tile(M, 512, 256)
    tn, Np = _pick_tile(N, 512, 256)
    tk, Kp = _pick_tile(K, 1024, 512)
    single_k = (tk == Kp)

    has_add = x_add is not None
    has_res = residual is not None

    xb = _pad2(x.astype(jnp.bfloat16), Mp, Kp)
    wb = _pad2(w.astype(jnp.bfloat16), Kp, Np)
    bb = _pad2(b.reshape(1, N).astype(jnp.float32), 1, Np)

    if single_k:
        ins = [xb, wb, bb]
        in_specs = [
            pl.BlockSpec((tm, Kp), lambda i, j: (i, 0)),
            pl.BlockSpec((Kp, tn), lambda i, j: (0, j)),
            pl.BlockSpec((1, tn), lambda i, j: (0, j)),
        ]
        if has_add:
            ins.append(_pad2(x_add.astype(jnp.bfloat16), Mp, Kp))
            in_specs.append(pl.BlockSpec((tm, Kp), lambda i, j: (i, 0)))
        if has_res:
            ins.append(_pad2(residual.astype(jnp.bfloat16), Mp, Np))
            in_specs.append(pl.BlockSpec((tm, tn), lambda i, j: (i, j)))

        def kernel(*refs):
            idx = 0
            x_ref = refs[idx]; idx += 1
            w_ref = refs[idx]; idx += 1
            b_ref = refs[idx]; idx += 1
            a_ref = None
            r_ref = None
            if has_add:
                a_ref = refs[idx]; idx += 1
            if has_res:
                r_ref = refs[idx]; idx += 1
            o_ref = refs[idx]

            xv = x_ref[...]
            if a_ref is not None:
                xv = xv + a_ref[...]
            y = jnp.dot(xv, w_ref[...], preferred_element_type=jnp.float32)
            y = y + b_ref[...]
            y = _act(y, activation)
            if r_ref is not None:
                y = y + r_ref[...].astype(jnp.float32)
            o_ref[...] = y.astype(o_ref.dtype)

        out = pl.pallas_call(
            kernel,
            out_shape=jax.ShapeDtypeStruct((Mp, Np), out_dtype),
            grid=(Mp // tm, Np // tn),
            in_specs=in_specs,
            out_specs=pl.BlockSpec((tm, tn), lambda i, j: (i, j)),
            compiler_params=pltpu.CompilerParams(
                dimension_semantics=("parallel", "parallel"),
                vmem_limit_bytes=_VMEM_LIMIT),
        )(*ins)
    else:
        ins = [xb, wb, bb]
        in_specs = [
            pl.BlockSpec((tm, tk), lambda i, j, k: (i, k)),
            pl.BlockSpec((tk, tn), lambda i, j, k: (k, j)),
            pl.BlockSpec((1, tn), lambda i, j, k: (0, j)),
        ]
        if has_add:
            ins.append(_pad2(x_add.astype(jnp.bfloat16), Mp, Kp))
            in_specs.append(pl.BlockSpec((tm, tk), lambda i, j, k: (i, k)))
        if has_res:
            ins.append(_pad2(residual.astype(jnp.bfloat16), Mp, Np))
            in_specs.append(pl.BlockSpec((tm, tn), lambda i, j, k: (i, j)))

        def kernel(*refs):
            idx = 0
            x_ref = refs[idx]; idx += 1
            w_ref = refs[idx]; idx += 1
            b_ref = refs[idx]; idx += 1
            a_ref = None
            r_ref = None
            if has_add:
                a_ref = refs[idx]; idx += 1
            if has_res:
                r_ref = refs[idx]; idx += 1
            o_ref = refs[idx]; idx += 1
            acc_ref = refs[idx]

            @pl.when(pl.program_id(2) == 0)
            def _():
                acc_ref[...] = jnp.zeros_like(acc_ref)

            xv = x_ref[...]
            if a_ref is not None:
                xv = xv + a_ref[...]
            acc_ref[...] += jnp.dot(xv, w_ref[...],
                                    preferred_element_type=jnp.float32)

            @pl.when(pl.program_id(2) == pl.num_programs(2) - 1)
            def _():
                y = acc_ref[...] + b_ref[...]
                y = _act(y, activation)
                if r_ref is not None:
                    y = y + r_ref[...].astype(jnp.float32)
                o_ref[...] = y.astype(o_ref.dtype)

        out = pl.pallas_call(
            kernel,
            out_shape=jax.ShapeDtypeStruct((Mp, Np), out_dtype),
            grid=(Mp // tm, Np // tn, Kp // tk),
            in_specs=in_specs,
            out_specs=pl.BlockSpec((tm, tn), lambda i, j, k: (i, j)),
            scratch_shapes=[pltpu.VMEM((tm, tn), jnp.float32)],
            compiler_params=pltpu.CompilerParams(
                dimension_semantics=("parallel", "parallel", "arbitrary"),
                vmem_limit_bytes=_VMEM_LIMIT),
        )(*ins)

    if Mp != M or Np != N:
        out = out[:M, :N]
    return out


def _layernorm(x, gamma, beta, residual=None, activation=None, eps=1e-6,
               out_dtype=jnp.bfloat16):
    """Row-wise layernorm over the last dim (optionally fused residual add).
    bf16 in / bf16 out, f32 math inside the kernel."""
    M, D = x.shape
    if M < _TINY_ROWS:
        xv = x.astype(jnp.float32)
        if residual is not None:
            xv = xv + residual.astype(jnp.float32)
        mu = jnp.mean(xv, axis=-1, keepdims=True)
        var = jnp.mean(jnp.square(xv - mu), axis=-1, keepdims=True)
        y = (xv - mu) * jax.lax.rsqrt(var + eps) * gamma + beta
        return _act(y, activation).astype(out_dtype)

    tm, Mp = _pick_tile(M, 512, 256)
    has_res = residual is not None

    ins = [_pad2(x.astype(jnp.bfloat16), Mp, D)]
    in_specs = [pl.BlockSpec((tm, D), lambda i: (i, 0))]
    if has_res:
        ins.append(_pad2(residual.astype(jnp.bfloat16), Mp, D))
        in_specs.append(pl.BlockSpec((tm, D), lambda i: (i, 0)))
    ins += [gamma.reshape(1, D).astype(jnp.float32),
            beta.reshape(1, D).astype(jnp.float32)]
    in_specs += [pl.BlockSpec((1, D), lambda i: (0, 0)),
                 pl.BlockSpec((1, D), lambda i: (0, 0))]

    def kernel(*refs):
        if has_res:
            x_ref, r_ref, g_ref, b_ref, o_ref = refs
        else:
            x_ref, g_ref, b_ref, o_ref = refs
            r_ref = None
        xv = x_ref[...].astype(jnp.float32)
        if r_ref is not None:
            xv = xv + r_ref[...].astype(jnp.float32)
        mu = jnp.mean(xv, axis=-1, keepdims=True)
        var = jnp.mean(jnp.square(xv - mu), axis=-1, keepdims=True)
        y = (xv - mu) * jax.lax.rsqrt(var + eps) * g_ref[...] + b_ref[...]
        o_ref[...] = _act(y, activation).astype(o_ref.dtype)

    out = pl.pallas_call(
        kernel,
        out_shape=jax.ShapeDtypeStruct((Mp, D), out_dtype),
        grid=(Mp // tm,),
        in_specs=in_specs,
        out_specs=pl.BlockSpec((tm, D), lambda i: (i, 0)),
        compiler_params=pltpu.CompilerParams(
            dimension_semantics=("parallel",),
            vmem_limit_bytes=_VMEM_LIMIT),
    )(*ins)
    return out[:M] if Mp != M else out


def _attention(q, k, v):
    """Single-head scaled dot-product attention, flash-style online softmax.

    q is expected to be pre-scaled by 1/sqrt(D) (folded into the q-projection weights),
    so the kernel does no per-step VPU scaling.  Grid (B, q_tiles, kv_tiles) with VMEM
    scratch (m, l, acc); the full score matrix is never materialized.  bf16 operands
    feed the MXU, accumulation in f32, bf16 output.
    """
    # TODO(synk): SAM uses multi-head attention (8/12 heads); single-head used here.
    B, Tq, D = q.shape
    Tk = k.shape[1]

    if Tq < _TINY_ROWS and Tk < _TINY_ROWS:      # tiny token-token path -> XLA
        qf, kf, vf = (t.astype(jnp.float32) for t in (q, k, v))
        s = jnp.einsum("bqd,bkd->bqk", qf, kf)
        p = jax.nn.softmax(s, axis=-1)
        return jnp.einsum("bqk,bkd->bqd", p, vf).astype(jnp.bfloat16)

    tq = min(256, _round_up(Tq, 16))
    Tqp = _round_up(Tq, tq)
    tkv = min(256, _round_up(Tk, 16))
    Tkp = _round_up(Tk, tkv)

    qb = _pad_seq(q.astype(jnp.bfloat16), Tqp)
    kb = _pad_seq(k.astype(jnp.bfloat16), Tkp)
    vb = _pad_seq(v.astype(jnp.bfloat16), Tkp)
    needs_mask = Tkp != Tk
    NEG = -1e30

    def kernel(q_ref, k_ref, v_ref, o_ref, m_sc, l_sc, acc_sc):
        kv = pl.program_id(2)

        @pl.when(kv == 0)
        def _():
            m_sc[...] = jnp.full_like(m_sc, NEG)
            l_sc[...] = jnp.zeros_like(l_sc)
            acc_sc[...] = jnp.zeros_like(acc_sc)

        s = jax.lax.dot_general(q_ref[0], k_ref[0], (((1,), (1,)), ((), ())),
                                preferred_element_type=jnp.float32)
        if needs_mask:
            kv_pos = kv * tkv + jax.lax.broadcasted_iota(jnp.int32, s.shape, 1)
            s = jnp.where(kv_pos < Tk, s, NEG)

        m_prev = m_sc[...]
        m_new = jnp.maximum(m_prev, jnp.max(s, axis=-1, keepdims=True))
        alpha = jnp.exp(m_prev - m_new)
        p = jnp.exp(s - m_new)
        l_sc[...] = alpha * l_sc[...] + jnp.sum(p, axis=-1, keepdims=True)
        acc_sc[...] = alpha * acc_sc[...] + jnp.dot(
            p.astype(jnp.bfloat16), v_ref[0], preferred_element_type=jnp.float32)
        m_sc[...] = m_new

        @pl.when(kv == pl.num_programs(2) - 1)
        def _():
            o_ref[0] = (acc_sc[...] * pl.reciprocal(l_sc[...], approx=True)
                        ).astype(o_ref.dtype)

    out = pl.pallas_call(
        kernel,
        out_shape=jax.ShapeDtypeStruct((B, Tqp, D), jnp.bfloat16),
        grid=(B, Tqp // tq, Tkp // tkv),
        in_specs=[
            pl.BlockSpec((1, tq, D), lambda b, i, j: (b, i, 0)),
            pl.BlockSpec((1, tkv, D), lambda b, i, j: (b, j, 0)),
            pl.BlockSpec((1, tkv, D), lambda b, i, j: (b, j, 0)),
        ],
        out_specs=pl.BlockSpec((1, tq, D), lambda b, i, j: (b, i, 0)),
        scratch_shapes=[
            pltpu.VMEM((tq, 1), jnp.float32),
            pltpu.VMEM((tq, 1), jnp.float32),
            pltpu.VMEM((tq, D), jnp.float32),
        ],
        compiler_params=pltpu.CompilerParams(
            dimension_semantics=("parallel", "parallel", "arbitrary"),
            vmem_limit_bytes=_VMEM_LIMIT),
    )(qb, kb, vb)
    return out[:, :Tq, :] if Tqp != Tq else out


def _batched_hyper_matmul(hyper, feat):
    """masks[b] = hyper[b] @ feat[b].T .  hyper:(B,M,C) feat:(B,N,C) -> (B,M,N).

    M (mask tokens) is padded to the sublane; the pixel dim N is tiled wide (up to 1024)
    so the big upscaled feature map streams through VMEM.  feat is consumed in bf16
    directly (no f32 round trip from up2).
    """
    B, M, C = hyper.shape
    N = feat.shape[1]
    Mp = _round_up(M, 16)
    tn, Np = _pick_tile(N, 1024, 512)

    hb = jnp.pad(hyper.astype(jnp.bfloat16), ((0, 0), (0, Mp - M), (0, 0)))
    fb = feat.astype(jnp.bfloat16)
    if Np != N:
        fb = jnp.pad(fb, ((0, 0), (0, Np - N), (0, 0)))

    def kernel(h_ref, f_ref, o_ref):
        o_ref[0] = jax.lax.dot_general(
            h_ref[0], f_ref[0], (((1,), (1,)), ((), ())),
            preferred_element_type=jnp.float32)

    out = pl.pallas_call(
        kernel,
        out_shape=jax.ShapeDtypeStruct((B, Mp, Np), jnp.float32),
        grid=(B, Np // tn),
        in_specs=[
            pl.BlockSpec((1, Mp, C), lambda b, j: (b, 0, 0)),
            pl.BlockSpec((1, tn, C), lambda b, j: (b, j, 0)),
        ],
        out_specs=pl.BlockSpec((1, Mp, tn), lambda b, j: (b, 0, j)),
        compiler_params=pltpu.CompilerParams(
            dimension_semantics=("parallel", "parallel"),
            vmem_limit_bytes=_VMEM_LIMIT),
    )(hb, fb)
    return out[:, :M, :N]


def _bilinear_resize(x, R, Cm):
    """Separable bilinear resize: out[b] = R @ x[b] @ Cm.T, row-tiled, bf16 MXU ops."""
    BC, h, w = x.shape
    H = R.shape[0]
    W = Cm.shape[0]
    th, Hpad = _pick_tile(H, 256, 8)

    xb = x.astype(jnp.bfloat16)
    Rb = _pad2(R, Hpad, h).astype(jnp.bfloat16)
    Cb = Cm.astype(jnp.bfloat16)

    def kernel(x_ref, r_ref, c_ref, o_ref):
        tmp = jnp.dot(r_ref[...], x_ref[0], preferred_element_type=jnp.float32)
        o_ref[0] = jax.lax.dot_general(
            tmp.astype(jnp.bfloat16), c_ref[...], (((1,), (1,)), ((), ())),
            preferred_element_type=jnp.float32)

    out = pl.pallas_call(
        kernel,
        out_shape=jax.ShapeDtypeStruct((BC, Hpad, W), jnp.float32),
        grid=(BC, Hpad // th),
        in_specs=[
            pl.BlockSpec((1, h, w), lambda b, r: (b, 0, 0)),
            pl.BlockSpec((th, h), lambda b, r: (r, 0)),
            pl.BlockSpec((W, w), lambda b, r: (0, 0)),
        ],
        out_specs=pl.BlockSpec((1, th, W), lambda b, r: (b, r, 0)),
        compiler_params=pltpu.CompilerParams(
            dimension_semantics=("parallel", "parallel"),
            vmem_limit_bytes=_VMEM_LIMIT),
    )(xb, Rb, Cb)
    return out[:, :H, :]


# --------------------------------------------------------------------------- #
# Glue: interpolation matrices, Fourier positional encoding
# --------------------------------------------------------------------------- #
def _bilinear_matrix(out_size, in_size):
    """Row-interpolation matrix reproducing F.interpolate(mode='bilinear', align_corners=False)."""
    scale = in_size / out_size
    dst = jnp.arange(out_size, dtype=jnp.float32)
    src = (dst + 0.5) * scale - 0.5
    src = jnp.maximum(src, 0.0)
    i0 = jnp.floor(src)
    frac = src - i0
    i0 = jnp.minimum(i0.astype(jnp.int32), in_size - 1)
    i1 = jnp.minimum(i0 + 1, in_size - 1)
    m = (jax.nn.one_hot(i0, in_size, dtype=jnp.float32) * (1.0 - frac)[:, None]
         + jax.nn.one_hot(i1, in_size, dtype=jnp.float32) * frac[:, None])
    return m


def _pe_encode(coords, gauss):
    """Random-Fourier positional encoding (coords in [0,1], last dim = 2)."""
    c = 2.0 * coords - 1.0
    proj = c @ gauss * (2.0 * jnp.pi)
    return jnp.concatenate([jnp.sin(proj), jnp.cos(proj)], axis=-1)


# --------------------------------------------------------------------------- #
# Sub-modules (synthesized SAM-style components)
# --------------------------------------------------------------------------- #
def _attn_module(xq, xk, xv, p, pre, residual=None, q_add=None, k_add=None):
    """Attention block.  Effective inputs are (xq + q_add), (xk + k_add), xv; the adds
    are fused into the projection kernels.  1/sqrt(D) is folded into the q weights."""
    B, Tq, D = xq.shape
    Tk = xk.shape[1]
    scale = 1.0 / math.sqrt(D)
    wq = p[pre + "_wq"] * scale
    bq = p[pre + "_bq"] * scale
    wk, wv = p[pre + "_wk"], p[pre + "_wv"]
    bk, bv = p[pre + "_bk"], p[pre + "_bv"]
    xq2d = xq.reshape(B * Tq, D)
    xk2d = xk.reshape(B * Tk, D)
    xv2d = xv.reshape(B * Tk, D)
    qa2d = None if q_add is None else q_add.reshape(B * Tq, D)
    ka2d = None if k_add is None else k_add.reshape(B * Tk, D)

    if xq is xk and xk is xv and q_add is None and k_add is None:
        # fused QKV projection (encoder self-attention)
        qkv = _linear(xq2d, jnp.concatenate([wq, wk, wv], axis=1),
                      jnp.concatenate([bq, bk, bv], axis=0))
        q = qkv[:, :D].reshape(B, Tq, D)
        k = qkv[:, D:2 * D].reshape(B, Tq, D)
        v = qkv[:, 2 * D:].reshape(B, Tq, D)
    else:
        q = _linear(xq2d, wq, bq, x_add=qa2d).reshape(B, Tq, D)
        k = _linear(xk2d, wk, bk, x_add=ka2d).reshape(B, Tk, D)
        v = _linear(xv2d, wv, bv).reshape(B, Tk, D)

    o = _attention(q, k, v)
    res2d = None if residual is None else residual.reshape(B * Tq, D)
    out = _linear(o.reshape(B * Tq, D), p[pre + "_wo"], p[pre + "_bo"],
                  residual=res2d)                  # residual add fused into o-proj
    return out.reshape(B, Tq, D)


def image_encoder(image_nhwc, p):
    B, H, W, Cin = image_nhwc.shape
    patch = p["patch_size"]
    D = p["embed_dim"]
    Hp, Wp = H // patch, W // patch
    N = Hp * Wp
    # patchify (glue) + patch-embed matmul with the pos_embed add fused as residual
    x = image_nhwc.reshape(B, Hp, patch, Wp, patch, Cin)
    x = x.transpose(0, 1, 3, 2, 4, 5).reshape(B * N, patch * patch * Cin)
    pos = jnp.broadcast_to(p["pos_embed"][None], (B, N, D)).reshape(B * N, D)
    x2d = _linear(x, p["patch_w"], p["patch_b"], residual=pos)
    # one transformer block
    # TODO(synk): LN1/LN2 could be fused into the following matmul prologues.
    h = _layernorm(x2d, p["ln1_g"], p["ln1_b"]).reshape(B, N, D)
    x = _attn_module(h, h, h, p, "enc_attn",
                     residual=x2d.reshape(B, N, D))            # x + attn(LN1(x))
    x2d = x.reshape(B * N, D)
    h = _layernorm(x2d, p["ln2_g"], p["ln2_b"])
    h = _linear(h, p["mlp_w1"], p["mlp_b1"], activation="gelu")
    x2d = _linear(h, p["mlp_w2"], p["mlp_b2"], residual=x2d)   # x + mlp(LN2(x))
    # neck (1x1 conv == per-pixel linear)
    x2d = _linear(x2d, p["neck_w"], p["neck_b"])
    return x2d.reshape(B, Hp, Wp, D), None


def prompt_encoder(boxes, p, image_hw, embed_hw):
    """boxes: (B, nb, 4) -> sparse (B, 2, D), dense (B, Hp, Wp, D)."""
    B = boxes.shape[0]
    D = p["embed_dim"]
    H_img, W_img = image_hw
    coords = boxes.reshape(B, 2, 2) + 0.5
    coords = coords / jnp.array([W_img, H_img], jnp.float32)
    sparse = _pe_encode(coords, p["pe_gauss"]) + p["point_embed"][None]
    Hp, Wp = embed_hw
    dense = jnp.broadcast_to(p["no_mask_embed"][None, None, None, :], (B, Hp, Wp, D))
    return sparse.astype(jnp.float32), dense.astype(jnp.float32)


def get_dense_pe(p, embed_hw):
    Hp, Wp = embed_hw
    ys = (jnp.arange(Hp, dtype=jnp.float32) + 0.5) / Hp
    xs = (jnp.arange(Wp, dtype=jnp.float32) + 0.5) / Wp
    gx, gy = jnp.meshgrid(xs, ys, indexing="xy")
    grid = jnp.stack([gx, gy], axis=-1)
    return _pe_encode(grid, p["pe_gauss"])[None]


def _two_way_block(tokens, src, tok_pe, src_pe, p):
    B, T, D = tokens.shape
    N = src.shape[1]
    # self attention on tokens (tiny -> XLA fallback inside the kernels)
    a = _attn_module(tokens, tokens, tokens, p, "dec_self",
                     residual=tokens, q_add=tok_pe, k_add=tok_pe)
    tokens = _layernorm(a.reshape(B * T, D), p["dln1_g"], p["dln1_b"]).reshape(B, T, D)
    # cross attention token -> image (pe adds fused into the q/k projections)
    a = _attn_module(tokens, src, src, p, "dec_t2i",
                     residual=tokens, q_add=tok_pe, k_add=src_pe)
    tokens = _layernorm(a.reshape(B * T, D), p["dln2_g"], p["dln2_b"]).reshape(B, T, D)
    # mlp on tokens
    h = _linear(tokens.reshape(B * T, D), p["dmlp_w1"], p["dmlp_b1"], activation="relu")
    h = _linear(h, p["dmlp_w2"], p["dmlp_b2"], residual=tokens.reshape(B * T, D))
    tokens = _layernorm(h, p["dln3_g"], p["dln3_b"]).reshape(B, T, D)
    # cross attention image -> token (big path: pe add fused into q-proj,
    # residual fused into o-proj, LN row-tiled)
    a = _attn_module(src, tokens, tokens, p, "dec_i2t",
                     residual=src, q_add=src_pe, k_add=tok_pe)
    src = _layernorm(a.reshape(B * N, D), p["dln4_g"], p["dln4_b"]).reshape(B, N, D)
    return tokens, src


def mask_decoder(image_embeddings, image_pe, sparse, dense, p, multimask_output=False):
    B, Hp, Wp, D = image_embeddings.shape
    num_mask_tokens = p["mask_tokens"].shape[0]
    out_tokens = jnp.concatenate([p["iou_token"], p["mask_tokens"]], axis=0)
    tokens = jnp.concatenate(
        [jnp.broadcast_to(out_tokens[None], (B,) + out_tokens.shape), sparse], axis=1)
    T = tokens.shape[1]
    N = Hp * Wp
    # TODO(synk): `dense` is a constant vector; it could be folded into downstream biases.
    src = (image_embeddings + dense.astype(image_embeddings.dtype)).reshape(B, N, D)
    pos_src = jnp.broadcast_to(image_pe.reshape(1, N, D), (B, N, D)).astype(jnp.bfloat16)
    tok_pe = tokens

    tokens, src = _two_way_block(tokens, src, tok_pe, pos_src, p)
    # final attention token -> image (pe adds fused into the q/k projections)
    a = _attn_module(tokens, src, src, p, "dec_final",
                     residual=tokens, q_add=tok_pe, k_add=pos_src)
    tokens = _layernorm(a.reshape(B * T, D), p["dln5_g"], p["dln5_b"]).reshape(B, T, D)

    iou_token_out = tokens[:, 0, :]
    mask_tokens_out = tokens[:, 1:1 + num_mask_tokens, :]

    # output upscaling: ConvTranspose2d(k=2,s=2) == per-pixel matmul + pixel shuffle
    # TODO(synk): the pixel-shuffle interleave could be fused into the matmul output
    #             BlockSpec index_map instead of an XLA transpose between kernels.
    D4, D8 = D // 4, D // 8
    up1 = _linear(src.reshape(B * N, D), p["up1_w"], p["up1_b"])
    up1 = up1.reshape(B, Hp, Wp, 2, 2, D4).transpose(0, 1, 3, 2, 4, 5).reshape(B, 2 * Hp, 2 * Wp, D4)
    up1 = _layernorm(up1.reshape(-1, D4), p["upln_g"], p["upln_b"], activation="gelu")
    up2 = _linear(up1, p["up2_w"], p["up2_b"], activation="gelu")       # bf16 out
    up2 = up2.reshape(B, 2 * Hp, 2 * Wp, 2, 2, D8).transpose(0, 1, 3, 2, 4, 5)
    up2 = up2.reshape(B, 4 * Hp, 4 * Wp, D8)

    # hypernetwork head (shared MLP across mask tokens, tiny -> XLA inside _linear)
    # TODO(synk): SAM uses one separate 3-layer MLP per mask token; a shared 2-layer MLP is used here.
    h = _linear(mask_tokens_out.reshape(B * num_mask_tokens, D),
                p["hyp_w1"], p["hyp_b1"], activation="relu")
    hyper_in = _linear(h, p["hyp_w2"], p["hyp_b2"]).reshape(B, num_mask_tokens, D8)

    up_flat = up2.reshape(B, 4 * Hp * 4 * Wp, D8)                       # stays bf16
    masks = _batched_hyper_matmul(hyper_in, up_flat).reshape(B, num_mask_tokens, 4 * Hp, 4 * Wp)

    iou_pred = _linear(iou_token_out, p["iou_w"], p["iou_b"])

    if multimask_output:
        masks = masks[:, 1:, :, :]
    else:
        masks = masks[:, 0:1, :, :]
    return masks, iou_pred


# --------------------------------------------------------------------------- #
# MedSAM.forward
# --------------------------------------------------------------------------- #
def medsam_forward(params, image_nchw, box):
    """image: (B,3,H,W) NCHW float, box: (B,4) -> ori_res_masks (B,1,H,W)."""
    B, Cin, H, W = image_nchw.shape
    image = jnp.transpose(image_nchw, (0, 2, 3, 1)).astype(jnp.float32)

    image_embedding, _ = image_encoder(image, params)

    # "with torch.no_grad()" branch: prompt encoder is frozen -> stop_gradient
    box_arr = jnp.asarray(box, dtype=jnp.float32)
    if box_arr.ndim == 2:
        box_arr = box_arr[:, None, :]
    embed_hw = image_embedding.shape[1:3]
    sparse, dense = prompt_encoder(jax.lax.stop_gradient(box_arr), params, (H, W), embed_hw)
    sparse = jax.lax.stop_gradient(sparse)
    dense = jax.lax.stop_gradient(dense)

    image_pe = get_dense_pe(params, embed_hw)
    low_res_masks, _ = mask_decoder(image_embedding, image_pe, sparse, dense, params,
                                    multimask_output=False)

    # F.interpolate(low_res_masks, size=(H, W), mode="bilinear", align_corners=False)
    Bm, Cm, h, w = low_res_masks.shape
    Rm = _bilinear_matrix(H, h)
    Cmat = _bilinear_matrix(W, w)
    ori = _bilinear_resize(low_res_masks.reshape(Bm * Cm, h, w), Rm, Cmat)
    return ori.reshape(Bm, Cm, H, W)


# --------------------------------------------------------------------------- #
# Deterministic parameter init
# --------------------------------------------------------------------------- #
def init_params(key, *, embed_dim=128, patch_size=16, in_chans=3, img_size=64,
                mlp_hidden=256, num_mask_tokens=4):
    D = embed_dim
    Hp = img_size // patch_size
    N = Hp * Hp
    ks = iter(jax.random.split(key, 128))

    def w(shape):
        return jax.random.normal(next(ks), shape, jnp.float32) / math.sqrt(shape[0])

    def small(shape, s=0.02):
        return jax.random.normal(next(ks), shape, jnp.float32) * s

    z = lambda shape: jnp.zeros(shape, jnp.float32)
    o = lambda shape: jnp.ones(shape, jnp.float32)

    p = {"embed_dim": D, "patch_size": patch_size}

    def add_attn(pre):
        for n in ["q", "k", "v", "o"]:
            p[f"{pre}_w{n}"] = w((D, D))
            p[f"{pre}_b{n}"] = z((D,))

    # image encoder
    p["patch_w"] = w((patch_size * patch_size * in_chans, D)); p["patch_b"] = z((D,))
    p["pos_embed"] = small((N, D))
    p["ln1_g"] = o((D,)); p["ln1_b"] = z((D,))
    p["ln2_g"] = o((D,)); p["ln2_b"] = z((D,))
    add_attn("enc_attn")
    p["mlp_w1"] = w((D, mlp_hidden)); p["mlp_b1"] = z((mlp_hidden,))
    p["mlp_w2"] = w((mlp_hidden, D)); p["mlp_b2"] = z((D,))
    p["neck_w"] = w((D, D)); p["neck_b"] = z((D,))
    # prompt encoder
    p["pe_gauss"] = jax.random.normal(next(ks), (2, D // 2), jnp.float32)
    p["point_embed"] = small((2, D))
    p["no_mask_embed"] = small((D,))
    # mask decoder
    p["iou_token"] = small((1, D))
    p["mask_tokens"] = small((num_mask_tokens, D))
    for pre in ["dec_self", "dec_t2i", "dec_i2t", "dec_final"]:
        add_attn(pre)
    for i in range(1, 6):
        p[f"dln{i}_g"] = o((D,)); p[f"dln{i}_b"] = z((D,))
    p["dmlp_w1"] = w((D, mlp_hidden)); p["dmlp_b1"] = z((mlp_hidden,))
    p["dmlp_w2"] = w((mlp_hidden, D)); p["dmlp_b2"] = z((D,))
    D4, D8 = D // 4, D // 8
    p["up1_w"] = w((D, 4 * D4)); p["up1_b"] = z((4 * D4,))
    p["upln_g"] = o((D4,)); p["upln_b"] = z((D4,))
    p["up2_w"] = w((D4, 4 * D8)); p["up2_b"] = z((4 * D8,))
    p["hyp_w1"] = w((D, D)); p["hyp_b1"] = z((D,))
    p["hyp_w2"] = w((D, D8)); p["hyp_b2"] = z((D8,))
    p["iou_w"] = w((D, num_mask_tokens)); p["iou_b"] = z((num_mask_tokens,))
    return p


# --------------------------------------------------------------------------- #
if __name__ == "__main__":
    key = jax.random.PRNGKey(0)
    pkey, ikey, bkey = jax.random.split(key, 3)

    B, Cin, H, W = 2, 3, 64, 64
    params = init_params(pkey, embed_dim=128, patch_size=16, in_chans=Cin, img_size=H)

    image = jax.random.normal(ikey, (B, Cin, H, W), jnp.float32)
    xy0 = jax.random.uniform(bkey, (B, 2), minval=0.0, maxval=H / 2)
    box = jnp.concatenate([xy0, xy0 + H / 2], axis=-1)  # (B, 4): x0, y0, x1, y1

    fwd = jax.jit(functools.partial(medsam_forward, params))
    out = fwd(image, box)
    out = jax.block_until_ready(out)

    assert out.shape == (B, 1, H, W), out.shape
    assert bool(jnp.all(jnp.isfinite(out)))
    print("KERNEL_OK")
</pallas_src>

<mosaic_0001>
module attributes {stable_mosaic.version = 11 : i64} {
  func.func @kernel(%arg0: i32, %arg1: i32, %arg2: memref<32x768xbf16, #tpu.memory_space<vmem>>, %arg3: memref<768x128xbf16, #tpu.memory_space<vmem>>, %arg4: memref<1x128xf32, #tpu.memory_space<vmem>>, %arg5: memref<32x128xbf16, #tpu.memory_space<vmem>>, %arg6: memref<32x128xbf16, #tpu.memory_space<vmem>>) attributes {dimension_semantics = [#tpu.dimension_semantics<parallel>, #tpu.dimension_semantics<parallel>], iteration_bounds = array<i64: 1, 1>, scalar_prefetch = 0 : i64, scratch_operands = 0 : i64, tpu.core_type = #tpu.core_type<tc>, window_params = [{transform_indices = @transform_0, window_bounds = array<i64: 32, 768>}, {transform_indices = @transform_1, window_bounds = array<i64: 768, 128>}, {transform_indices = @transform_2, window_bounds = array<i64: 1, 128>}, {transform_indices = @transform_3, window_bounds = array<i64: 32, 128>}, {transform_indices = @transform_4, window_bounds = array<i64: 32, 128>}]} {
    %c0 = arith.constant 0 : index
    %c0_0 = arith.constant 0 : index
    %0 = vector.load %arg2[%c0, %c0_0] : memref<32x768xbf16, #tpu.memory_space<vmem>>, vector<32x768xbf16>
    %c0_1 = arith.constant 0 : index
    %c0_2 = arith.constant 0 : index
    %1 = vector.load %arg3[%c0_1, %c0_2] : memref<768x128xbf16, #tpu.memory_space<vmem>>, vector<768x128xbf16>
    %cst = arith.constant dense<0.000000e+00> : vector<32x128xf32>
    %2 = tpu.matmul %0, %1, %cst {dimension_numbers = #tpu.dot_dimension_numbers<[1], [0], [0], [1], [0, 0, 1, 1], [], []>} : vector<32x768xbf16>, vector<768x128xbf16>, vector<32x128xf32> -> vector<32x128xf32>
    %c0_3 = arith.constant 0 : index
    %c0_4 = arith.constant 0 : index
    %3 = vector.load %arg4[%c0_3, %c0_4] : memref<1x128xf32, #tpu.memory_space<vmem>>, vector<1x128xf32>
    %4 = vector.broadcast %3 : vector<1x128xf32> to vector<32x128xf32>
    %5 = arith.addf %2, %4 : vector<32x128xf32>
    %c0_5 = arith.constant 0 : index
    %c0_6 = arith.constant 0 : index
    %6 = vector.load %arg5[%c0_5, %c0_6] : memref<32x128xbf16, #tpu.memory_space<vmem>>, vector<32x128xbf16>
    %7 = arith.extf %6 : vector<32x128xbf16> to vector<32x128xf32>
    %8 = arith.addf %5, %7 : vector<32x128xf32>
    %9 = arith.truncf %8 : vector<32x128xf32> to vector<32x128xbf16>
    %c0_7 = arith.constant 0 : index
    %c0_8 = arith.constant 0 : index
    %10 = vector.load %arg6[%c0_7, %c0_8] : memref<32x128xbf16, #tpu.memory_space<vmem>>, vector<32x128xbf16>
    tpu.vector_store %arg6[%c0_7, %c0_8], %9 {strides = array<i32>} : memref<32x128xbf16, #tpu.memory_space<vmem>>, vector<32x128xbf16>,
    return
  }
  func.func @transform_0(%arg0: i32, %arg1: i32) -> (i32, i32) {
    %c0_i32 = arith.constant 0 : i32
    %c0_i32_0 = arith.constant 0 : i32
    return %arg0, %c0_i32 : i32, i32
  }
  func.func @transform_1(%arg0: i32, %arg1: i32) -> (i32, i32) {
    %c0_i32 = arith.constant 0 : i32
    %c0_i32_0 = arith.constant 0 : i32
    return %c0_i32, %arg1 : i32, i32
  }
  func.func @transform_2(%arg0: i32, %arg1: i32) -> (i32, i32) {
    %c0_i32 = arith.constant 0 : i32
    %c0_i32_0 = arith.constant 0 : i32
    return %c0_i32, %arg1 : i32, i32
  }
  func.func @transform_3(%arg0: i32, %arg1: i32) -> (i32, i32) {
    %c0_i32 = arith.constant 0 : i32
    return %arg0, %arg1 : i32, i32
  }
  func.func @transform_4(%arg0: i32, %arg1: i32) -> (i32, i32) {
    %c0_i32 = arith.constant 0 : i32
    return %arg0, %arg1 : i32, i32
  }
}

module attributes {stable_mosaic.version = 11 : i64} {
  func.func @kernel(%arg0: i32, %arg1: memref<32x128xbf16, #tpu.memory_space<vmem>>, %arg2: memref<1x128xf32, #tpu.memory_space<vmem>>, %arg3: memref<1x128xf32, #tpu.memory_space<vmem>>, %arg4: memref<32x128xbf16, #tpu.memory_space<vmem>>) attributes {dimension_semantics = [#tpu.dimension_semantics<parallel>], iteration_bounds = array<i64: 1>, scalar_prefetch = 0 : i64, scratch_operands = 0 : i64, tpu.core_type = #tpu.core_type<tc>, window_params = [{transform_indices = @transform_0, window_bounds = array<i64: 32, 128>}, {pipeline_mode = #tpu.pipeline_mode<synchronous>, transform_indices = @transform_1, window_bounds = array<i64: 1, 128>}, {pipeline_mode = #tpu.pipeline_mode<synchronous>, transform_indices = @transform_2, window_bounds = array<i64: 1, 128>}, {transform_indices = @transform_3, window_bounds = array<i64: 32, 128>}]} {
    %c0 = arith.constant 0 : index
    %c0_0 = arith.constant 0 : index
    %0 = vector.load %arg1[%c0, %c0_0] : memref<32x128xbf16, #tpu.memory_space<vmem>>, vector<32x128xbf16>
    %1 = arith.extf %0 : vector<32x128xbf16> to vector<32x128xf32>
    %cst = arith.constant dense<0.000000e+00> : vector<32xf32>
    %2 = vector.multi_reduction <add>, %1, %cst [1] : vector<32x128xf32> to vector<32xf32>
    %3 = vector.shape_cast %2 : vector<32xf32> to vector<32x1xf32>
    %cst_1 = arith.constant 1.280000e+02 : f32
    %4 = vector.broadcast %cst_1 : f32 to vector<32x1xf32>
    %5 = arith.divf %3, %4 : vector<32x1xf32>
    %6 = vector.broadcast %5 : vector<32x1xf32> to vector<32x128xf32>
    %7 = arith.subf %1, %6 : vector<32x128xf32>
    %8 = arith.mulf %7, %7 : vector<32x128xf32>
    %cst_2 = arith.constant dense<0.000000e+00> : vector<32xf32>
    %9 = vector.multi_reduction <add>, %8, %cst_2 [1] : vector<32x128xf32> to vector<32xf32>
    %10 = vector.shape_cast %9 : vector<32xf32> to vector<32x1xf32>
    %cst_3 = arith.constant 1.280000e+02 : f32
    %11 = vector.broadcast %cst_3 : f32 to vector<32x1xf32>
    %12 = arith.divf %10, %11 : vector<32x1xf32>
    %13 = vector.broadcast %5 : vector<32x1xf32> to vector<32x128xf32>
    %14 = arith.subf %1, %13 : vector<32x128xf32>
    %cst_4 = arith.constant 9.99999997E-7 : f32
    %15 = vector.broadcast %cst_4 : f32 to vector<32x1xf32>
    %16 = arith.addf %12, %15 : vector<32x1xf32>
    %17 = math.rsqrt %16 : vector<32x1xf32>
    %18 = vector.broadcast %17 : vector<32x1xf32> to vector<32x128xf32>
    %19 = arith.mulf %14, %18 : vector<32x128xf32>
    %c0_5 = arith.constant 0 : index
    %c0_6 = arith.constant 0 : index
    %20 = vector.load %arg2[%c0_5, %c0_6] : memref<1x128xf32, #tpu.memory_space<vmem>>, vector<1x128xf32>
    %21 = vector.broadcast %20 : vector<1x128xf32> to vector<32x128xf32>
    %22 = arith.mulf %19, %21 : vector<32x128xf32>
    %c0_7 = arith.constant 0 : index
    %c0_8 = arith.constant 0 : index
    %23 = vector.load %arg3[%c0_7, %c0_8] : memref<1x128xf32, #tpu.memory_space<vmem>>, vector<1x128xf32>
    %24 = vector.broadcast %23 : vector<1x128xf32> to vector<32x128xf32>
    %25 = arith.addf %22, %24 : vector<32x128xf32>
    %26 = arith.truncf %25 : vector<32x128xf32> to vector<32x128xbf16>
    %c0_9 = arith.constant 0 : index
    %c0_10 = arith.constant 0 : index
    %27 = vector.load %arg4[%c0_9, %c0_10] : memref<32x128xbf16, #tpu.memory_space<vmem>>, vector<32x128xbf16>
    tpu.vector_store %arg4[%c0_9, %c0_10], %26 {strides = array<i32>} : memref<32x128xbf16, #tpu.memory_space<vmem>>, vector<32x128xbf16>,
    return
  }
  func.func @transform_0(%arg0: i32) -> (i32, i32) {
    %c0_i32 = arith.constant 0 : i32
    %c0_i32_0 = arith.constant 0 : i32
    return %arg0, %c0_i32 : i32, i32
  }
  func.func @transform_1(%arg0: i32) -> (i32, i32) {
    %c0_i32 = arith.constant 0 : i32
    %c0_i32_0 = arith.constant 0 : i32
    %c0_i32_1 = arith.constant 0 : i32
    return %c0_i32, %c0_i32_0 : i32, i32
  }
  func.func @transform_2(%arg0: i32) -> (i32, i32) {
    %c0_i32 = arith.constant 0 : i32
    %c0_i32_0 = arith.constant 0 : i32
    %c0_i32_1 = arith.constant 0 : i32
    return %c0_i32, %c0_i32_0 : i32, i32
  }
  func.func @transform_3(%arg0: i32) -> (i32, i32) {
    %c0_i32 = arith.constant 0 : i32
    %c0_i32_0 = arith.constant 0 : i32
    return %arg0, %c0_i32 : i32, i32
  }
}

module attributes {stable_mosaic.version = 11 : i64} {
  func.func @kernel(%arg0: i32, %arg1: i32, %arg2: memref<32x128xbf16, #tpu.memory_space<vmem>>, %arg3: memref<128x384xbf16, #tpu.memory_space<vmem>>, %arg4: memref<1x384xf32, #tpu.memory_space<vmem>>, %arg5: memref<32x384xbf16, #tpu.memory_space<vmem>>) attributes {dimension_semantics = [#tpu.dimension_semantics<parallel>, #tpu.dimension_semantics<parallel>], iteration_bounds = array<i64: 1, 1>, scalar_prefetch = 0 : i64, scratch_operands = 0 : i64, tpu.core_type = #tpu.core_type<tc>, window_params = [{transform_indices = @transform_0, window_bounds = array<i64: 32, 128>}, {transform_indices = @transform_1, window_bounds = array<i64: 128, 384>}, {transform_indices = @transform_2, window_bounds = array<i64: 1, 384>}, {transform_indices = @transform_3, window_bounds = array<i64: 32, 384>}]} {
    %c0 = arith.constant 0 : index
    %c0_0 = arith.constant 0 : index
    %0 = vector.load %arg2[%c0, %c0_0] : memref<32x128xbf16, #tpu.memory_space<vmem>>, vector<32x128xbf16>
    %c0_1 = arith.constant 0 : index
    %c0_2 = arith.constant 0 : index
    %1 = vector.load %arg3[%c0_1, %c0_2] : memref<128x384xbf16, #tpu.memory_space<vmem>>, vector<128x384xbf16>
    %cst = arith.constant dense<0.000000e+00> : vector<32x384xf32>
    %2 = tpu.matmul %0, %1, %cst {dimension_numbers = #tpu.dot_dimension_numbers<[1], [0], [0], [1], [0, 0, 1, 1], [], []>} : vector<32x128xbf16>, vector<128x384xbf16>, vector<32x384xf32> -> vector<32x384xf32>
    %c0_3 = arith.constant 0 : index
    %c0_4 = arith.constant 0 : index
    %3 = vector.load %arg4[%c0_3, %c0_4] : memref<1x384xf32, #tpu.memory_space<vmem>>, vector<1x384xf32>
    %4 = vector.broadcast %3 : vector<1x384xf32> to vector<32x384xf32>
    %5 = arith.addf %2, %4 : vector<32x384xf32>
    %6 = arith.truncf %5 : vector<32x384xf32> to vector<32x384xbf16>
    %c0_5 = arith.constant 0 : index
    %c0_6 = arith.constant 0 : index
    %7 = vector.load %arg5[%c0_5, %c0_6] : memref<32x384xbf16, #tpu.memory_space<vmem>>, vector<32x384xbf16>
    tpu.vector_store %arg5[%c0_5, %c0_6], %6 {strides = array<i32>} : memref<32x384xbf16, #tpu.memory_space<vmem>>, vector<32x384xbf16>,
    return
  }
  func.func @transform_0(%arg0: i32, %arg1: i32) -> (i32, i32) {
    %c0_i32 = arith.constant 0 : i32
    %c0_i32_0 = arith.constant 0 : i32
    return %arg0, %c0_i32 : i32, i32
  }
  func.func @transform_1(%arg0: i32, %arg1: i32) -> (i32, i32) {
    %c0_i32 = arith.constant 0 : i32
    %c0_i32_0 = arith.constant 0 : i32
    return %c0_i32, %arg1 : i32, i32
  }
  func.func @transform_2(%arg0: i32, %arg1: i32) -> (i32, i32) {
    %c0_i32 = arith.constant 0 : i32
    %c0_i32_0 = arith.constant 0 : i32
    return %c0_i32, %arg1 : i32, i32
  }
  func.func @transform_3(%arg0: i32, %arg1: i32) -> (i32, i32) {
    %c0_i32 = arith.constant 0 : i32
    return %arg0, %arg1 : i32, i32
  }
}

module attributes {stable_mosaic.version = 11 : i64} {
  func.func @kernel(%arg0: i32, %arg1: i32, %arg2: i32, %arg3: memref<1x16x128xbf16, #tpu.memory_space<vmem>>, %arg4: memref<1x16x128xbf16, #tpu.memory_space<vmem>>, %arg5: memref<1x16x128xbf16, #tpu.memory_space<vmem>>, %arg6: memref<1x16x128xbf16, #tpu.memory_space<vmem>>, %arg7: memref<16x1xf32, #tpu.memory_space<vmem>>, %arg8: memref<16x1xf32, #tpu.memory_space<vmem>>, %arg9: memref<16x128xf32, #tpu.memory_space<vmem>>) attributes {dimension_semantics = [#tpu.dimension_semantics<parallel>, #tpu.dimension_semantics<parallel>, #tpu.dimension_semantics<arbitrary>], iteration_bounds = array<i64: 2, 1, 1>, scalar_prefetch = 0 : i64, scratch_operands = 3 : i64, tpu.core_type = #tpu.core_type<tc>, window_params = [{transform_indices = @transform_0, window_bounds = array<i64: 1, 16, 128>}, {transform_indices = @transform_1, window_bounds = array<i64: 1, 16, 128>}, {transform_indices = @transform_2, window_bounds = array<i64: 1, 16, 128>}, {transform_indices = @transform_3, window_bounds = array<i64: 1, 16, 128>}]} {
    %c0_i32 = arith.constant 0 : i32
    %0 = arith.cmpi eq, %arg2, %c0_i32 : i32
    %1 = arith.extui %0 : i1 to i32
    %c0_i32_0 = arith.constant 0 : i32
    %2 = arith.cmpi ne, %1, %c0_i32_0 : i32
    scf.if %2 {
      %cst_26 = arith.constant -1.000000e+30 : f32
      %36 = vector.broadcast %cst_26 : f32 to vector<16x1xf32>
      %c0_27 = arith.constant 0 : index
      %c0_28 = arith.constant 0 : index
      %37 = vector.load %arg7[%c0_27, %c0_28] : memref<16x1xf32, #tpu.memory_space<vmem>>, vector<16x1xf32>
      tpu.vector_store %arg7[%c0_27, %c0_28], %36 {strides = array<i32>} : memref<16x1xf32, #tpu.memory_space<vmem>>, vector<16x1xf32>,
      %cst_29 = arith.constant 0.000000e+00 : f32
      %38 = vector.broadcast %cst_29 : f32 to vector<16x1xf32>
      %c0_30 = arith.constant 0 : index
      %c0_31 = arith.constant 0 : index
      %39 = vector.load %arg8[%c0_30, %c0_31] : memref<16x1xf32, #tpu.memory_space<vmem>>, vector<16x1xf32>
      tpu.vector_store %arg8[%c0_30, %c0_31], %38 {strides = array<i32>} : memref<16x1xf32, #tpu.memory_space<vmem>>, vector<16x1xf32>,
      %cst_32 = arith.constant 0.000000e+00 : f32
      %40 = vector.broadcast %cst_32 : f32 to vector<16x128xf32>
      %c0_33 = arith.constant 0 : index
      %c0_34 = arith.constant 0 : index
      %41 = vector.load %arg9[%c0_33, %c0_34] : memref<16x128xf32, #tpu.memory_space<vmem>>, vector<16x128xf32>
      tpu.vector_store %arg9[%c0_33, %c0_34], %40 {strides = array<i32>} : memref<16x128xf32, #tpu.memory_space<vmem>>, vector<16x128xf32>,
    } else {
    }
    %c0 = arith.constant 0 : index
    %c0_1 = arith.constant 0 : index
    %c0_2 = arith.constant 0 : index
    %3 = vector.load %arg3[%c0, %c0_1, %c0_2] : memref<1x16x128xbf16, #tpu.memory_space<vmem>>, vector<1x16x128xbf16>
    %4 = vector.shape_cast %3 : vector<1x16x128xbf16> to vector<16x128xbf16>
    %c0_3 = arith.constant 0 : index
    %c0_4 = arith.constant 0 : index
    %c0_5 = arith.constant 0 : index
    %5 = vector.load %arg4[%c0_3, %c0_4, %c0_5] : memref<1x16x128xbf16, #tpu.memory_space<vmem>>, vector<1x16x128xbf16>
    %6 = vector.shape_cast %5 : vector<1x16x128xbf16> to vector<16x128xbf16>
    %cst = arith.constant dense<0.000000e+00> : vector<16x16xf32>
    %7 = tpu.matmul %4, %6, %cst {dimension_numbers = #tpu.dot_dimension_numbers<[1], [1], [0], [0], [0, 0, 1, 0], [], []>} : vector<16x128xbf16>, vector<16x128xbf16>, vector<16x16xf32> -> vector<16x16xf32>
    %c0_6 = arith.constant 0 : index
    %c0_7 = arith.constant 0 : index
    %8 = vector.load %arg7[%c0_6, %c0_7] : memref<16x1xf32, #tpu.memory_space<vmem>>, vector<16x1xf32>
    %cst_8 = arith.constant dense<0xFF800000> : vector<16xf32>
    %9 = vector.multi_reduction <maximumf>, %7, %cst_8 [1] : vector<16x16xf32> to vector<16xf32>
    %10 = vector.shape_cast %9 : vector<16xf32> to vector<16x1xf32>
    %11 = arith.maximumf %8, %10 : vector<16x1xf32>
    %12 = arith.subf %8, %11 : vector<16x1xf32>
    %13 = math.exp %12 : vector<16x1xf32>
    %14 = vector.broadcast %11 : vector<16x1xf32> to vector<16x16xf32>
    %15 = arith.subf %7, %14 : vector<16x16xf32>
    %16 = math.exp %15 : vector<16x16xf32>
    %c0_9 = arith.constant 0 : index
    %c0_10 = arith.constant 0 : index
    %17 = vector.load %arg8[%c0_9, %c0_10] : memref<16x1xf32, #tpu.memory_space<vmem>>, vector<16x1xf32>
    %18 = arith.mulf %13, %17 : vector<16x1xf32>
    %cst_11 = arith.constant dense<0.000000e+00> : vector<16xf32>
    %19 = vector.multi_reduction <add>, %16, %cst_11 [1] : vector<16x16xf32> to vector<16xf32>
    %20 = vector.shape_cast %19 : vector<16xf32> to vector<16x1xf32>
    %21 = arith.addf %18, %20 : vector<16x1xf32>
    %c0_12 = arith.constant 0 : index
    %c0_13 = arith.constant 0 : index
    %22 = vector.load %arg8[%c0_12, %c0_13] : memref<16x1xf32, #tpu.memory_space<vmem>>, vector<16x1xf32>
    tpu.vector_store %arg8[%c0_12, %c0_13], %21 {strides = array<i32>} : memref<16x1xf32, #tpu.memory_space<vmem>>, vector<16x1xf32>,
    %c0_14 = arith.constant 0 : index
    %c0_15 = arith.constant 0 : index
    %23 = vector.load %arg9[%c0_14, %c0_15] : memref<16x128xf32, #tpu.memory_space<vmem>>, vector<16x128xf32>
    %24 = vector.broadcast %13 : vector<16x1xf32> to vector<16x128xf32>
    %25 = arith.mulf %24, %23 : vector<16x128xf32>
    %26 = arith.truncf %16 : vector<16x16xf32> to vector<16x16xbf16>
    %c0_16 = arith.constant 0 : index
    %c0_17 = arith.constant 0 : index
    %c0_18 = arith.constant 0 : index
    %27 = vector.load %arg5[%c0_16, %c0_17, %c0_18] : memref<1x16x128xbf16, #tpu.memory_space<vmem>>, vector<1x16x128xbf16>
    %28 = vector.shape_cast %27 : vector<1x16x128xbf16> to vector<16x128xbf16>
    %cst_19 = arith.constant dense<0.000000e+00> : vector<16x128xf32>
    %29 = tpu.matmul %26, %28, %cst_19 {dimension_numbers = #tpu.dot_dimension_numbers<[1], [0], [0], [1], [0, 0, 1, 1], [], []>} : vector<16x16xbf16>, vector<16x128xbf16>, vector<16x128xf32> -> vector<16x128xf32>
    %30 = arith.addf %25, %29 : vector<16x128xf32>
    %c0_20 = arith.constant 0 : index
    %c0_21 = arith.constant 0 : index
    %31 = vector.load %arg9[%c0_20, %c0_21] : memref<16x128xf32, #tpu.memory_space<vmem>>, vector<16x128xf32>
    tpu.vector_store %arg9[%c0_20, %c0_21], %30 {strides = array<i32>} : memref<16x128xf32, #tpu.memory_space<vmem>>, vector<16x128xf32>,
    %c0_22 = arith.constant 0 : index
    %c0_23 = arith.constant 0 : index
    %32 = vector.load %arg7[%c0_22, %c0_23] : memref<16x1xf32, #tpu.memory_space<vmem>>, vector<16x1xf32>
    tpu.vector_store %arg7[%c0_22, %c0_23], %11 {strides = array<i32>} : memref<16x1xf32, #tpu.memory_space<vmem>>, vector<16x1xf32>,
    %c0_i32_24 = arith.constant 0 : i32
    %33 = arith.cmpi eq, %arg2, %c0_i32_24 : i32
    %34 = arith.extui %33 : i1 to i32
    %c0_i32_25 = arith.constant 0 : i32
    %35 = arith.cmpi ne, %34, %c0_i32_25 : i32
    scf.if %35 {
      %c0_26 = arith.constant 0 : index
      %c0_27 = arith.constant 0 : index
      %36 = vector.load %arg9[%c0_26, %c0_27] : memref<16x128xf32, #tpu.memory_space<vmem>>, vector<16x128xf32>
      %c0_28 = arith.constant 0 : index
      %c0_29 = arith.constant 0 : index
      %37 = vector.load %arg8[%c0_28, %c0_29] : memref<16x1xf32, #tpu.memory_space<vmem>>, vector<16x1xf32>
      %38 = tpu.reciprocal %37 {approx = true} : vector<16x1xf32> -> vector<16x1xf32>
      %39 = vector.broadcast %38 : vector<16x1xf32> to vector<16x128xf32>
      %40 = arith.mulf %36, %39 : vector<16x128xf32>
      %41 = arith.truncf %40 : vector<16x128xf32> to vector<16x128xbf16>
      %c0_30 = arith.constant 0 : index
      %c0_31 = arith.constant 0 : index
      %c0_32 = arith.constant 0 : index
      %42 = vector.load %arg6[%c0_30, %c0_31, %c0_32] : memref<1x16x128xbf16, #tpu.memory_space<vmem>>, vector<1x16x128xbf16>
      %43 = vector.shape_cast %42 : vector<1x16x128xbf16> to vector<16x128xbf16>
      %44 = vector.shape_cast %41 : vector<16x128xbf16> to vector<1x16x128xbf16>
      tpu.vector_store %arg6[%c0_30, %c0_31, %c0_32], %44 {strides = array<i32>} : memref<1x16x128xbf16, #tpu.memory_space<vmem>>, vector<1x16x128xbf16>,
    } else {
    }
    return
  }
  func.func @transform_0(%arg0: i32, %arg1: i32, %arg2: i32) -> (i32, i32, i32) {
    %c0_i32 = arith.constant 0 : i32
    %c0_i32_0 = arith.constant 0 : i32
    return %arg0, %arg1, %c0_i32 : i32, i32, i32
  }
  func.func @transform_1(%arg0: i32, %arg1: i32, %arg2: i32) -> (i32, i32, i32) {
    %c0_i32 = arith.constant 0 : i32
    %c0_i32_0 = arith.constant 0 : i32
    return %arg0, %arg2, %c0_i32 : i32, i32, i32
  }
  func.func @transform_2(%arg0: i32, %arg1: i32, %arg2: i32) -> (i32, i32, i32) {
    %c0_i32 = arith.constant 0 : i32
    %c0_i32_0 = arith.constant 0 : i32
    return %arg0, %arg2, %c0_i32 : i32, i32, i32
  }
  func.func @transform_3(%arg0: i32, %arg1: i32, %arg2: i32) -> (i32, i32, i32) {
    %c0_i32 = arith.constant 0 : i32
    %c0_i32_0 = arith.constant 0 : i32
    return %arg0, %arg1, %c0_i32 : i32, i32, i32
  }
}

module attributes {stable_mosaic.version = 11 : i64} {
  func.func @kernel(%arg0: i32, %arg1: i32, %arg2: memref<32x128xbf16, #tpu.memory_space<vmem>>, %arg3: memref<128x128xbf16, #tpu.memory_space<vmem>>, %arg4: memref<1x128xf32, #tpu.memory_space<vmem>>, %arg5: memref<32x128xbf16, #tpu.memory_space<vmem>>, %arg6: memref<32x128xbf16, #tpu.memory_space<vmem>>) attributes {dimension_semantics = [#tpu.dimension_semantics<parallel>, #tpu.dimension_semantics<parallel>], iteration_bounds = array<i64: 1, 1>, scalar_prefetch = 0 : i64, scratch_operands = 0 : i64, tpu.core_type = #tpu.core_type<tc>, window_params = [{transform_indices = @transform_0, window_bounds = array<i64: 32, 128>}, {transform_indices = @transform_1, window_bounds = array<i64: 128, 128>}, {transform_indices = @transform_2, window_bounds = array<i64: 1, 128>}, {transform_indices = @transform_3, window_bounds = array<i64: 32, 128>}, {transform_indices = @transform_4, window_bounds = array<i64: 32, 128>}]} {
    %c0 = arith.constant 0 : index
    %c0_0 = arith.constant 0 : index
    %0 = vector.load %arg2[%c0, %c0_0] : memref<32x128xbf16, #tpu.memory_space<vmem>>, vector<32x128xbf16>
    %c0_1 = arith.constant 0 : index
    %c0_2 = arith.constant 0 : index
    %1 = vector.load %arg3[%c0_1, %c0_2] : memref<128x128xbf16, #tpu.memory_space<vmem>>, vector<128x128xbf16>
    %cst = arith.constant dense<0.000000e+00> : vector<32x128xf32>
    %2 = tpu.matmul %0, %1, %cst {dimension_numbers = #tpu.dot_dimension_numbers<[1], [0], [0], [1], [0, 0, 1, 1], [], []>} : vector<32x128xbf16>, vector<128x128xbf16>, vector<32x128xf32> -> vector<32x128xf32>
    %c0_3 = arith.constant 0 : index
    %c0_4 = arith.constant 0 : index
    %3 = vector.load %arg4[%c0_3, %c0_4] : memref<1x128xf32, #tpu.memory_space<vmem>>, vector<1x128xf32>
    %4 = vector.broadcast %3 : vector<1x128xf32> to vector<32x128xf32>
    %5 = arith.addf %2, %4 : vector<32x128xf32>
    %c0_5 = arith.constant 0 : index
    %c0_6 = arith.constant 0 : index
    %6 = vector.load %arg5[%c0_5, %c0_6] : memref<32x128xbf16, #tpu.memory_space<vmem>>, vector<32x128xbf16>
    %7 = arith.extf %6 : vector<32x128xbf16> to vector<32x128xf32>
    %8 = arith.addf %5, %7 : vector<32x128xf32>
    %9 = arith.truncf %8 : vector<32x128xf32> to vector<32x128xbf16>
    %c0_7 = arith.constant 0 : index
    %c0_8 = arith.constant 0 : index
    %10 = vector.load %arg6[%c0_7, %c0_8] : memref<32x128xbf16, #tpu.memory_space<vmem>>, vector<32x128xbf16>
    tpu.vector_store %arg6[%c0_7, %c0_8], %9 {strides = array<i32>} : memref<32x128xbf16, #tpu.memory_space<vmem>>, vector<32x128xbf16>,
    return
  }
  func.func @transform_0(%arg0: i32, %arg1: i32) -> (i32, i32) {
    %c0_i32 = arith.constant 0 : i32
    %c0_i32_0 = arith.constant 0 : i32
    return %arg0, %c0_i32 : i32, i32
  }
  func.func @transform_1(%arg0: i32, %arg1: i32) -> (i32, i32) {
    %c0_i32 = arith.constant 0 : i32
    %c0_i32_0 = arith.constant 0 : i32
    return %c0_i32, %arg1 : i32, i32
  }
  func.func @transform_2(%arg0: i32, %arg1: i32) -> (i32, i32) {
    %c0_i32 = arith.constant 0 : i32
    %c0_i32_0 = arith.constant 0 : i32
    return %c0_i32, %arg1 : i32, i32
  }
  func.func @transform_3(%arg0: i32, %arg1: i32) -> (i32, i32) {
    %c0_i32 = arith.constant 0 : i32
    return %arg0, %arg1 : i32, i32
  }
  func.func @transform_4(%arg0: i32, %arg1: i32) -> (i32, i32) {
    %c0_i32 = arith.constant 0 : i32
    return %arg0, %arg1 : i32, i32
  }
}

module attributes {stable_mosaic.version = 11 : i64} {
  func.func @kernel(%arg0: i32, %arg1: i32, %arg2: memref<32x128xbf16, #tpu.memory_space<vmem>>, %arg3: memref<128x256xbf16, #tpu.memory_space<vmem>>, %arg4: memref<1x256xf32, #tpu.memory_space<vmem>>, %arg5: memref<32x256xbf16, #tpu.memory_space<vmem>>) attributes {dimension_semantics = [#tpu.dimension_semantics<parallel>, #tpu.dimension_semantics<parallel>], iteration_bounds = array<i64: 1, 1>, scalar_prefetch = 0 : i64, scratch_operands = 0 : i64, tpu.core_type = #tpu.core_type<tc>, window_params = [{transform_indices = @transform_0, window_bounds = array<i64: 32, 128>}, {transform_indices = @transform_1, window_bounds = array<i64: 128, 256>}, {transform_indices = @transform_2, window_bounds = array<i64: 1, 256>}, {transform_indices = @transform_3, window_bounds = array<i64: 32, 256>}]} {
    %c0 = arith.constant 0 : index
    %c0_0 = arith.constant 0 : index
    %0 = vector.load %arg2[%c0, %c0_0] : memref<32x128xbf16, #tpu.memory_space<vmem>>, vector<32x128xbf16>
    %c0_1 = arith.constant 0 : index
    %c0_2 = arith.constant 0 : index
    %1 = vector.load %arg3[%c0_1, %c0_2] : memref<128x256xbf16, #tpu.memory_space<vmem>>, vector<128x256xbf16>
    %cst = arith.constant dense<0.000000e+00> : vector<32x256xf32>
    %2 = tpu.matmul %0, %1, %cst {dimension_numbers = #tpu.dot_dimension_numbers<[1], [0], [0], [1], [0, 0, 1, 1], [], []>} : vector<32x128xbf16>, vector<128x256xbf16>, vector<32x256xf32> -> vector<32x256xf32>
    %c0_3 = arith.constant 0 : index
    %c0_4 = arith.constant 0 : index
    %3 = vector.load %arg4[%c0_3, %c0_4] : memref<1x256xf32, #tpu.memory_space<vmem>>, vector<1x256xf32>
    %4 = vector.broadcast %3 : vector<1x256xf32> to vector<32x256xf32>
    %5 = arith.addf %2, %4 : vector<32x256xf32>
    %6 = arith.mulf %5, %5 : vector<32x256xf32>
    %7 = arith.mulf %5, %6 : vector<32x256xf32>
    %cst_5 = arith.constant 4.471500e-02 : f32
    %8 = vector.broadcast %cst_5 : f32 to vector<32x256xf32>
    %9 = arith.mulf %8, %7 : vector<32x256xf32>
    %10 = arith.addf %5, %9 : vector<32x256xf32>
    %cst_6 = arith.constant 0.797884583 : f32
    %11 = vector.broadcast %cst_6 : f32 to vector<32x256xf32>
    %12 = arith.mulf %11, %10 : vector<32x256xf32>
    %13 = math.tanh %12 : vector<32x256xf32>
    %cst_7 = arith.constant 1.000000e+00 : f32
    %14 = vector.broadcast %cst_7 : f32 to vector<32x256xf32>
    %15 = arith.addf %14, %13 : vector<32x256xf32>
    %cst_8 = arith.constant 5.000000e-01 : f32
    %16 = vector.broadcast %cst_8 : f32 to vector<32x256xf32>
    %17 = arith.mulf %16, %15 : vector<32x256xf32>
    %18 = arith.mulf %5, %17 : vector<32x256xf32>
    %19 = arith.truncf %18 : vector<32x256xf32> to vector<32x256xbf16>
    %c0_9 = arith.constant 0 : index
    %c0_10 = arith.constant 0 : index
    %20 = vector.load %arg5[%c0_9, %c0_10] : memref<32x256xbf16, #tpu.memory_space<vmem>>, vector<32x256xbf16>
    tpu.vector_store %arg5[%c0_9, %c0_10], %19 {strides = array<i32>} : memref<32x256xbf16, #tpu.memory_space<vmem>>, vector<32x256xbf16>,
    return
  }
  func.func @transform_0(%arg0: i32, %arg1: i32) -> (i32, i32) {
    %c0_i32 = arith.constant 0 : i32
    %c0_i32_0 = arith.constant 0 : i32
    return %arg0, %c0_i32 : i32, i32
  }
  func.func @transform_1(%arg0: i32, %arg1: i32) -> (i32, i32) {
    %c0_i32 = arith.constant 0 : i32
    %c0_i32_0 = arith.constant 0 : i32
    return %c0_i32, %arg1 : i32, i32
  }
  func.func @transform_2(%arg0: i32, %arg1: i32) -> (i32, i32) {
    %c0_i32 = arith.constant 0 : i32
    %c0_i32_0 = arith.constant 0 : i32
    return %c0_i32, %arg1 : i32, i32
  }
  func.func @transform_3(%arg0: i32, %arg1: i32) -> (i32, i32) {
    %c0_i32 = arith.constant 0 : i32
    return %arg0, %arg1 : i32, i32
  }
}

module attributes {stable_mosaic.version = 11 : i64} {
  func.func @kernel(%arg0: i32, %arg1: i32, %arg2: memref<32x256xbf16, #tpu.memory_space<vmem>>, %arg3: memref<256x128xbf16, #tpu.memory_space<vmem>>, %arg4: memref<1x128xf32, #tpu.memory_space<vmem>>, %arg5: memref<32x128xbf16, #tpu.memory_space<vmem>>, %arg6: memref<32x128xbf16, #tpu.memory_space<vmem>>) attributes {dimension_semantics = [#tpu.dimension_semantics<parallel>, #tpu.dimension_semantics<parallel>], iteration_bounds = array<i64: 1, 1>, scalar_prefetch = 0 : i64, scratch_operands = 0 : i64, tpu.core_type = #tpu.core_type<tc>, window_params = [{transform_indices = @transform_0, window_bounds = array<i64: 32, 256>}, {transform_indices = @transform_1, window_bounds = array<i64: 256, 128>}, {transform_indices = @transform_2, window_bounds = array<i64: 1, 128>}, {transform_indices = @transform_3, window_bounds = array<i64: 32, 128>}, {transform_indices = @transform_4, window_bounds = array<i64: 32, 128>}]} {
    %c0 = arith.constant 0 : index
    %c0_0 = arith.constant 0 : index
    %0 = vector.load %arg2[%c0, %c0_0] : memref<32x256xbf16, #tpu.memory_space<vmem>>, vector<32x256xbf16>
    %c0_1 = arith.constant 0 : index
    %c0_2 = arith.constant 0 : index
    %1 = vector.load %arg3[%c0_1, %c0_2] : memref<256x128xbf16, #tpu.memory_space<vmem>>, vector<256x128xbf16>
    %cst = arith.constant dense<0.000000e+00> : vector<32x128xf32>
    %2 = tpu.matmul %0, %1, %cst {dimension_numbers = #tpu.dot_dimension_numbers<[1], [0], [0], [1], [0, 0, 1, 1], [], []>} : vector<32x256xbf16>, vector<256x128xbf16>, vector<32x128xf32> -> vector<32x128xf32>
    %c0_3 = arith.constant 0 : index
    %c0_4 = arith.constant 0 : index
    %3 = vector.load %arg4[%c0_3, %c0_4] : memref<1x128xf32, #tpu.memory_space<vmem>>, vector<1x128xf32>
    %4 = vector.broadcast %3 : vector<1x128xf32> to vector<32x128xf32>
    %5 = arith.addf %2, %4 : vector<32x128xf32>
    %c0_5 = arith.constant 0 : index
    %c0_6 = arith.constant 0 : index
    %6 = vector.load %arg5[%c0_5, %c0_6] : memref<32x128xbf16, #tpu.memory_space<vmem>>, vector<32x128xbf16>
    %7 = arith.extf %6 : vector<32x128xbf16> to vector<32x128xf32>
    %8 = arith.addf %5, %7 : vector<32x128xf32>
    %9 = arith.truncf %8 : vector<32x128xf32> to vector<32x128xbf16>
    %c0_7 = arith.constant 0 : index
    %c0_8 = arith.constant 0 : index
    %10 = vector.load %arg6[%c0_7, %c0_8] : memref<32x128xbf16, #tpu.memory_space<vmem>>, vector<32x128xbf16>
    tpu.vector_store %arg6[%c0_7, %c0_8], %9 {strides = array<i32>} : memref<32x128xbf16, #tpu.memory_space<vmem>>, vector<32x128xbf16>,
    return
  }
  func.func @transform_0(%arg0: i32, %arg1: i32) -> (i32, i32) {
    %c0_i32 = arith.constant 0 : i32
    %c0_i32_0 = arith.constant 0 : i32
    return %arg0, %c0_i32 : i32, i32
  }
  func.func @transform_1(%arg0: i32, %arg1: i32) -> (i32, i32) {
    %c0_i32 = arith.constant 0 : i32
    %c0_i32_0 = arith.constant 0 : i32
    return %c0_i32, %arg1 : i32, i32
  }
  func.func @transform_2(%arg0: i32, %arg1: i32) -> (i32, i32) {
    %c0_i32 = arith.constant 0 : i32
    %c0_i32_0 = arith.constant 0 : i32
    return %c0_i32, %arg1 : i32, i32
  }
  func.func @transform_3(%arg0: i32, %arg1: i32) -> (i32, i32) {
    %c0_i32 = arith.constant 0 : i32
    return %arg0, %arg1 : i32, i32
  }
  func.func @transform_4(%arg0: i32, %arg1: i32) -> (i32, i32) {
    %c0_i32 = arith.constant 0 : i32
    return %arg0, %arg1 : i32, i32
  }
}

module attributes {stable_mosaic.version = 11 : i64} {
  func.func @kernel(%arg0: i32, %arg1: i32, %arg2: memref<32x128xbf16, #tpu.memory_space<vmem>>, %arg3: memref<128x128xbf16, #tpu.memory_space<vmem>>, %arg4: memref<1x128xf32, #tpu.memory_space<vmem>>, %arg5: memref<32x128xbf16, #tpu.memory_space<vmem>>) attributes {dimension_semantics = [#tpu.dimension_semantics<parallel>, #tpu.dimension_semantics<parallel>], iteration_bounds = array<i64: 1, 1>, scalar_prefetch = 0 : i64, scratch_operands = 0 : i64, tpu.core_type = #tpu.core_type<tc>, window_params = [{transform_indices = @transform_0, window_bounds = array<i64: 32, 128>}, {transform_indices = @transform_1, window_bounds = array<i64: 128, 128>}, {transform_indices = @transform_2, window_bounds = array<i64: 1, 128>}, {transform_indices = @transform_3, window_bounds = array<i64: 32, 128>}]} {
    %c0 = arith.constant 0 : index
    %c0_0 = arith.constant 0 : index
    %0 = vector.load %arg2[%c0, %c0_0] : memref<32x128xbf16, #tpu.memory_space<vmem>>, vector<32x128xbf16>
    %c0_1 = arith.constant 0 : index
    %c0_2 = arith.constant 0 : index
    %1 = vector.load %arg3[%c0_1, %c0_2] : memref<128x128xbf16, #tpu.memory_space<vmem>>, vector<128x128xbf16>
    %cst = arith.constant dense<0.000000e+00> : vector<32x128xf32>
    %2 = tpu.matmul %0, %1, %cst {dimension_numbers = #tpu.dot_dimension_numbers<[1], [0], [0], [1], [0, 0, 1, 1], [], []>} : vector<32x128xbf16>, vector<128x128xbf16>, vector<32x128xf32> -> vector<32x128xf32>
    %c0_3 = arith.constant 0 : index
    %c0_4 = arith.constant 0 : index
    %3 = vector.load %arg4[%c0_3, %c0_4] : memref<1x128xf32, #tpu.memory_space<vmem>>, vector<1x128xf32>
    %4 = vector.broadcast %3 : vector<1x128xf32> to vector<32x128xf32>
    %5 = arith.addf %2, %4 : vector<32x128xf32>
    %6 = arith.truncf %5 : vector<32x128xf32> to vector<32x128xbf16>
    %c0_5 = arith.constant 0 : index
    %c0_6 = arith.constant 0 : index
    %7 = vector.load %arg5[%c0_5, %c0_6] : memref<32x128xbf16, #tpu.memory_space<vmem>>, vector<32x128xbf16>
    tpu.vector_store %arg5[%c0_5, %c0_6], %6 {strides = array<i32>} : memref<32x128xbf16, #tpu.memory_space<vmem>>, vector<32x128xbf16>,
    return
  }
  func.func @transform_0(%arg0: i32, %arg1: i32) -> (i32, i32) {
    %c0_i32 = arith.constant 0 : i32
    %c0_i32_0 = arith.constant 0 : i32
    return %arg0, %c0_i32 : i32, i32
  }
  func.func @transform_1(%arg0: i32, %arg1: i32) -> (i32, i32) {
    %c0_i32 = arith.constant 0 : i32
    %c0_i32_0 = arith.constant 0 : i32
    return %c0_i32, %arg1 : i32, i32
  }
  func.func @transform_2(%arg0: i32, %arg1: i32) -> (i32, i32) {
    %c0_i32 = arith.constant 0 : i32
    %c0_i32_0 = arith.constant 0 : i32
    return %c0_i32, %arg1 : i32, i32
  }
  func.func @transform_3(%arg0: i32, %arg1: i32) -> (i32, i32) {
    %c0_i32 = arith.constant 0 : i32
    return %arg0, %arg1 : i32, i32
  }
}

module attributes {stable_mosaic.version = 11 : i64} {
  func.func @kernel(%arg0: i32, %arg1: i32, %arg2: memref<32x128xbf16, #tpu.memory_space<vmem>>, %arg3: memref<128x128xbf16, #tpu.memory_space<vmem>>, %arg4: memref<1x128xf32, #tpu.memory_space<vmem>>, %arg5: memref<32x128xbf16, #tpu.memory_space<vmem>>, %arg6: memref<32x128xbf16, #tpu.memory_space<vmem>>) attributes {dimension_semantics = [#tpu.dimension_semantics<parallel>, #tpu.dimension_semantics<parallel>], iteration_bounds = array<i64: 1, 1>, scalar_prefetch = 0 : i64, scratch_operands = 0 : i64, tpu.core_type = #tpu.core_type<tc>, window_params = [{transform_indices = @transform_0, window_bounds = array<i64: 32, 128>}, {transform_indices = @transform_1, window_bounds = array<i64: 128, 128>}, {transform_indices = @transform_2, window_bounds = array<i64: 1, 128>}, {transform_indices = @transform_3, window_bounds = array<i64: 32, 128>}, {transform_indices = @transform_4, window_bounds = array<i64: 32, 128>}]} {
    %c0 = arith.constant 0 : index
    %c0_0 = arith.constant 0 : index
    %0 = vector.load %arg2[%c0, %c0_0] : memref<32x128xbf16, #tpu.memory_space<vmem>>, vector<32x128xbf16>
    %c0_1 = arith.constant 0 : index
    %c0_2 = arith.constant 0 : index
    %1 = vector.load %arg5[%c0_1, %c0_2] : memref<32x128xbf16, #tpu.memory_space<vmem>>, vector<32x128xbf16>
    %2 = arith.addf %0, %1 : vector<32x128xbf16>
    %c0_3 = arith.constant 0 : index
    %c0_4 = arith.constant 0 : index
    %3 = vector.load %arg3[%c0_3, %c0_4] : memref<128x128xbf16, #tpu.memory_space<vmem>>, vector<128x128xbf16>
    %cst = arith.constant dense<0.000000e+00> : vector<32x128xf32>
    %4 = tpu.matmul %2, %3, %cst {dimension_numbers = #tpu.dot_dimension_numbers<[1], [0], [0], [1], [0, 0, 1, 1], [], []>} : vector<32x128xbf16>, vector<128x128xbf16>, vector<32x128xf32> -> vector<32x128xf32>
    %c0_5 = arith.constant 0 : index
    %c0_6 = arith.constant 0 : index
    %5 = vector.load %arg4[%c0_5, %c0_6] : memref<1x128xf32, #tpu.memory_space<vmem>>, vector<1x128xf32>
    %6 = vector.broadcast %5 : vector<1x128xf32> to vector<32x128xf32>
    %7 = arith.addf %4, %6 : vector<32x128xf32>
    %8 = arith.truncf %7 : vector<32x128xf32> to vector<32x128xbf16>
    %c0_7 = arith.constant 0 : index
    %c0_8 = arith.constant 0 : index
    %9 = vector.load %arg6[%c0_7, %c0_8] : memref<32x128xbf16, #tpu.memory_space<vmem>>, vector<32x128xbf16>
    tpu.vector_store %arg6[%c0_7, %c0_8], %8 {strides = array<i32>} : memref<32x128xbf16, #tpu.memory_space<vmem>>, vector<32x128xbf16>,
    return
  }
  func.func @transform_0(%arg0: i32, %arg1: i32) -> (i32, i32) {
    %c0_i32 = arith.constant 0 : i32
    %c0_i32_0 = arith.constant 0 : i32
    return %arg0, %c0_i32 : i32, i32
  }
  func.func @transform_1(%arg0: i32, %arg1: i32) -> (i32, i32) {
    %c0_i32 = arith.constant 0 : i32
    %c0_i32_0 = arith.constant 0 : i32
    return %c0_i32, %arg1 : i32, i32
  }
  func.func @transform_2(%arg0: i32, %arg1: i32) -> (i32, i32) {
    %c0_i32 = arith.constant 0 : i32
    %c0_i32_0 = arith.constant 0 : i32
    return %c0_i32, %arg1 : i32, i32
  }
  func.func @transform_3(%arg0: i32, %arg1: i32) -> (i32, i32) {
    %c0_i32 = arith.constant 0 : i32
    %c0_i32_0 = arith.constant 0 : i32
    return %arg0, %c0_i32 : i32, i32
  }
  func.func @transform_4(%arg0: i32, %arg1: i32) -> (i32, i32) {
    %c0_i32 = arith.constant 0 : i32
    return %arg0, %arg1 : i32, i32
  }
}

module attributes {stable_mosaic.version = 11 : i64} {
  func.func @kernel(%arg0: i32, %arg1: i32, %arg2: i32, %arg3: memref<1x16x128xbf16, #tpu.memory_space<vmem>>, %arg4: memref<1x16x128xbf16, #tpu.memory_space<vmem>>, %arg5: memref<1x16x128xbf16, #tpu.memory_space<vmem>>, %arg6: memref<1x16x128xbf16, #tpu.memory_space<vmem>>, %arg7: memref<16x1xf32, #tpu.memory_space<vmem>>, %arg8: memref<16x1xf32, #tpu.memory_space<vmem>>, %arg9: memref<16x128xf32, #tpu.memory_space<vmem>>) attributes {dimension_semantics = [#tpu.dimension_semantics<parallel>, #tpu.dimension_semantics<parallel>, #tpu.dimension_semantics<arbitrary>], iteration_bounds = array<i64: 2, 1, 1>, scalar_prefetch = 0 : i64, scratch_operands = 3 : i64, tpu.core_type = #tpu.core_type<tc>, window_params = [{transform_indices = @transform_0, window_bounds = array<i64: 1, 16, 128>}, {transform_indices = @transform_1, window_bounds = array<i64: 1, 16, 128>}, {transform_indices = @transform_2, window_bounds = array<i64: 1, 16, 128>}, {transform_indices = @transform_3, window_bounds = array<i64: 1, 16, 128>}]} {
    %c0_i32 = arith.constant 0 : i32
    %0 = arith.cmpi eq, %arg2, %c0_i32 : i32
    %1 = arith.extui %0 : i1 to i32
    %c0_i32_0 = arith.constant 0 : i32
    %2 = arith.cmpi ne, %1, %c0_i32_0 : i32
    scf.if %2 {
      %cst_27 = arith.constant -1.000000e+30 : f32
      %44 = vector.broadcast %cst_27 : f32 to vector<16x1xf32>
      %c0_28 = arith.constant 0 : index
      %c0_29 = arith.constant 0 : index
      %45 = vector.load %arg7[%c0_28, %c0_29] : memref<16x1xf32, #tpu.memory_space<vmem>>, vector<16x1xf32>
      tpu.vector_store %arg7[%c0_28, %c0_29], %44 {strides = array<i32>} : memref<16x1xf32, #tpu.memory_space<vmem>>, vector<16x1xf32>,
      %cst_30 = arith.constant 0.000000e+00 : f32
      %46 = vector.broadcast %cst_30 : f32 to vector<16x1xf32>
      %c0_31 = arith.constant 0 : index
      %c0_32 = arith.constant 0 : index
      %47 = vector.load %arg8[%c0_31, %c0_32] : memref<16x1xf32, #tpu.memory_space<vmem>>, vector<16x1xf32>
      tpu.vector_store %arg8[%c0_31, %c0_32], %46 {strides = array<i32>} : memref<16x1xf32, #tpu.memory_space<vmem>>, vector<16x1xf32>,
      %cst_33 = arith.constant 0.000000e+00 : f32
      %48 = vector.broadcast %cst_33 : f32 to vector<16x128xf32>
      %c0_34 = arith.constant 0 : index
      %c0_35 = arith.constant 0 : index
      %49 = vector.load %arg9[%c0_34, %c0_35] : memref<16x128xf32, #tpu.memory_space<vmem>>, vector<16x128xf32>
      tpu.vector_store %arg9[%c0_34, %c0_35], %48 {strides = array<i32>} : memref<16x128xf32, #tpu.memory_space<vmem>>, vector<16x128xf32>,
    } else {
    }
    %c0 = arith.constant 0 : index
    %c0_1 = arith.constant 0 : index
    %c0_2 = arith.constant 0 : index
    %3 = vector.load %arg3[%c0, %c0_1, %c0_2] : memref<1x16x128xbf16, #tpu.memory_space<vmem>>, vector<1x16x128xbf16>
    %4 = vector.shape_cast %3 : vector<1x16x128xbf16> to vector<16x128xbf16>
    %c0_3 = arith.constant 0 : index
    %c0_4 = arith.constant 0 : index
    %c0_5 = arith.constant 0 : index
    %5 = vector.load %arg4[%c0_3, %c0_4, %c0_5] : memref<1x16x128xbf16, #tpu.memory_space<vmem>>, vector<1x16x128xbf16>
    %6 = vector.shape_cast %5 : vector<1x16x128xbf16> to vector<16x128xbf16>
    %cst = arith.constant dense<0.000000e+00> : vector<16x16xf32>
    %7 = tpu.matmul %4, %6, %cst {dimension_numbers = #tpu.dot_dimension_numbers<[1], [1], [0], [0], [0, 0, 1, 0], [], []>} : vector<16x128xbf16>, vector<16x128xbf16>, vector<16x16xf32> -> vector<16x16xf32>
    %c16_i32 = arith.constant 16 : i32
    %8 = arith.muli %arg2, %c16_i32 : i32
    %9 = tpu.iota {dimensions = array<i32: 1>} : vector<16x16xi32>
    %10 = vector.broadcast %8 : i32 to vector<16x16xi32>
    %11 = arith.addi %10, %9 : vector<16x16xi32>
    %c7_i32 = arith.constant 7 : i32
    %12 = vector.broadcast %c7_i32 : i32 to vector<16x16xi32>
    %13 = arith.cmpi slt, %11, %12 : vector<16x16xi32>
    %cst_6 = arith.constant -1.000000e+30 : f32
    %14 = vector.broadcast %cst_6 : f32 to vector<16x16xf32>
    %15 = arith.select %13, %7, %14 : vector<16x16xi1>, vector<16x16xf32>
    %c0_7 = arith.constant 0 : index
    %c0_8 = arith.constant 0 : index
    %16 = vector.load %arg7[%c0_7, %c0_8] : memref<16x1xf32, #tpu.memory_space<vmem>>, vector<16x1xf32>
    %cst_9 = arith.constant dense<0xFF800000> : vector<16xf32>
    %17 = vector.multi_reduction <maximumf>, %15, %cst_9 [1] : vector<16x16xf32> to vector<16xf32>
    %18 = vector.shape_cast %17 : vector<16xf32> to vector<16x1xf32>
    %19 = arith.maximumf %16, %18 : vector<16x1xf32>
    %20 = arith.subf %16, %19 : vector<16x1xf32>
    %21 = math.exp %20 : vector<16x1xf32>
    %22 = vector.broadcast %19 : vector<16x1xf32> to vector<16x16xf32>
    %23 = arith.subf %15, %22 : vector<16x16xf32>
    %24 = math.exp %23 : vector<16x16xf32>
    %c0_10 = arith.constant 0 : index
    %c0_11 = arith.constant 0 : index
    %25 = vector.load %arg8[%c0_10, %c0_11] : memref<16x1xf32, #tpu.memory_space<vmem>>, vector<16x1xf32>
    %26 = arith.mulf %21, %25 : vector<16x1xf32>
    %cst_12 = arith.constant dense<0.000000e+00> : vector<16xf32>
    %27 = vector.multi_reduction <add>, %24, %cst_12 [1] : vector<16x16xf32> to vector<16xf32>
    %28 = vector.shape_cast %27 : vector<16xf32> to vector<16x1xf32>
    %29 = arith.addf %26, %28 : vector<16x1xf32>
    %c0_13 = arith.constant 0 : index
    %c0_14 = arith.constant 0 : index
    %30 = vector.load %arg8[%c0_13, %c0_14] : memref<16x1xf32, #tpu.memory_space<vmem>>, vector<16x1xf32>
    tpu.vector_store %arg8[%c0_13, %c0_14], %29 {strides = array<i32>} : memref<16x1xf32, #tpu.memory_space<vmem>>, vector<16x1xf32>,
    %c0_15 = arith.constant 0 : index
    %c0_16 = arith.constant 0 : index
    %31 = vector.load %arg9[%c0_15, %c0_16] : memref<16x128xf32, #tpu.memory_space<vmem>>, vector<16x128xf32>
    %32 = vector.broadcast %21 : vector<16x1xf32> to vector<16x128xf32>
    %33 = arith.mulf %32, %31 : vector<16x128xf32>
    %34 = arith.truncf %24 : vector<16x16xf32> to vector<16x16xbf16>
    %c0_17 = arith.constant 0 : index
    %c0_18 = arith.constant 0 : index
    %c0_19 = arith.constant 0 : index
    %35 = vector.load %arg5[%c0_17, %c0_18, %c0_19] : memref<1x16x128xbf16, #tpu.memory_space<vmem>>, vector<1x16x128xbf16>
    %36 = vector.shape_cast %35 : vector<1x16x128xbf16> to vector<16x128xbf16>
    %cst_20 = arith.constant dense<0.000000e+00> : vector<16x128xf32>
    %37 = tpu.matmul %34, %36, %cst_20 {dimension_numbers = #tpu.dot_dimension_numbers<[1], [0], [0], [1], [0, 0, 1, 1], [], []>} : vector<16x16xbf16>, vector<16x128xbf16>, vector<16x128xf32> -> vector<16x128xf32>
    %38 = arith.addf %33, %37 : vector<16x128xf32>
    %c0_21 = arith.constant 0 : index
    %c0_22 = arith.constant 0 : index
    %39 = vector.load %arg9[%c0_21, %c0_22] : memref<16x128xf32, #tpu.memory_space<vmem>>, vector<16x128xf32>
    tpu.vector_store %arg9[%c0_21, %c0_22], %38 {strides = array<i32>} : memref<16x128xf32, #tpu.memory_space<vmem>>, vector<16x128xf32>,
    %c0_23 = arith.constant 0 : index
    %c0_24 = arith.constant 0 : index
    %40 = vector.load %arg7[%c0_23, %c0_24] : memref<16x1xf32, #tpu.memory_space<vmem>>, vector<16x1xf32>
    tpu.vector_store %arg7[%c0_23, %c0_24], %19 {strides = array<i32>} : memref<16x1xf32, #tpu.memory_space<vmem>>, vector<16x1xf32>,
    %c0_i32_25 = arith.constant 0 : i32
    %41 = arith.cmpi eq, %arg2, %c0_i32_25 : i32
    %42 = arith.extui %41 : i1 to i32
    %c0_i32_26 = arith.constant 0 : i32
    %43 = arith.cmpi ne, %42, %c0_i32_26 : i32
    scf.if %43 {
      %c0_27 = arith.constant 0 : index
      %c0_28 = arith.constant 0 : index
      %44 = vector.load %arg9[%c0_27, %c0_28] : memref<16x128xf32, #tpu.memory_space<vmem>>, vector<16x128xf32>
      %c0_29 = arith.constant 0 : index
      %c0_30 = arith.constant 0 : index
      %45 = vector.load %arg8[%c0_29, %c0_30] : memref<16x1xf32, #tpu.memory_space<vmem>>, vector<16x1xf32>
      %46 = tpu.reciprocal %45 {approx = true} : vector<16x1xf32> -> vector<16x1xf32>
      %47 = vector.broadcast %46 : vector<16x1xf32> to vector<16x128xf32>
      %48 = arith.mulf %44, %47 : vector<16x128xf32>
      %49 = arith.truncf %48 : vector<16x128xf32> to vector<16x128xbf16>
      %c0_31 = arith.constant 0 : index
      %c0_32 = arith.constant 0 : index
      %c0_33 = arith.constant 0 : index
      %50 = vector.load %arg6[%c0_31, %c0_32, %c0_33] : memref<1x16x128xbf16, #tpu.memory_space<vmem>>, vector<1x16x128xbf16>
      %51 = vector.shape_cast %50 : vector<1x16x128xbf16> to vector<16x128xbf16>
      %52 = vector.shape_cast %49 : vector<16x128xbf16> to vector<1x16x128xbf16>
      tpu.vector_store %arg6[%c0_31, %c0_32, %c0_33], %52 {strides = array<i32>} : memref<1x16x128xbf16, #tpu.memory_space<vmem>>, vector<1x16x128xbf16>,
    } else {
    }
    return
  }
  func.func @transform_0(%arg0: i32, %arg1: i32, %arg2: i32) -> (i32, i32, i32) {
    %c0_i32 = arith.constant 0 : i32
    %c0_i32_0 = arith.constant 0 : i32
    return %arg0, %arg1, %c0_i32 : i32, i32, i32
  }
  func.func @transform_1(%arg0: i32, %arg1: i32, %arg2: i32) -> (i32, i32, i32) {
    %c0_i32 = arith.constant 0 : i32
    %c0_i32_0 = arith.constant 0 : i32
    return %arg0, %arg2, %c0_i32 : i32, i32, i32
  }
  func.func @transform_2(%arg0: i32, %arg1: i32, %arg2: i32) -> (i32, i32, i32) {
    %c0_i32 = arith.constant 0 : i32
    %c0_i32_0 = arith.constant 0 : i32
    return %arg0, %arg2, %c0_i32 : i32, i32, i32
  }
  func.func @transform_3(%arg0: i32, %arg1: i32, %arg2: i32) -> (i32, i32, i32) {
    %c0_i32 = arith.constant 0 : i32
    %c0_i32_0 = arith.constant 0 : i32
    return %arg0, %arg1, %c0_i32 : i32, i32, i32
  }
}

module attributes {stable_mosaic.version = 11 : i64} {
  func.func @kernel(%arg0: i32, %arg1: memref<128x32xbf16, #tpu.memory_space<vmem>>, %arg2: memref<1x32xf32, #tpu.memory_space<vmem>>, %arg3: memref<1x32xf32, #tpu.memory_space<vmem>>, %arg4: memref<128x32xbf16, #tpu.memory_space<vmem>>) attributes {dimension_semantics = [#tpu.dimension_semantics<parallel>], iteration_bounds = array<i64: 1>, scalar_prefetch = 0 : i64, scratch_operands = 0 : i64, tpu.core_type = #tpu.core_type<tc>, window_params = [{transform_indices = @transform_0, window_bounds = array<i64: 128, 32>}, {pipeline_mode = #tpu.pipeline_mode<synchronous>, transform_indices = @transform_1, window_bounds = array<i64: 1, 32>}, {pipeline_mode = #tpu.pipeline_mode<synchronous>, transform_indices = @transform_2, window_bounds = array<i64: 1, 32>}, {transform_indices = @transform_3, window_bounds = array<i64: 128, 32>}]} {
    %c0 = arith.constant 0 : index
    %c0_0 = arith.constant 0 : index
    %0 = vector.load %arg1[%c0, %c0_0] : memref<128x32xbf16, #tpu.memory_space<vmem>>, vector<128x32xbf16>
    %1 = arith.extf %0 : vector<128x32xbf16> to vector<128x32xf32>
    %cst = arith.constant dense<0.000000e+00> : vector<128xf32>
    %2 = vector.multi_reduction <add>, %1, %cst [1] : vector<128x32xf32> to vector<128xf32>
    %3 = vector.shape_cast %2 : vector<128xf32> to vector<128x1xf32>
    %cst_1 = arith.constant 3.200000e+01 : f32
    %4 = vector.broadcast %cst_1 : f32 to vector<128x1xf32>
    %5 = arith.divf %3, %4 : vector<128x1xf32>
    %6 = vector.broadcast %5 : vector<128x1xf32> to vector<128x32xf32>
    %7 = arith.subf %1, %6 : vector<128x32xf32>
    %8 = arith.mulf %7, %7 : vector<128x32xf32>
    %cst_2 = arith.constant dense<0.000000e+00> : vector<128xf32>
    %9 = vector.multi_reduction <add>, %8, %cst_2 [1] : vector<128x32xf32> to vector<128xf32>
    %10 = vector.shape_cast %9 : vector<128xf32> to vector<128x1xf32>
    %cst_3 = arith.constant 3.200000e+01 : f32
    %11 = vector.broadcast %cst_3 : f32 to vector<128x1xf32>
    %12 = arith.divf %10, %11 : vector<128x1xf32>
    %13 = vector.broadcast %5 : vector<128x1xf32> to vector<128x32xf32>
    %14 = arith.subf %1, %13 : vector<128x32xf32>
    %cst_4 = arith.constant 9.99999997E-7 : f32
    %15 = vector.broadcast %cst_4 : f32 to vector<128x1xf32>
    %16 = arith.addf %12, %15 : vector<128x1xf32>
    %17 = math.rsqrt %16 : vector<128x1xf32>
    %18 = vector.broadcast %17 : vector<128x1xf32> to vector<128x32xf32>
    %19 = arith.mulf %14, %18 : vector<128x32xf32>
    %c0_5 = arith.constant 0 : index
    %c0_6 = arith.constant 0 : index
    %20 = vector.load %arg2[%c0_5, %c0_6] : memref<1x32xf32, #tpu.memory_space<vmem>>, vector<1x32xf32>
    %21 = vector.broadcast %20 : vector<1x32xf32> to vector<128x32xf32>
    %22 = arith.mulf %19, %21 : vector<128x32xf32>
    %c0_7 = arith.constant 0 : index
    %c0_8 = arith.constant 0 : index
    %23 = vector.load %arg3[%c0_7, %c0_8] : memref<1x32xf32, #tpu.memory_space<vmem>>, vector<1x32xf32>
    %24 = vector.broadcast %23 : vector<1x32xf32> to vector<128x32xf32>
    %25 = arith.addf %22, %24 : vector<128x32xf32>
    %26 = arith.mulf %25, %25 : vector<128x32xf32>
    %27 = arith.mulf %25, %26 : vector<128x32xf32>
    %cst_9 = arith.constant 4.471500e-02 : f32
    %28 = vector.broadcast %cst_9 : f32 to vector<128x32xf32>
    %29 = arith.mulf %28, %27 : vector<128x32xf32>
    %30 = arith.addf %25, %29 : vector<128x32xf32>
    %cst_10 = arith.constant 0.797884583 : f32
    %31 = vector.broadcast %cst_10 : f32 to vector<128x32xf32>
    %32 = arith.mulf %31, %30 : vector<128x32xf32>
    %33 = math.tanh %32 : vector<128x32xf32>
    %cst_11 = arith.constant 1.000000e+00 : f32
    %34 = vector.broadcast %cst_11 : f32 to vector<128x32xf32>
    %35 = arith.addf %34, %33 : vector<128x32xf32>
    %cst_12 = arith.constant 5.000000e-01 : f32
    %36 = vector.broadcast %cst_12 : f32 to vector<128x32xf32>
    %37 = arith.mulf %36, %35 : vector<128x32xf32>
    %38 = arith.mulf %25, %37 : vector<128x32xf32>
    %39 = arith.truncf %38 : vector<128x32xf32> to vector<128x32xbf16>
    %c0_13 = arith.constant 0 : index
    %c0_14 = arith.constant 0 : index
    %40 = vector.load %arg4[%c0_13, %c0_14] : memref<128x32xbf16, #tpu.memory_space<vmem>>, vector<128x32xbf16>
    tpu.vector_store %arg4[%c0_13, %c0_14], %39 {strides = array<i32>} : memref<128x32xbf16, #tpu.memory_space<vmem>>, vector<128x32xbf16>,
    return
  }
  func.func @transform_0(%arg0: i32) -> (i32, i32) {
    %c0_i32 = arith.constant 0 : i32
    %c0_i32_0 = arith.constant 0 : i32
    return %arg0, %c0_i32 : i32, i32
  }
  func.func @transform_1(%arg0: i32) -> (i32, i32) {
    %c0_i32 = arith.constant 0 : i32
    %c0_i32_0 = arith.constant 0 : i32
    %c0_i32_1 = arith.constant 0 : i32
    return %c0_i32, %c0_i32_0 : i32, i32
  }
  func.func @transform_2(%arg0: i32) -> (i32, i32) {
    %c0_i32 = arith.constant 0 : i32
    %c0_i32_0 = arith.constant 0 : i32
    %c0_i32_1 = arith.constant 0 : i32
    return %c0_i32, %c0_i32_0 : i32, i32
  }
  func.func @transform_3(%arg0: i32) -> (i32, i32) {
    %c0_i32 = arith.constant 0 : i32
    %c0_i32_0 = arith.constant 0 : i32
    return %arg0, %c0_i32 : i32, i32
  }
}

module attributes {stable_mosaic.version = 11 : i64} {
  func.func @kernel(%arg0: i32, %arg1: i32, %arg2: memref<128x32xbf16, #tpu.memory_space<vmem>>, %arg3: memref<32x64xbf16, #tpu.memory_space<vmem>>, %arg4: memref<1x64xf32, #tpu.memory_space<vmem>>, %arg5: memref<128x64xbf16, #tpu.memory_space<vmem>>) attributes {dimension_semantics = [#tpu.dimension_semantics<parallel>, #tpu.dimension_semantics<parallel>], iteration_bounds = array<i64: 1, 1>, scalar_prefetch = 0 : i64, scratch_operands = 0 : i64, tpu.core_type = #tpu.core_type<tc>, window_params = [{transform_indices = @transform_0, window_bounds = array<i64: 128, 32>}, {transform_indices = @transform_1, window_bounds = array<i64: 32, 64>}, {transform_indices = @transform_2, window_bounds = array<i64: 1, 64>}, {transform_indices = @transform_3, window_bounds = array<i64: 128, 64>}]} {
    %c0 = arith.constant 0 : index
    %c0_0 = arith.constant 0 : index
    %0 = vector.load %arg2[%c0, %c0_0] : memref<128x32xbf16, #tpu.memory_space<vmem>>, vector<128x32xbf16>
    %c0_1 = arith.constant 0 : index
    %c0_2 = arith.constant 0 : index
    %1 = vector.load %arg3[%c0_1, %c0_2] : memref<32x64xbf16, #tpu.memory_space<vmem>>, vector<32x64xbf16>
    %cst = arith.constant dense<0.000000e+00> : vector<128x64xf32>
    %2 = tpu.matmul %0, %1, %cst {dimension_numbers = #tpu.dot_dimension_numbers<[1], [0], [0], [1], [0, 0, 1, 1], [], []>} : vector<128x32xbf16>, vector<32x64xbf16>, vector<128x64xf32> -> vector<128x64xf32>
    %c0_3 = arith.constant 0 : index
    %c0_4 = arith.constant 0 : index
    %3 = vector.load %arg4[%c0_3, %c0_4] : memref<1x64xf32, #tpu.memory_space<vmem>>, vector<1x64xf32>
    %4 = vector.broadcast %3 : vector<1x64xf32> to vector<128x64xf32>
    %5 = arith.addf %2, %4 : vector<128x64xf32>
    %6 = arith.mulf %5, %5 : vector<128x64xf32>
    %7 = arith.mulf %5, %6 : vector<128x64xf32>
    %cst_5 = arith.constant 4.471500e-02 : f32
    %8 = vector.broadcast %cst_5 : f32 to vector<128x64xf32>
    %9 = arith.mulf %8, %7 : vector<128x64xf32>
    %10 = arith.addf %5, %9 : vector<128x64xf32>
    %cst_6 = arith.constant 0.797884583 : f32
    %11 = vector.broadcast %cst_6 : f32 to vector<128x64xf32>
    %12 = arith.mulf %11, %10 : vector<128x64xf32>
    %13 = math.tanh %12 : vector<128x64xf32>
    %cst_7 = arith.constant 1.000000e+00 : f32
    %14 = vector.broadcast %cst_7 : f32 to vector<128x64xf32>
    %15 = arith.addf %14, %13 : vector<128x64xf32>
    %cst_8 = arith.constant 5.000000e-01 : f32
    %16 = vector.broadcast %cst_8 : f32 to vector<128x64xf32>
    %17 = arith.mulf %16, %15 : vector<128x64xf32>
    %18 = arith.mulf %5, %17 : vector<128x64xf32>
    %19 = arith.truncf %18 : vector<128x64xf32> to vector<128x64xbf16>
    %c0_9 = arith.constant 0 : index
    %c0_10 = arith.constant 0 : index
    %20 = vector.load %arg5[%c0_9, %c0_10] : memref<128x64xbf16, #tpu.memory_space<vmem>>, vector<128x64xbf16>
    tpu.vector_store %arg5[%c0_9, %c0_10], %19 {strides = array<i32>} : memref<128x64xbf16, #tpu.memory_space<vmem>>, vector<128x64xbf16>,
    return
  }
  func.func @transform_0(%arg0: i32, %arg1: i32) -> (i32, i32) {
    %c0_i32 = arith.constant 0 : i32
    %c0_i32_0 = arith.constant 0 : i32
    return %arg0, %c0_i32 : i32, i32
  }
  func.func @transform_1(%arg0: i32, %arg1: i32) -> (i32, i32) {
    %c0_i32 = arith.constant 0 : i32
    %c0_i32_0 = arith.constant 0 : i32
    return %c0_i32, %arg1 : i32, i32
  }
  func.func @transform_2(%arg0: i32, %arg1: i32) -> (i32, i32) {
    %c0_i32 = arith.constant 0 : i32
    %c0_i32_0 = arith.constant 0 : i32
    return %c0_i32, %arg1 : i32, i32
  }
  func.func @transform_3(%arg0: i32, %arg1: i32) -> (i32, i32) {
    %c0_i32 = arith.constant 0 : i32
    return %arg0, %arg1 : i32, i32
  }
}

module attributes {stable_mosaic.version = 11 : i64} {
  func.func @kernel(%arg0: i32, %arg1: i32, %arg2: memref<1x16x16xbf16, #tpu.memory_space<vmem>>, %arg3: memref<1x256x16xbf16, #tpu.memory_space<vmem>>, %arg4: memref<1x16x256xf32, #tpu.memory_space<vmem>>) attributes {dimension_semantics = [#tpu.dimension_semantics<parallel>, #tpu.dimension_semantics<parallel>], iteration_bounds = array<i64: 2, 1>, scalar_prefetch = 0 : i64, scratch_operands = 0 : i64, tpu.core_type = #tpu.core_type<tc>, window_params = [{transform_indices = @transform_0, window_bounds = array<i64: 1, 16, 16>}, {transform_indices = @transform_1, window_bounds = array<i64: 1, 256, 16>}, {transform_indices = @transform_2, window_bounds = array<i64: 1, 16, 256>}]} {
    %c0 = arith.constant 0 : index
    %c0_0 = arith.constant 0 : index
    %c0_1 = arith.constant 0 : index
    %0 = vector.load %arg2[%c0, %c0_0, %c0_1] : memref<1x16x16xbf16, #tpu.memory_space<vmem>>, vector<1x16x16xbf16>
    %1 = vector.shape_cast %0 : vector<1x16x16xbf16> to vector<16x16xbf16>
    %c0_2 = arith.constant 0 : index
    %c0_3 = arith.constant 0 : index
    %c0_4 = arith.constant 0 : index
    %2 = vector.load %arg3[%c0_2, %c0_3, %c0_4] : memref<1x256x16xbf16, #tpu.memory_space<vmem>>, vector<1x256x16xbf16>
    %3 = vector.shape_cast %2 : vector<1x256x16xbf16> to vector<256x16xbf16>
    %cst = arith.constant dense<0.000000e+00> : vector<16x256xf32>
    %4 = tpu.matmul %1, %3, %cst {dimension_numbers = #tpu.dot_dimension_numbers<[1], [1], [0], [0], [0, 0, 1, 0], [], []>} : vector<16x16xbf16>, vector<256x16xbf16>, vector<16x256xf32> -> vector<16x256xf32>
    %c0_5 = arith.constant 0 : index
    %c0_6 = arith.constant 0 : index
    %c0_7 = arith.constant 0 : index
    %5 = vector.load %arg4[%c0_5, %c0_6, %c0_7] : memref<1x16x256xf32, #tpu.memory_space<vmem>>, vector<1x16x256xf32>
    %6 = vector.shape_cast %5 : vector<1x16x256xf32> to vector<16x256xf32>
    %7 = vector.shape_cast %4 : vector<16x256xf32> to vector<1x16x256xf32>
    tpu.vector_store %arg4[%c0_5, %c0_6, %c0_7], %7 {strides = array<i32>} : memref<1x16x256xf32, #tpu.memory_space<vmem>>, vector<1x16x256xf32>,
    return
  }
  func.func @transform_0(%arg0: i32, %arg1: i32) -> (i32, i32, i32) {
    %c0_i32 = arith.constant 0 : i32
    %c0_i32_0 = arith.constant 0 : i32
    %c0_i32_1 = arith.constant 0 : i32
    return %arg0, %c0_i32, %c0_i32_0 : i32, i32, i32
  }
  func.func @transform_1(%arg0: i32, %arg1: i32) -> (i32, i32, i32) {
    %c0_i32 = arith.constant 0 : i32
    %c0_i32_0 = arith.constant 0 : i32
    return %arg0, %arg1, %c0_i32 : i32, i32, i32
  }
  func.func @transform_2(%arg0: i32, %arg1: i32) -> (i32, i32, i32) {
    %c0_i32 = arith.constant 0 : i32
    %c0_i32_0 = arith.constant 0 : i32
    return %arg0, %c0_i32, %arg1 : i32, i32, i32
  }
}

module attributes {stable_mosaic.version = 11 : i64} {
  func.func @kernel(%arg0: i32, %arg1: i32, %arg2: memref<1x16x16xbf16, #tpu.memory_space<vmem>>, %arg3: memref<64x16xbf16, #tpu.memory_space<vmem>>, %arg4: memref<64x16xbf16, #tpu.memory_space<vmem>>, %arg5: memref<1x64x64xf32, #tpu.memory_space<vmem>>) attributes {dimension_semantics = [#tpu.dimension_semantics<parallel>, #tpu.dimension_semantics<parallel>], iteration_bounds = array<i64: 2, 1>, scalar_prefetch = 0 : i64, scratch_operands = 0 : i64, tpu.core_type = #tpu.core_type<tc>, window_params = [{transform_indices = @transform_0, window_bounds = array<i64: 1, 16, 16>}, {transform_indices = @transform_1, window_bounds = array<i64: 64, 16>}, {pipeline_mode = #tpu.pipeline_mode<synchronous>, transform_indices = @transform_2, window_bounds = array<i64: 64, 16>}, {transform_indices = @transform_3, window_bounds = array<i64: 1, 64, 64>}]} {
    %c0 = arith.constant 0 : index
    %c0_0 = arith.constant 0 : index
    %0 = vector.load %arg3[%c0, %c0_0] : memref<64x16xbf16, #tpu.memory_space<vmem>>, vector<64x16xbf16>
    %c0_1 = arith.constant 0 : index
    %c0_2 = arith.constant 0 : index
    %c0_3 = arith.constant 0 : index
    %1 = vector.load %arg2[%c0_1, %c0_2, %c0_3] : memref<1x16x16xbf16, #tpu.memory_space<vmem>>, vector<1x16x16xbf16>
    %2 = vector.shape_cast %1 : vector<1x16x16xbf16> to vector<16x16xbf16>
    %cst = arith.constant dense<0.000000e+00> : vector<64x16xf32>
    %3 = tpu.matmul %0, %2, %cst {dimension_numbers = #tpu.dot_dimension_numbers<[1], [0], [0], [1], [0, 0, 1, 1], [], []>} : vector<64x16xbf16>, vector<16x16xbf16>, vector<64x16xf32> -> vector<64x16xf32>
    %4 = arith.truncf %3 : vector<64x16xf32> to vector<64x16xbf16>
    %c0_4 = arith.constant 0 : index
    %c0_5 = arith.constant 0 : index
    %5 = vector.load %arg4[%c0_4, %c0_5] : memref<64x16xbf16, #tpu.memory_space<vmem>>, vector<64x16xbf16>
    %cst_6 = arith.constant dense<0.000000e+00> : vector<64x64xf32>
    %6 = tpu.matmul %4, %5, %cst_6 {dimension_numbers = #tpu.dot_dimension_numbers<[1], [1], [0], [0], [0, 0, 1, 0], [], []>} : vector<64x16xbf16>, vector<64x16xbf16>, vector<64x64xf32> -> vector<64x64xf32>
    %c0_7 = arith.constant 0 : index
    %c0_8 = arith.constant 0 : index
    %c0_9 = arith.constant 0 : index
    %7 = vector.load %arg5[%c0_7, %c0_8, %c0_9] : memref<1x64x64xf32, #tpu.memory_space<vmem>>, vector<1x64x64xf32>
    %8 = vector.shape_cast %7 : vector<1x64x64xf32> to vector<64x64xf32>
    %9 = vector.shape_cast %6 : vector<64x64xf32> to vector<1x64x64xf32>
    tpu.vector_store %arg5[%c0_7, %c0_8, %c0_9], %9 {strides = array<i32>} : memref<1x64x64xf32, #tpu.memory_space<vmem>>, vector<1x64x64xf32>,
    return
  }
  func.func @transform_0(%arg0: i32, %arg1: i32) -> (i32, i32, i32) {
    %c0_i32 = arith.constant 0 : i32
    %c0_i32_0 = arith.constant 0 : i32
    %c0_i32_1 = arith.constant 0 : i32
    return %arg0, %c0_i32, %c0_i32_0 : i32, i32, i32
  }
  func.func @transform_1(%arg0: i32, %arg1: i32) -> (i32, i32) {
    %c0_i32 = arith.constant 0 : i32
    %c0_i32_0 = arith.constant 0 : i32
    return %arg1, %c0_i32 : i32, i32
  }
  func.func @transform_2(%arg0: i32, %arg1: i32) -> (i32, i32) {
    %c0_i32 = arith.constant 0 : i32
    %c0_i32_0 = arith.constant 0 : i32
    %c0_i32_1 = arith.constant 0 : i32
    return %c0_i32, %c0_i32_0 : i32, i32
  }
  func.func @transform_3(%arg0: i32, %arg1: i32) -> (i32, i32, i32) {
    %c0_i32 = arith.constant 0 : i32
    %c0_i32_0 = arith.constant 0 : i32
    return %arg0, %arg1, %c0_i32 : i32, i32, i32
  }
}

</mosaic_0001>

<bundles_post_ra>
// kernel: medsam_forward.25
= control target key start
LH: loop header
LB: loop body
LE: loop exit
PB: predicated region body
PF: predicated region fallthrough
CT: control target
= control target key end

     0   :  { %s189_s0 = inlined_call_operand.vmem [shape: bf16[32,128], index: 0, kind: input, shape index: {}]   ;;  %s190_s1 = inlined_call_operand.vmem [shape: f32[1,128], index: 1, kind: input, shape index: {}]   ;;  %s191_s2 = inlined_call_operand.vmem [shape: f32[1,128], index: 2, kind: input, shape index: {}]   ;;  %s192_s3 = inlined_call_operand.vmem [shape: bf16[32,128], index: 3, kind: output, shape index: {}]  }
   0x1   :  { %v124_v0 = vld [vmem:[%s189_s0] sm:$0xff]   ;;  %v141_v1 = vld [vmem:[%s189_s0 + $0x8] sm:$0xff]  }
   0x2   :  { %v125_v2 = vunpack.c.l.bf16 %v124_v0  ;;  %v129_v3 = vunpack.c.l.bf16 %v141_v1  ;;  %v126_v4 = vunpack.c.h.bf16 %v124_v0  ;;  %v130_v5 = vunpack.c.h.bf16 %v141_v1  ;;  %v113_v36 = vld [vmem:[%s190_s1] ss:$0 sm:$0xff] }
   0x3   :  { %v114_v41 = vld [vmem:[%s191_s2] ss:$0 sm:$0xff] }
   0x4   :  { %22 = vadd.xlane.f32.xlu0 %v125_v2  ;;  %26 = vadd.xlane.f32.xlu1 %v129_v3 }
   0x8   :  { %24 = vadd.xlane.f32.xlu0 %v126_v4  ;;  %28 = vadd.xlane.f32.xlu1 %v130_v5 }
  0x91   :  { %v23_v6 = vpop.xlane.xlu0 %22  ;;  %v27_v7 = vpop.xlane.xlu1 %26 }
  0x92   :  { %v31_v8 = vmul.f32 0.0078125, %v23_v6  ;;  %v33_v9 = vmul.f32 0.0078125, %v27_v7 }
  0x94   :  { %v35_v10 = vsub.f32 %v125_v2, %v31_v8  ;;  %v37_v11 = vsub.f32 %v129_v3, %v33_v9 }
  0x95   :  { %v25_v12 = vpop.xlane.xlu0 %24  ;;  %v29_v13 = vpop.xlane.xlu1 %28 }
  0x96   :  { %v32_v14 = vmul.f32 0.0078125, %v25_v12  ;;  %v39_v15 = vmul.f32 %v35_v10, %v35_v10  ;;  %v34_v16 = vmul.f32 0.0078125, %v29_v13  ;;  %v41_v19 = vmul.f32 %v37_v11, %v37_v11 }
  0x98   :  { %v36_v17 = vsub.f32 %v126_v4, %v32_v14  ;;  %43 = vadd.xlane.f32.xlu0 %v39_v15  ;;  %v38_v18 = vsub.f32 %v130_v5, %v34_v16 }
  0x9a   :  { %v40_v20 = vmul.f32 %v36_v17, %v36_v17  ;;  %v42_v21 = vmul.f32 %v38_v18, %v38_v18 }
  0x9c   :  { %47 = vadd.xlane.f32.xlu0 %v41_v19  ;;  %45 = vadd.xlane.f32.xlu1 %v40_v20 }
  0xa0   :  { %49 = vadd.xlane.f32.xlu1 %v42_v21 }
 0x125   :  { %v44_v22 = vpop.xlane.xlu0 %43 }
 0x126   :  { %v51_v23 = vmul.f32 0.0078125, %v44_v22 }
 0x128   :  { %v55_v24 = vadd.f32 1e-06, %v51_v23 }
 0x129   :  { %v46_v25 = vpop.xlane.xlu1 %45  ;;  %v48_v26 = vpop.xlane.xlu0 %47 }
 0x12a   :  { %143 = vrsqrt.f32 %v55_v24  ;;  %v52_v27 = vmul.f32 0.0078125, %v46_v25  ;;  %v53_v28 = vmul.f32 0.0078125, %v48_v26 }
 0x12c   :  { %v56_v29 = vadd.f32 1e-06, %v52_v27  ;;  %v57_v30 = vadd.f32 1e-06, %v53_v28 }
 0x12d   :  { %v50_v31 = vpop.xlane.xlu1 %49 }
 0x12e   :  { %145 = vrsqrt.f32 %v56_v29  ;;  %v54_v32 = vmul.f32 0.0078125, %v50_v31 }
 0x12f   :  { %147 = vrsqrt.f32 %v57_v30 }
 0x130   :  { %v58_v33 = vadd.f32 1e-06, %v54_v32 }
 0x132   :  { %149 = vrsqrt.f32 %v58_v33 }
 0x134   :  { %v144_v34 = vpop.eup %143 }
 0x135   :  { %v63_v35 = vmul.f32 %v144_v34, %v35_v10 }
 0x137   :  { %v74_v39 = vmul.f32 %v113_v36, %v63_v35 }
 0x138   :  { %v146_v37 = vpop.eup %145 }
 0x139   :  { %v148_v38 = vpop.eup %147  ;;  %v64_v40 = vmul.f32 %v146_v37, %v36_v17  ;;  %v85_v45 = vadd.f32 %v114_v41, %v74_v39 }
 0x13a   :  { %v65_v42 = vmul.f32 %v148_v38, %v37_v11 }
 0x13b   :  { %v75_v43 = vmul.f32 %v113_v36, %v64_v40 }
 0x13c   :  { %v150_v44 = vpop.eup %149  ;;  %v76_v47 = vmul.f32 %v113_v36, %v65_v42 }
 0x13d   :  { %v86_v46 = vadd.f32 %v114_v41, %v75_v43  ;;  %v66_v48 = vmul.f32 %v150_v44, %v38_v18 }
 0x13e   :  { %v87_v51 = vadd.f32 %v114_v41, %v76_v47 }
 0x13f   :  { %v134_v49 = vpack.c.bf16 %v86_v46, %v85_v45  ;;  %v77_v50 = vmul.f32 %v113_v36, %v66_v48 }
 0x141   :  { %135 = vst [vmem:[%s192_s3] sm:$0xff] %v134_v49   ;;  %v88_v52 = vadd.f32 %v114_v41, %v77_v50 }
 0x143   :  { %v139_v53 = vpack.c.bf16 %v88_v52, %v87_v51 }
 0x145   :  { %142 = vst [vmem:[%s192_s3 + $0x8] sm:$0xff] %v139_v53  }

// kernel: medsam_forward.24
= control target key start
LH: loop header
LB: loop body
LE: loop exit
PB: predicated region body
PF: predicated region fallthrough
CT: control target
= control target key end

     0   :  { %s1139_s1 = inlined_call_operand.vmem [shape: bf16[768,128], index: 1, kind: input, shape index: {}]   ;;  %s1140_s0 = inlined_call_operand.vmem [shape: bf16[32,768], index: 0, kind: input, shape index: {}]   ;;  %s1141_s2 = inlined_call_operand.vmem [shape: f32[1,128], index: 2, kind: input, shape index: {}]   ;;  %s1142_s3 = inlined_call_operand.vmem [shape: bf16[32,128], index: 3, kind: input, shape index: {}]   ;;  %s1143_s4 = inlined_call_operand.vmem [shape: bf16[32,128], index: 4, kind: output, shape index: {}]  }
   0x1   :  { %v853_v0 = vld [vmem:[%s1139_s1 + $0x40] sm:$0xff]   ;;  %v857_v4 = vld [vmem:[%s1139_s1 + $0x48] sm:$0xff]   ;;  %v861_v8 = vld [vmem:[%s1139_s1 + $0x50] sm:$0xff]  }
   0x2   :  { %v854_v1 = vld [vmem:[%s1139_s1 + $0xc0] sm:$0xff]   ;;  %753 = vmatprep.subr.bf16.mxu0 %v853_v0  ;;  %v858_v5 = vld [vmem:[%s1139_s1 + $0xc8] sm:$0xff]   ;;  %v862_v9 = vld [vmem:[%s1139_s1 + $0xd0] sm:$0xff]  }
   0x3   :  { %v855_v2 = vld [vmem:[%s1139_s1] sm:$0xff]   ;;  %781 = vmatprep.subr.bf16.mxu1 %v854_v1  ;;  %v859_v6 = vld [vmem:[%s1139_s1 + $0x8] sm:$0xff]   ;;  %v863_v10 = vld [vmem:[%s1139_s1 + $0x10] sm:$0xff]  }
   0x4   :  { %v856_v3 = vld [vmem:[%s1139_s1 + $0x80] sm:$0xff]   ;;  %754 = vmatpush3.bf16.msra.mxu0 %v855_v2  ;;  %v860_v7 = vld [vmem:[%s1139_s1 + $0x88] sm:$0xff]   ;;  %v864_v11 = vld [vmem:[%s1139_s1 + $0x90] sm:$0xff]  }
   0x5   :  { %782 = vmatpush3.bf16.msra.mxu1 %v856_v3  ;;  %755 = vmatprep.subr.bf16.mxu0 %v857_v4  ;;  %v865_v12 = vld [vmem:[%s1139_s1 + $0x58] sm:$0xff]   ;;  %v869_v16 = vld [vmem:[%s1139_s1 + $0x60] sm:$0xff]   ;;  %v873_v20 = vld [vmem:[%s1139_s1 + $0x68] sm:$0xff]  }
   0x6   :  { %783 = vmatprep.subr.bf16.mxu1 %v858_v5  ;;  %v866_v13 = vld [vmem:[%s1139_s1 + $0xd8] sm:$0xff]   ;;  %v870_v17 = vld [vmem:[%s1139_s1 + $0xe0] sm:$0xff]   ;;  %v874_v21 = vld [vmem:[%s1139_s1 + $0xe8] sm:$0xff]  }
   0x7   :  { %v867_v14 = vld [vmem:[%s1139_s1 + $0x18] sm:$0xff]   ;;  %v871_v18 = vld [vmem:[%s1139_s1 + $0x20] sm:$0xff]   ;;  %v875_v22 = vld [vmem:[%s1139_s1 + $0x28] sm:$0xff]  }
   0x8   :  { %756 = vmatpush3.bf16.msra.mxu0 %v859_v6  ;;  %v868_v15 = vld [vmem:[%s1139_s1 + $0x98] sm:$0xff]   ;;  %v872_v19 = vld [vmem:[%s1139_s1 + $0xa0] sm:$0xff]   ;;  %v876_v23 = vld [vmem:[%s1139_s1 + $0xa8] sm:$0xff]  }
   0x9   :  { %784 = vmatpush3.bf16.msra.mxu1 %v860_v7  ;;  %757 = vmatprep.subr.bf16.mxu0 %v861_v8  ;;  %v877_v24 = vld [vmem:[%s1139_s1 + $0x70] sm:$0xff]   ;;  %v881_v28 = vld [vmem:[%s1139_s1 + $0x78] sm:$0xff]   ;;  %v888_v34 = vld [vmem:[%s1140_s0 + $0x8] ss:$24 sps:$4 sm:$0xff]  }
   0xa   :  { %785 = vmatprep.subr.bf16.mxu1 %v862_v9  ;;  %v878_v25 = vld [vmem:[%s1139_s1 + $0xf0] sm:$0xff]   ;;  %v882_v29 = vld [vmem:[%s1139_s1 + $0xf8] sm:$0xff]   ;;  %v890_v35 = vld [vmem:[%s1140_s0 + $0xc] ss:$24 sps:$4 sm:$0xff]  }
   0xb   :  { %v879_v26 = vld [vmem:[%s1139_s1 + $0x30] sm:$0xff]   ;;  %v883_v30 = vld [vmem:[%s1139_s1 + $0x38] sm:$0xff]   ;;  %v891_v36 = vld [vmem:[%s1139_s1 + $0x140] sm:$0xff]   ;;  %562 = vmatprep.mubr.bf16.mxu1 %v890_v35 }
   0xc   :  { %758 = vmatpush3.bf16.msra.mxu0 %v863_v10  ;;  %v880_v27 = vld [vmem:[%s1139_s1 + $0xb0] sm:$0xff]   ;;  %v884_v31 = vld [vmem:[%s1139_s1 + $0xb8] sm:$0xff]   ;;  %v892_v37 = vld [vmem:[%s1139_s1 + $0x100] sm:$0xff]  }
   0xd   :  { %786 = vmatpush3.bf16.msra.mxu1 %v864_v11  ;;  %759 = vmatprep.subr.bf16.mxu0 %v865_v12  ;;  %v885_v32 = vld [vmem:[%s1140_s0] ss:$24 sps:$4 sm:$0xff]   ;;  %v887_v33 = vld [vmem:[%s1140_s0 + $0x4] ss:$24 sps:$4 sm:$0xff]   ;;  %v893_v38 = vld [vmem:[%s1139_s1 + $0x148] sm:$0xff]  }
   0xe   :  { %787 = vmatprep.subr.bf16.mxu1 %v866_v13  ;;  %513 = vmatprep.mubr.bf16.mxu0 %v887_v33  ;;  %v894_v39 = vld [vmem:[%s1139_s1 + $0x108] sm:$0xff]   ;;  %v895_v40 = vld [vmem:[%s1139_s1 + $0x150] sm:$0xff]   ;;  %v897_v42 = vld [vmem:[%s1139_s1 + $0x158] sm:$0xff]  }
   0xf   :  { %v896_v41 = vld [vmem:[%s1139_s1 + $0x110] sm:$0xff]   ;;  %v898_v43 = vld [vmem:[%s1139_s1 + $0x118] sm:$0xff]   ;;  %v899_v47 = vld [vmem:[%s1139_s1 + $0x160] sm:$0xff]  }
  0x10   :  { %760 = vmatpush3.bf16.msra.mxu0 %v867_v14  ;;  %v901_v44 = vld [vmem:[%s1140_s0 + $0x34] ss:$24 sps:$4 sm:$0xff]   ;;  %v903_v45 = vld [vmem:[%s1140_s0 + $0x30] ss:$24 sps:$4 sm:$0xff]   ;;  %v900_v49 = vld [vmem:[%s1139_s1 + $0x120] sm:$0xff]  }
  0x11   :  { %788 = vmatpush3.bf16.msra.mxu1 %v868_v15  ;;  %761 = vmatprep.subr.bf16.mxu0 %v869_v16  ;;  %v904_v46 = vld [vmem:[%s1140_s0 + $0x3c] ss:$24 sps:$4 sm:$0xff]   ;;  %v907_v48 = vld [vmem:[%s1140_s0 + $0x38] ss:$24 sps:$4 sm:$0xff]   ;;  %v906_v50 = vld [vmem:[%s1139_s1 + $0x168] sm:$0xff]  }
  0x12   :  { %789 = vmatprep.subr.bf16.mxu1 %v870_v17  ;;  %v908_v51 = vld [vmem:[%s1139_s1 + $0x128] sm:$0xff]   ;;  %v909_v53 = vld [vmem:[%s1139_s1 + $0x170] sm:$0xff]   ;;  %v918_v54 = vld [vmem:[%s1140_s0 + $0x44] ss:$24 sps:$4 sm:$0xff]  }
  0x13   :  { %v915_v52 = vld [vmem:[%s1140_s0 + $0x14] ss:$24 sps:$4 sm:$0xff]   ;;  %v911_v56 = vld [vmem:[%s1139_s1 + $0x178] sm:$0xff]   ;;  %v913_v58 = vld [vmem:[%s1140_s0 + $0x10] ss:$24 sps:$4 sm:$0xff]  }
  0x14   :  { %762 = vmatpush3.bf16.msra.mxu0 %v871_v18  ;;  %v910_v55 = vld [vmem:[%s1139_s1 + $0x130] sm:$0xff]   ;;  %v912_v57 = vld [vmem:[%s1139_s1 + $0x138] sm:$0xff]   ;;  %v664_v62 = vld [vmem:[%s1141_s2] ss:$0 sm:$0xff] }
  0x15   :  { %790 = vmatpush3.bf16.msra.mxu1 %v872_v19  ;;  %763 = vmatprep.subr.bf16.mxu0 %v873_v20  ;;  %v916_v59 = vld [vmem:[%s1140_s0 + $0x40] ss:$24 sps:$4 sm:$0xff]   ;;  %v751_v35 = vld [vmem:[%s1142_s3 + $0x8] sm:$0xff]  }
  0x16   :  { %791 = vmatprep.subr.bf16.mxu1 %v874_v21 }
  0x18   :  { %764 = vmatpush3.bf16.msra.mxu0 %v875_v22 }
  0x19   :  { %792 = vmatpush3.bf16.msra.mxu1 %v876_v23  ;;  %765 = vmatprep.subr.bf16.mxu0 %v877_v24 }
  0x1a   :  { %793 = vmatprep.subr.bf16.mxu1 %v878_v25 }
  0x1c   :  { %766 = vmatpush3.bf16.msra.mxu0 %v879_v26 }
  0x1d   :  { %794 = vmatpush3.bf16.msra.mxu1 %v880_v27  ;;  %767 = vmatprep.subr.bf16.mxu0 %v881_v28 }
  0x1e   :  { %795 = vmatprep.subr.bf16.mxu1 %v882_v29 }
  0x20   :  { %768 = vmatpush3.bf16.msra.mxu0 %v883_v30 }
  0x21   :  { %796 = vmatpush3.bf16.msra.mxu1 %v884_v31  ;;  %809 = vmatprep.subr.bf16.mxu0 %v891_v36 }
  0x22   :  { %837 = vmatprep.subr.bf16.mxu1 %v891_v36 }
  0x23   :  { %514 = vmatmul.mubr.bf16.vlgmr.msra.gmra.mrb[0].mxu0 %v885_v32  ;;  %v734_v32 = vld [vmem:[%s1142_s3] sm:$0xff]  }
  0x24   :  { %563 = vmatmul.mubr.bf16.vlgmr.msra.gmra.mrb[0].mxu1 %v888_v34  ;;  %810 = vmatpush3.bf16.msra.mxu0 %v892_v37 }
  0x25   :  { %845 = vmatpush3.bf16.msra.mxu1 %v892_v37  ;;  %811 = vmatprep.subr.bf16.mxu0 %v893_v38 }
  0x26   :  { %838 = vmatprep.subr.bf16.mxu1 %v893_v38  ;;  %521 = vmatprep.mubr.bf16.mxu0 %v901_v44 }
  0x27   :  { %570 = vmatprep.mubr.bf16.mxu1 %v904_v46  ;;  %v739_v46 = vunpack.c.l.bf16 %v751_v35 }
  0x28   :  { %812 = vmatpush3.bf16.msra.mxu0 %v894_v39 }
  0x29   :  { %846 = vmatpush3.bf16.msra.mxu1 %v894_v39  ;;  %813 = vmatprep.subr.bf16.mxu0 %v895_v40 }
  0x2a   :  { %839 = vmatprep.subr.bf16.mxu1 %v895_v40 }
  0x2b   :  { %522 = vmatmul.mubr.bf16.gmra.mrb[4].mxu0 %v903_v45 }
  0x2c   :  { %814 = vmatpush3.bf16.msra.mxu0 %v896_v41  ;;  %571 = vmatmul.mubr.bf16.gmra.mrb[4].mxu1 %v907_v48  ;;  %v740_v48 = vunpack.c.h.bf16 %v751_v35 }
  0x2d   :  { %847 = vmatpush3.bf16.msra.mxu1 %v896_v41  ;;  %815 = vmatprep.subr.bf16.mxu0 %v897_v42  ;;  %v735_v41 = vunpack.c.l.bf16 %v734_v32 }
  0x2e   :  { %840 = vmatprep.subr.bf16.mxu1 %v897_v42  ;;  %611 = vmatprep.mubr.bf16.mxu0 %v915_v52 }
  0x2f   :  { %619 = vmatprep.mubr.bf16.mxu1 %v918_v54 }
  0x30   :  { %816 = vmatpush3.bf16.msra.mxu0 %v898_v43 }
  0x31   :  { %848 = vmatpush3.bf16.msra.mxu1 %v898_v43  ;;  %817 = vmatprep.subr.bf16.mxu0 %v899_v47  ;;  %v736_v43 = vunpack.c.h.bf16 %v734_v32 }
  0x32   :  { %841 = vmatprep.subr.bf16.mxu1 %v899_v47 }
  0x34   :  { %818 = vmatpush3.bf16.msra.mxu0 %v900_v49 }
  0x35   :  { %849 = vmatpush3.bf16.msra.mxu1 %v900_v49  ;;  %819 = vmatprep.subr.bf16.mxu0 %v906_v50 }
  0x36   :  { %842 = vmatprep.subr.bf16.mxu1 %v906_v50 }
  0x38   :  { %820 = vmatpush3.bf16.msra.mxu0 %v908_v51 }
  0x39   :  { %850 = vmatpush3.bf16.msra.mxu1 %v908_v51  ;;  %821 = vmatprep.subr.bf16.mxu0 %v909_v53 }
  0x3a   :  { %843 = vmatprep.subr.bf16.mxu1 %v909_v53 }
  0x3c   :  { %822 = vmatpush3.bf16.msra.mxu0 %v910_v55 }
  0x3d   :  { %851 = vmatpush3.bf16.msra.mxu1 %v910_v55  ;;  %823 = vmatprep.subr.bf16.mxu0 %v911_v56 }
  0x3e   :  { %844 = vmatprep.subr.bf16.mxu1 %v911_v56 }
  0x40   :  { %824 = vmatpush3.bf16.msra.mxu0 %v912_v57 }
  0x41   :  { %852 = vmatpush3.bf16.msra.mxu1 %v912_v57 }
  0x43   :  { %612 = vmatmul.mubr.bf16.vlgmr.msra.gmra.mrb[8].mxu0 %v913_v58 }
  0x44   :  { %620 = vmatmul.mubr.bf16.vlgmr.msra.gmra.mrb[8].mxu1 %v916_v59 }
  0xf6   :  { %v769_v60 = vpop.f32.mrb[0].mxu0 }
  0xf7   :  { %v797_v61 = vpop.f32.mrb[0].mxu1  ;;  %v770_v63 = vpop.f32.mrb[1].mxu0 }
  0xf8   :  { %v771_v0 = vadd.f32 %v770_v63, %v769_v60  ;;  %v798_v1 = vpop.f32.mrb[1].mxu1  ;;  %v772_v2 = vpop.f32.mrb[2].mxu0 }
  0xf9   :  { %v799_v3 = vadd.f32 %v798_v1, %v797_v61  ;;  %v800_v4 = vpop.f32.mrb[2].mxu1  ;;  %v773_v5 = vpop.f32.mrb[3].mxu0 }
  0xfa   :  { %v516_v6 = vadd.f32 %v771_v0, %v664_v62  ;;  %v774_v7 = vadd.f32 %v773_v5, %v772_v2  ;;  %v801_v8 = vpop.f32.mrb[3].mxu1 }
  0xfb   :  { %v802_v9 = vadd.f32 %v801_v8, %v800_v4 }
  0xfc   :  { %v565_v10 = vadd.f32 %v799_v3, %v516_v6  ;;  %v519_v11 = vadd.f32 %v774_v7, %v664_v62 }
  0xfe   :  { %v568_v12 = vadd.f32 %v802_v9, %v519_v11  ;;  %v775_v13 = vpop.f32.mrb[4].mxu0 }
  0xff   :  { %v776_v14 = vpop.f32.mrb[5].mxu0  ;;  %v803_v15 = vpop.f32.mrb[4].mxu1 }
 0x100   :  { %v777_v16 = vadd.f32 %v776_v14, %v775_v13  ;;  %v778_v17 = vpop.f32.mrb[6].mxu0  ;;  %v804_v18 = vpop.f32.mrb[5].mxu1 }
 0x101   :  { %v779_v19 = vpop.f32.mrb[7].mxu0  ;;  %v805_v20 = vadd.f32 %v804_v18, %v803_v15  ;;  %v806_v21 = vpop.f32.mrb[6].mxu1 }
 0x102   :  { %v524_v22 = vadd.f32 %v777_v16, %v664_v62  ;;  %v780_v23 = vadd.f32 %v779_v19, %v778_v17  ;;  %v807_v24 = vpop.f32.mrb[7].mxu1 }
 0x103   :  { %v808_v25 = vadd.f32 %v807_v24, %v806_v21 }
 0x104   :  { %v527_v26 = vadd.f32 %v780_v23, %v664_v62  ;;  %v573_v27 = vadd.f32 %v805_v20, %v524_v22 }
 0x106   :  { %v576_v28 = vadd.f32 %v808_v25, %v527_v26 }
 0x116   :  { %v825_v29 = vpop.f32.mrb[8].mxu0 }
 0x117   :  { %v831_v30 = vpop.f32.mrb[8].mxu1  ;;  %v826_v31 = vpop.f32.mrb[9].mxu0 }
 0x118   :  { %v827_v33 = vadd.f32 %v826_v31, %v825_v29  ;;  %v832_v34 = vpop.f32.mrb[9].mxu1  ;;  %v828_v36 = vpop.f32.mrb[10].mxu0 }
 0x119   :  { %v833_v37 = vadd.f32 %v832_v34, %v831_v30  ;;  %v834_v38 = vpop.f32.mrb[10].mxu1  ;;  %v829_v39 = vpop.f32.mrb[11].mxu0 }
 0x11a   :  { %v614_v40 = vadd.f32 %v827_v33, %v565_v10  ;;  %v830_v42 = vadd.f32 %v829_v39, %v828_v36  ;;  %v835_v44 = vpop.f32.mrb[11].mxu1 }
 0x11b   :  { %v622_v45 = vadd.f32 %v833_v37, %v573_v27  ;;  %v836_v47 = vadd.f32 %v835_v44, %v834_v38 }
 0x11c   :  { %v617_v49 = vadd.f32 %v830_v42, %v568_v12  ;;  %v636_v51 = vadd.f32 %v735_v41, %v614_v40 }
 0x11d   :  { %v625_v50 = vadd.f32 %v836_v47, %v576_v28  ;;  %v638_v53 = vadd.f32 %v739_v46, %v622_v45 }
 0x11e   :  { %v637_v52 = vadd.f32 %v736_v43, %v617_v49 }
 0x11f   :  { %v639_v54 = vadd.f32 %v740_v48, %v625_v50 }
 0x120   :  { %v744_v55 = vpack.c.bf16 %v637_v52, %v636_v51 }
 0x121   :  { %v749_v56 = vpack.c.bf16 %v639_v54, %v638_v53 }
 0x122   :  { %745 = vst [vmem:[%s1143_s4] sm:$0xff] %v744_v55  }
 0x123   :  { %752 = vst [vmem:[%s1143_s4 + $0x8] sm:$0xff] %v749_v56  }

// kernel: medsam_forward.26
= control target key start
LH: loop header
LB: loop body
LE: loop exit
PB: predicated region body
PF: predicated region fallthrough
CT: control target
= control target key end

     0   :  { %v469_v1 = vmov 0   ;;  %v53_v27 = vlaneseq  ;;  %s595_s1 = inlined_call_operand.vmem [shape: bf16[128,384], index: 1, kind: input, shape index: {}]   ;;  %s596_s0 = inlined_call_operand.vmem [shape: bf16[32,128], index: 0, kind: input, shape index: {}]   ;;  %s597_s2 = inlined_call_operand.vmem [shape: f32[1,384], index: 2, kind: input, shape index: {}]   ;;  %s598_s3 = inlined_call_operand.vmem [shape: bf16[32,384], index: 3, kind: output, shape index: {}]  }
   0x1   :  { %v435_v0 = vld [vmem:[%s595_s1 + $0x4] ss:$12 sps:$4 sm:$0xff]   ;;  %240 = vmatprep.mubr.bf16.mxu0 %v469_v1  ;;  %v437_v2 = vld [vmem:[%s595_s1] ss:$12 sps:$4 sm:$0xff]   ;;  %v438_v3 = vld [vmem:[%s595_s1 + $0x1c] ss:$12 sps:$4 sm:$0xff]  }
   0x2   :  { %208 = vmatprep.subr.bf16.mxu0 %v435_v0  ;;  %v440_v4 = vld [vmem:[%s595_s1 + $0x18] ss:$12 sps:$4 sm:$0xff]   ;;  %v441_v5 = vld [vmem:[%s595_s1 + $0x8] ss:$12 sps:$4 sm:$0xff]   ;;  %v445_v7 = vld [vmem:[%s595_s1 + $0x20] ss:$12 sps:$4 sm:$0xff]  }
   0x3   :  { %209 = vmatpush1.bf16.msra.mxu0 %v437_v2  ;;  %v442_v6 = vld [vmem:[%s595_s1 + $0x34] ss:$12 sps:$4 sm:$0xff]   ;;  %414 = vmatprep.subr.bf16.mxu1 %v441_v5  ;;  %v444_v8 = vld [vmem:[%s595_s1 + $0x30] ss:$12 sps:$4 sm:$0xff]   ;;  %v446_v9 = vld [vmem:[%s595_s1 + $0x4c] ss:$12 sps:$4 sm:$0xff]  }
   0x4   :  { %210 = vmatprep.subr.bf16.mxu0 %v438_v3  ;;  %415 = vmatpush3.bf16.msra.mxu1 %v441_v5  ;;  %v449_v10 = vld [vmem:[%s595_s1 + $0x38] ss:$12 sps:$4 sm:$0xff]   ;;  %v448_v11 = vld [vmem:[%s595_s1 + $0x48] ss:$12 sps:$4 sm:$0xff]   ;;  %v453_v12 = vld [vmem:[%s595_s1 + $0x50] ss:$12 sps:$4 sm:$0xff]  }
   0x5   :  { %416 = vmatprep.subr.bf16.mxu1 %v445_v7  ;;  %v450_v13 = vld [vmem:[%s595_s1 + $0x64] ss:$12 sps:$4 sm:$0xff]   ;;  %v452_v14 = vld [vmem:[%s595_s1 + $0x60] ss:$12 sps:$4 sm:$0xff]   ;;  %v457_v15 = vld [vmem:[%s595_s1 + $0x68] ss:$12 sps:$4 sm:$0xff]  }
   0x6   :  { %v454_v16 = vld [vmem:[%s595_s1 + $0x7c] ss:$12 sps:$4 sm:$0xff]   ;;  %v456_v17 = vld [vmem:[%s595_s1 + $0x78] ss:$12 sps:$4 sm:$0xff]   ;;  %v461_v19 = vld [vmem:[%s595_s1 + $0x80] ss:$12 sps:$4 sm:$0xff]  }
   0x7   :  { %211 = vmatpush1.bf16.msra.mxu0 %v440_v4  ;;  %v466_v18 = vld [vmem:[%s596_s0] sm:$0xff]   ;;  %v460_v21 = vld [vmem:[%s595_s1 + $0x90] ss:$12 sps:$4 sm:$0xff]   ;;  %v462_v23 = vld [vmem:[%s595_s1 + $0xac] ss:$12 sps:$4 sm:$0xff]   ;;  %v54_v28 = vshrl.u32 %v53_v27, 7 }
   0x8   :  { %212 = vmatprep.subr.bf16.mxu0 %v442_v6  ;;  %417 = vmatpush3.bf16.msra.mxu1 %v445_v7  ;;  %v458_v20 = vld [vmem:[%s595_s1 + $0x94] ss:$12 sps:$4 sm:$0xff]   ;;  %v465_v22 = vld [vmem:[%s595_s1 + $0x98] ss:$12 sps:$4 sm:$0xff]   ;;  %v467_v25 = vld [vmem:[%s595_s1 + $0xb0] ss:$12 sps:$4 sm:$0xff]  }
   0x9   :  { %418 = vmatprep.subr.bf16.mxu1 %v449_v10  ;;  %430 = vmatprep.mubr.bf16.mxu1 %v466_v18  ;;  %v464_v24 = vld [vmem:[%s595_s1 + $0xa8] ss:$12 sps:$4 sm:$0xff]   ;;  %v55_v29 = vsub.s32 0, %v54_v28  ;;  %v51_v30 = vld [vmem:[%s597_s2] sm:$0x7]  ;;  %v59_v31 = vsub.s32 1, %v54_v28 }
   0xa   :  { %v468_v26 = vld [vmem:[%s596_s0 + $0x8] sm:$0xff]   ;;  %v63_v32 = vsub.s32 2, %v54_v28 }
   0xb   :  { %213 = vmatpush1.bf16.msra.mxu0 %v444_v8  ;;  %v56_v33 = vrot.slane %v51_v30, %v55_v29  ;;  %v60_v34 = vrot.slane %v51_v30, %v59_v31 }
   0xc   :  { %214 = vmatprep.subr.bf16.mxu0 %v446_v9  ;;  %419 = vmatpush3.bf16.msra.mxu1 %v449_v10  ;;  %v64_v36 = vrot.slane %v51_v30, %v63_v32 }
   0xd   :  { %420 = vmatprep.subr.bf16.mxu1 %v453_v12 }
   0xf   :  { %215 = vmatpush1.bf16.msra.mxu0 %v448_v11 }
  0x10   :  { %216 = vmatprep.subr.bf16.mxu0 %v450_v13  ;;  %421 = vmatpush3.bf16.msra.mxu1 %v453_v12 }
  0x11   :  { %422 = vmatprep.subr.bf16.mxu1 %v457_v15 }
  0x13   :  { %217 = vmatpush1.bf16.msra.mxu0 %v452_v14 }
  0x14   :  { %218 = vmatprep.subr.bf16.mxu0 %v454_v16  ;;  %423 = vmatpush3.bf16.msra.mxu1 %v457_v15 }
  0x15   :  { %424 = vmatprep.subr.bf16.mxu1 %v461_v19 }
  0x17   :  { %219 = vmatpush1.bf16.msra.mxu0 %v456_v17 }
  0x18   :  { %220 = vmatprep.subr.bf16.mxu0 %v458_v20  ;;  %425 = vmatpush3.bf16.msra.mxu1 %v461_v19 }
  0x19   :  { %426 = vmatprep.subr.bf16.mxu1 %v465_v22 }
  0x1b   :  { %221 = vmatpush1.bf16.msra.mxu0 %v460_v21 }
  0x1c   :  { %222 = vmatprep.subr.bf16.mxu0 %v462_v23  ;;  %427 = vmatpush3.bf16.msra.mxu1 %v465_v22 }
  0x1d   :  { %428 = vmatprep.subr.bf16.mxu1 %v467_v25 }
  0x1f   :  { %223 = vmatpush1.bf16.msra.mxu0 %v464_v24 }
  0x20   :  { %429 = vmatpush3.bf16.msra.mxu1 %v467_v25 }
  0x22   :  { %241 = vmatmul.mubr.bf16.vlgmr.msra.gmra.mrb[0].mxu0 %v466_v18 }
  0x23   :  { %250 = vmatprep.mubr.bf16.mxu0 %v469_v1  ;;  %431 = vmatmul.mubr.bf16.vlgmr.msra.gmra.mrb[0].mxu1 %v468_v26 }
  0x2a   :  { %251 = vmatmul.mubr.bf16.gmra.mrb[4].mxu0 %v468_v26 }
  0xf5   :  { %v242_v35 = vpop.f32.mrb[0].mxu0 }
  0xf6   :  { %v243_v37 = vadd.f32 %v242_v35, %v56_v33  ;;  %v244_v38 = vpop.f32.mrb[1].mxu0  ;;  %v432_v43 = vpop.f32.mrb[0].mxu1 }
  0xf7   :  { %v245_v39 = vadd.f32 %v244_v38, %v60_v34  ;;  %v246_v40 = vpop.f32.mrb[2].mxu0  ;;  %v304_v46 = vadd.f32 %v432_v43, %v64_v36  ;;  %v295_v47 = vpop.f32.mrb[1].mxu1 }
  0xf8   :  { %v247_v41 = vadd.f32 %v246_v40, %v56_v33  ;;  %v248_v42 = vpop.f32.mrb[3].mxu0  ;;  %v296_v48 = vadd.f32 %v295_v47, %v64_v36  ;;  %v433_v49 = vpop.f32.mrb[2].mxu1 }
  0xf9   :  { %v396_v44 = vpack.c.bf16 %v245_v39, %v243_v37  ;;  %v249_v45 = vadd.f32 %v248_v42, %v60_v34  ;;  %v401_v51 = vpack.c.bf16 %v304_v46, %v304_v46  ;;  %v307_v52 = vadd.f32 %v433_v49, %v64_v36  ;;  %v298_v53 = vpop.f32.mrb[3].mxu1 }
  0xfa   :  { %v397_v54 = vpack.c.bf16 %v296_v48, %v296_v48  ;;  %v299_v55 = vadd.f32 %v298_v53, %v64_v36 }
  0xfb   :  { %350 = vst [vmem:[%s598_s3] sm:$0xff] %v396_v44  ;;  %v398_v50 = vpack.c.bf16 %v249_v45, %v247_v41  ;;  %355 = vst [vmem:[%s598_s3 + $0x20] sm:$0xf] %v401_v51  ;;  %v403_v56 = vpack.c.bf16 %v307_v52, %v307_v52 }
  0xfc   :  { %351 = vst [vmem:[%s598_s3 + $0x8] sm:$0xf] %v397_v54  ;;  %v399_v59 = vpack.c.bf16 %v299_v55, %v299_v55 }
  0xfd   :  { %352 = vst [vmem:[%s598_s3 + $0xc] sm:$0xff] %v398_v50  ;;  %v252_v57 = vpop.f32.mrb[4].mxu0  ;;  %357 = vst [vmem:[%s598_s3 + $0x2c] sm:$0xf] %v403_v56 }
  0xfe   :  { %v253_v58 = vadd.f32 %v252_v57, %v56_v33  ;;  %v254_v60 = vpop.f32.mrb[5].mxu0  ;;  %353 = vst [vmem:[%s598_s3 + $0x14] sm:$0xf] %v399_v59 }
  0xff   :  { %v255_v61 = vadd.f32 %v254_v60, %v60_v34  ;;  %v256_v62 = vpop.f32.mrb[6].mxu0 }
 0x100   :  { %v257_v63 = vadd.f32 %v256_v62, %v56_v33  ;;  %v258_v0 = vpop.f32.mrb[7].mxu0 }
 0x101   :  { %v400_v1 = vpack.c.bf16 %v255_v61, %v253_v58  ;;  %v259_v2 = vadd.f32 %v258_v0, %v60_v34 }
 0x103   :  { %354 = vst [vmem:[%s598_s3 + $0x18] sm:$0xff] %v400_v1  ;;  %v402_v3 = vpack.c.bf16 %v259_v2, %v257_v63 }
 0x105   :  { %356 = vst [vmem:[%s598_s3 + $0x24] sm:$0xff] %v402_v3 }

// kernel: medsam_forward.27
= control target key start
LH: loop header
LB: loop body
LE: loop exit
PB: predicated region body
PF: predicated region fallthrough
CT: control target
= control target key end

     0   :  { %s777_s12 = smov 0   ;;  %s779_s13 = smov 0   ;;  %s835_s0 = inlined_call_operand.vmem [shape: bf16[2,16,128], index: 0, kind: input, shape index: {}]   ;;  %s836_s1 = inlined_call_operand.vmem [shape: bf16[2,16,128], index: 1, kind: input, shape index: {}]   ;;  %s837_s2 = inlined_call_operand.vmem [shape: bf16[2,16,128], index: 2, kind: input, shape index: {}]   ;;  %s838_s3 = inlined_call_operand.vmem [shape: bf16[2,16,128], index: 3, kind: output, shape index: {}]  }
   0x1   :  { %s781_s14 = smov 0  }
   0x2 LB: > { %s32_s15 = sadd.s32 1, %s747_s13  ;;  %p640_p0 = scmp.ge.s32.totalorder %s751_s14, 1  ;;  %s751_s14 = sphi %s781_s14, %s13_s14   ;;  %s747_s13 = sphi %s779_s13, %s840_s13   ;;  %s743_s12 = sphi %s777_s12, %s839_s12  }
   0x3   : > { %p34_p1 = scmp.ge.s32.totalorder %s32_s15, 2  ;;  %p199_p2 = scmp.lt.s32.totalorder %s751_s14, 3 }
   0x5   : > { %s842_s15 = smov (%p34_p1, %s32_s15), 0  ;;  %p200_p3 = pnand %p640_p0, %p199_p2 }
   0x6   : > { %p250_p4 = scmp.lt.s32.totalorder (!%p200_p3), %s743_s12, 1  ;;  %v753_v0 = vmov (!%p200_p3), 0.0   ;;  %vm754_vm0 = vmmov (!%p200_p3), 0   ;;  %vm294_vm1 = vcmask (!%p200_p3), 7168   ;;  %v755_v3 = vmov (!%p200_p3), -1e+30  }
   0x7   : > { %203 = sbr.rel (%p200_p3) target bundleno = 826 (0x33a), region = 32  ;;  %672 = vmatprep.subr.bf16.mxu0 (!%p200_p3), %v753_v0  ;;  %674 = vmatprep.mubr.msk.bf16.mxu0 (!%p200_p3), %vm754_vm0, %v753_v0  ;;  %295 = vst.msk [vmem:[#allocation2] sm:$0xff] (!%p200_p3), %vm294_vm1, %v755_v3  ;;  %296 = vst.msk [vmem:[#allocation2 + $0x8] sm:$0xff] (!%p200_p3), %vm294_vm1, %v755_v3  ;;  %vm360_vm2 = vcmask (!%p200_p3), 130048   ;;  %v756_v10 = vmov (!%p200_p3), 0  }
   0x8   : > { %678 = vmatprep.subr.bf16.mxu1 (!%p200_p3), %v753_v0  ;;  %680 = vmatprep.mubr.msk.bf16.mxu1 (!%p200_p3), %vm754_vm0, %v753_v0  ;;  %297 = vst.msk [vmem:[#allocation3] sm:$0xff] (!%p200_p3), %vm294_vm1, %v753_v0  ;;  %298 = vst.msk [vmem:[#allocation3 + $0x8] sm:$0xff] (!%p200_p3), %vm294_vm1, %v753_v0 }
   0x9   : > { %712 = vset.pattern.permute.xlu1 (!%p200_p3), %v756_v10  ;;  %713 = vset.pattern.permute.xlu0 (!%p200_p3), %v756_v10 }
   0xe   : > { %s844_s12 = smov (!%p250_p4, %s743_s12), 1  ;;  %v358_v11 = vld [vmem:[#allocation2] sm:$0xff]  ;;  %v359_v14 = vld [vmem:[#allocation2 + $0x8] sm:$0xff] }
   0xf   : > { %s795_s16 = sshll.u32 %s844_s12, 3  ;;  %v391_v35 = vld [vmem:[#allocation3] sm:$0xff]  ;;  %v392_v38 = vld [vmem:[#allocation3 + $0x8] sm:$0xff] }
  0x10   : > { %s267_s19 = scalar_lea.vmem %s836_s1, %s795_s16  ;;  %s257_s22 = scalar_lea.vmem %s835_s0, %s795_s16 }
  0x11   : > { %v714_v1 = vld [vmem:[%s267_s19] sm:$0xff]   ;;  %s277_s25 = scalar_lea.vmem %s837_s2, %s795_s16  ;;  %s287_s28 = scalar_lea.vmem %s838_s3, %s795_s16 }
  0x12   : > { %673 = vmatpush3.bf16.xpose.msra.mxu0 %v714_v1  ;;  %v715_v2 = vld [vmem:[%s257_s22] sm:$0xff]  }
  0x13   : > { %v716_v19 = vld [vmem:[%s277_s25] sm:$0xff]  }
  0x14   : > { %679 = vmatpush3.bf16.msra.mxu1 %v716_v19 }
  0x19   : > { %675 = vmatmul.mubr.bf16.vlgmr.msra.gmra.mrb[0].mxu0 %v715_v2 }
  0xec   : > { %v351_v4 = vpop.f32.mrb[0].mxu0 }
  0xed   : > { %v676_v5 = vpop.f32.mrb[1].mxu0  ;;  %v361_v6 = vsel %vm360_vm2, %v351_v4, -inf }
  0xee   : > { %362 = vmax.xlane.f32.xlu0 %v361_v6  ;;  %v354_v7 = vpop.f32.mrb[2].mxu0 }
  0xef   : > { %v677_v8 = vpop.f32.mrb[3].mxu0  ;;  %v364_v9 = vsel %vm360_vm2, %v354_v7, -inf }
  0xf2   : > { %365 = vmax.xlane.f32.xlu0 %v364_v9 }
 0x17b   : > { %v363_v12 = vpop.xlane.xlu0 %362 }
 0x17c   : > { %v367_v13 = vmax.f32 %v358_v11, %v363_v12 }
 0x17e   : > { %v369_v15 = vsub.f32 %v358_v11, %v367_v13  ;;  %477 = vst.msk [vmem:[#allocation2] sm:$0xff] %vm294_vm1, %v367_v13  ;;  %377 = vperm.xlu1 %712, %v367_v13  }
 0x17f   : > { %v366_v16 = vpop.xlane.xlu0 %365 }
 0x180   : > { %v368_v17 = vmax.f32 %v359_v14, %v366_v16  ;;  %v371_v32 = vmul.f32 1.442695, %v369_v15 }
 0x182   : > { %v370_v18 = vsub.f32 %v359_v14, %v368_v17  ;;  %478 = vst.msk [vmem:[#allocation2 + $0x8] sm:$0xff] %vm294_vm1, %v368_v17  ;;  %382 = vperm.xlu1 %712, %v368_v17  }
 0x184   : > { %v373_v31 = vmul.f32 1.442695, %v370_v18 }
 0x1fd   : > { %v378_v20 = vpop.permute.xlu1 %377 }
 0x1fe   : > { %v385_v21 = vsub.f32 %v351_v4, %v378_v20 }
 0x200   : > { %v387_v22 = vmul.f32 1.442695, %v385_v21 }
 0x201   : > { %v383_v23 = vpop.permute.xlu1 %382 }
 0x202   : > { %717 = vpow2.f32 %v387_v22  ;;  %v386_v24 = vsub.f32 %v354_v7, %v383_v23 }
 0x204   : > { %v389_v25 = vmul.f32 1.442695, %v386_v24 }
 0x206   : > { %719 = vpow2.f32 %v389_v25 }
 0x207   : > { %721 = vpow2.f32 %v373_v31 }
 0x208   : > { %723 = vpow2.f32 %v371_v32 }
 0x20c   : > { %v718_v26 = vpop.eup %717 }
 0x20d   : > { %v395_v27 = vsel %vm360_vm2, %v718_v26, 0.0 }
 0x20e   : > { %396 = vadd.xlane.f32.xlu0 %v395_v27 }
 0x210   : > { %v720_v28 = vpop.eup %719 }
 0x211   : > { %v398_v29 = vsel %vm360_vm2, %v720_v28, 0.0  ;;  %v420_v30 = vpack.c.bf16 %v720_v28, %v718_v26  ;;  %v722_v33 = vpop.eup %721 }
 0x212   : > { %399 = vadd.xlane.f32.xlu1 %v398_v29  ;;  %v724_v34 = vpop.eup %723  ;;  %v394_v40 = vmul.f32 %v722_v33, %v392_v38 }
 0x213   : > { %681 = vmatmul.mubr.msk.bf16.vlgmr.msra.gmra.mrb[0].mxu1 %vm360_vm2, %v420_v30  ;;  %v393_v36 = vmul.f32 %v724_v34, %v391_v35 }
 0x223   : > { %415 = vperm.xlu1 %712, %v722_v33  }
 0x224   : > { %410 = vperm.xlu0 %713, %v724_v34  }
 0x29b   : > { %v397_v37 = vpop.xlane.xlu0 %396 }
 0x29c   : > { %v401_v39 = vadd.f32 %v397_v37, %v393_v36 }
 0x29e   : > { %404 = vst.msk [vmem:[#allocation3] sm:$0xff] %vm294_vm1, %v401_v39 }
 0x29f   : > { %v400_v41 = vpop.xlane.xlu1 %399 }
 0x2a0   : > { %v402_v42 = vadd.f32 %v400_v41, %v394_v40 }
 0x2a2   : > { %405 = vst.msk [vmem:[#allocation3 + $0x8] sm:$0xff] %vm294_vm1, %v402_v42 }
 0x2a3   : > { %v411_v51 = vpop.permute.xlu0 %410  ;;  %v416_v52 = vpop.permute.xlu1 %415 }
 0x2a4   : > { %v419_v54 = vmul.f32 0.0, %v416_v52  ;;  %v418_v55 = vmul.f32 0.0, %v411_v51 }
 0x2a5   : > { %v484_v43 = vld [vmem:[#allocation3] sm:$0xff] }
 0x2a6   : > { %725 = vrcp.f32 %v484_v43 }
 0x2a9   : > { %v485_v44 = vld [vmem:[#allocation3 + $0x8] sm:$0xff] }
 0x2aa   : > { %727 = vrcp.f32 %v485_v44 }
 0x2b0   : > { %v726_v45 = vpop.eup %725 }
 0x2b1   : > { %490 = vperm.xlu0 %713, %v726_v45  }
 0x2b4   : > { %v728_v46 = vpop.eup %727 }
 0x2b5   : > { %495 = vperm.xlu0 %713, %v728_v46  }
 0x2e6   : > { %v466_v47 = vpop.f32.mrb[0].mxu1 }
 0x2e7   : > { %v682_v48 = vpop.f32.mrb[1].mxu1  ;;  %v473_v56 = vadd.f32 %v466_v47, %v418_v55 }
 0x2e8   : > { %v469_v49 = vpop.f32.mrb[2].mxu1 }
 0x2e9   : > { %v683_v50 = vpop.f32.mrb[3].mxu1  ;;  %v474_v57 = vadd.f32 %v469_v49, %v419_v54 }
 0x330   : > { %v491_v53 = vpop.permute.xlu0 %490 }
 0x331   : > { %v498_v59 = vmul.f32 %v491_v53, %v473_v56 }
 0x334   : > { %v496_v58 = vpop.permute.xlu0 %495 }
 0x335   : > { %v499_v60 = vmul.f32 %v496_v58, %v474_v57 }
 0x337   : > { %v666_v61 = vpack.c.bf16 %v499_v60, %v498_v59 }
 0x339   : > { %667 = vst [vmem:[%s287_s28] sm:$0xff] %v666_v61  }
 0x33a PF: > { %s13_s14 = sadd.s32 1, %s751_s14   ;;  %s839_s12 = smov %s747_s13 }
 0x33b   : > { %p10_p5 = scmp.ge.s32.totalorder %s13_s14, 4   ;;  %s840_s13 = smov %s842_s15 }
 0x33d   :  { %12 = sbr.rel (!%p10_p5) target bundleno = 2 (0x2), region = 76 }

// kernel: medsam_forward.28
= control target key start
LH: loop header
LB: loop body
LE: loop exit
PB: predicated region body
PF: predicated region fallthrough
CT: control target
= control target key end

     0   :  { %s339_s1 = inlined_call_operand.vmem [shape: bf16[128,128], index: 1, kind: input, shape index: {}]   ;;  %s340_s0 = inlined_call_operand.vmem [shape: bf16[32,128], index: 0, kind: input, shape index: {}]   ;;  %s341_s2 = inlined_call_operand.vmem [shape: f32[1,128], index: 2, kind: input, shape index: {}]   ;;  %s342_s3 = inlined_call_operand.vmem [shape: bf16[32,128], index: 3, kind: input, shape index: {}]   ;;  %s343_s4 = inlined_call_operand.vmem [shape: bf16[32,128], index: 4, kind: output, shape index: {}]  }
   0x1   :  { %v259_v0 = vld [vmem:[%s339_s1] sm:$0xff]   ;;  %v260_v1 = vld [vmem:[%s339_s1 + $0x8] sm:$0xff]   ;;  %v261_v2 = vld [vmem:[%s339_s1 + $0x10] sm:$0xff]  }
   0x2   :  { %239 = vmatprep.subr.bf16.mxu0 %v259_v0  ;;  %v262_v3 = vld [vmem:[%s339_s1 + $0x18] sm:$0xff]   ;;  %v267_v4 = vld [vmem:[%s340_s0] sm:$0xff]   ;;  %v264_v6 = vld [vmem:[%s339_s1 + $0x28] sm:$0xff]  }
   0x3   :  { %240 = vmatpush3.bf16.msra.mxu0 %v259_v0  ;;  %255 = vmatprep.mubr.bf16.mxu0 %v267_v4  ;;  %v263_v5 = vld [vmem:[%s339_s1 + $0x20] sm:$0xff]   ;;  %v265_v7 = vld [vmem:[%s339_s1 + $0x30] sm:$0xff]   ;;  %v266_v8 = vld [vmem:[%s339_s1 + $0x38] sm:$0xff]  }
   0x4   :  { %241 = vmatprep.subr.bf16.mxu0 %v260_v1  ;;  %v268_v9 = vld [vmem:[%s340_s0 + $0x8] sm:$0xff]   ;;  %v190_v10 = vld [vmem:[%s341_s2] ss:$0 sm:$0xff] }
   0x5   :  { %v227_v11 = vld [vmem:[%s342_s3 + $0x8] sm:$0xff]   ;;  %v210_v12 = vld [vmem:[%s342_s3] sm:$0xff]  }
   0x6   :  { %v215_v15 = vunpack.c.l.bf16 %v227_v11  ;;  %v216_v17 = vunpack.c.h.bf16 %v227_v11  ;;  %v211_v19 = vunpack.c.l.bf16 %v210_v12  ;;  %v212_v21 = vunpack.c.h.bf16 %v210_v12 }
   0x7   :  { %242 = vmatpush3.bf16.msra.mxu0 %v260_v1 }
   0x8   :  { %243 = vmatprep.subr.bf16.mxu0 %v261_v2 }
   0xb   :  { %244 = vmatpush3.bf16.msra.mxu0 %v261_v2 }
   0xc   :  { %245 = vmatprep.subr.bf16.mxu0 %v262_v3 }
   0xf   :  { %246 = vmatpush3.bf16.msra.mxu0 %v262_v3 }
  0x10   :  { %247 = vmatprep.subr.bf16.mxu0 %v263_v5 }
  0x13   :  { %248 = vmatpush3.bf16.msra.mxu0 %v263_v5 }
  0x14   :  { %249 = vmatprep.subr.bf16.mxu0 %v264_v6 }
  0x17   :  { %250 = vmatpush3.bf16.msra.mxu0 %v264_v6 }
  0x18   :  { %251 = vmatprep.subr.bf16.mxu0 %v265_v7 }
  0x1b   :  { %252 = vmatpush3.bf16.msra.mxu0 %v265_v7 }
  0x1c   :  { %253 = vmatprep.subr.bf16.mxu0 %v266_v8 }
  0x1f   :  { %254 = vmatpush3.bf16.msra.mxu0 %v266_v8 }
  0x22   :  { %256 = vmatmul.mubr.bf16.vlgmr.msra.gmra.mrb[0].mxu0 %v268_v9 }
  0xf5   :  { %v257_v13 = vpop.f32.mrb[0].mxu0 }
  0xf6   :  { %v148_v14 = vadd.f32 %v257_v13, %v190_v10  ;;  %v139_v16 = vpop.f32.mrb[1].mxu0 }
  0xf7   :  { %v140_v18 = vadd.f32 %v190_v10, %v139_v16  ;;  %v258_v20 = vpop.f32.mrb[2].mxu0 }
  0xf8   :  { %v151_v22 = vadd.f32 %v258_v20, %v190_v10  ;;  %v142_v23 = vpop.f32.mrb[3].mxu0  ;;  %v164_v25 = vadd.f32 %v215_v15, %v148_v14 }
  0xf9   :  { %v143_v24 = vadd.f32 %v190_v10, %v142_v23  ;;  %v162_v27 = vadd.f32 %v211_v19, %v140_v18 }
  0xfa   :  { %v165_v26 = vadd.f32 %v216_v17, %v151_v22 }
  0xfb   :  { %v163_v28 = vadd.f32 %v212_v21, %v143_v24 }
  0xfc   :  { %v225_v29 = vpack.c.bf16 %v165_v26, %v164_v25 }
  0xfd   :  { %v220_v30 = vpack.c.bf16 %v163_v28, %v162_v27 }
  0xfe   :  { %228 = vst [vmem:[%s343_s4 + $0x8] sm:$0xff] %v225_v29  }
  0xff   :  { %221 = vst [vmem:[%s343_s4] sm:$0xff] %v220_v30  }

// kernel: medsam_forward.30
= control target key start
LH: loop header
LB: loop body
LE: loop exit
PB: predicated region body
PF: predicated region fallthrough
CT: control target
= control target key end

     0   :  { %v381_v1 = vmov 0   ;;  %v37_v19 = vlaneseq  ;;  %s527_s1 = inlined_call_operand.vmem [shape: bf16[128,256], index: 1, kind: input, shape index: {}]   ;;  %s528_s0 = inlined_call_operand.vmem [shape: bf16[32,128], index: 0, kind: input, shape index: {}]   ;;  %s529_s2 = inlined_call_operand.vmem [shape: f32[1,256], index: 2, kind: input, shape index: {}]   ;;  %s530_s3 = inlined_call_operand.vmem [shape: bf16[32,256], index: 3, kind: output, shape index: {}]  }
   0x1   :  { %v339_v0 = vld [vmem:[%s527_s1 + $0x4] ss:$8 sps:$4 sm:$0xff]   ;;  %171 = vmatprep.mubr.bf16.mxu0 %v381_v1  ;;  %181 = vmatprep.mubr.bf16.mxu1 %v381_v1  ;;  %v341_v2 = vld [vmem:[%s527_s1] ss:$8 sps:$4 sm:$0xff]   ;;  %v342_v3 = vld [vmem:[%s527_s1 + $0x14] ss:$8 sps:$4 sm:$0xff]  }
   0x2   :  { %139 = vmatprep.subr.bf16.mxu0 %v339_v0  ;;  %322 = vmatprep.subr.bf16.mxu1 %v339_v0  ;;  %v344_v4 = vld [vmem:[%s527_s1 + $0x10] ss:$8 sps:$4 sm:$0xff]   ;;  %v345_v5 = vld [vmem:[%s527_s1 + $0x24] ss:$8 sps:$4 sm:$0xff]   ;;  %v347_v6 = vld [vmem:[%s527_s1 + $0x20] ss:$8 sps:$4 sm:$0xff]  }
   0x3   :  { %140 = vmatpush1.bf16.msra.mxu0 %v341_v2  ;;  %330 = vmatpush1.bf16.msra.mxu1 %v341_v2  ;;  %v348_v7 = vld [vmem:[%s527_s1 + $0x34] ss:$8 sps:$4 sm:$0xff]   ;;  %v350_v8 = vld [vmem:[%s527_s1 + $0x30] ss:$8 sps:$4 sm:$0xff]   ;;  %v351_v9 = vld [vmem:[%s527_s1 + $0x44] ss:$8 sps:$4 sm:$0xff]  }
   0x4   :  { %141 = vmatprep.subr.bf16.mxu0 %v342_v3  ;;  %323 = vmatprep.subr.bf16.mxu1 %v342_v3  ;;  %v353_v10 = vld [vmem:[%s527_s1 + $0x40] ss:$8 sps:$4 sm:$0xff]   ;;  %v354_v11 = vld [vmem:[%s527_s1 + $0x54] ss:$8 sps:$4 sm:$0xff]   ;;  %v356_v12 = vld [vmem:[%s527_s1 + $0x50] ss:$8 sps:$4 sm:$0xff]  }
   0x5   :  { %v357_v13 = vld [vmem:[%s527_s1 + $0x64] ss:$8 sps:$4 sm:$0xff]   ;;  %v359_v14 = vld [vmem:[%s527_s1 + $0x60] ss:$8 sps:$4 sm:$0xff]   ;;  %v360_v15 = vld [vmem:[%s527_s1 + $0x74] ss:$8 sps:$4 sm:$0xff]  }
   0x6   :  { %v362_v16 = vld [vmem:[%s527_s1 + $0x70] ss:$8 sps:$4 sm:$0xff]   ;;  %v363_v17 = vld [vmem:[%s528_s0] sm:$0xff]   ;;  %v364_v18 = vld [vmem:[%s528_s0 + $0x8] sm:$0xff]   ;;  %v38_v20 = vshrl.u32 %v37_v19, 7 }
   0x7   :  { %142 = vmatpush1.bf16.msra.mxu0 %v344_v4  ;;  %331 = vmatpush1.bf16.msra.mxu1 %v344_v4  ;;  %v35_v22 = vld [vmem:[%s529_s2] sm:$0x3] }
   0x8   :  { %143 = vmatprep.subr.bf16.mxu0 %v345_v5  ;;  %324 = vmatprep.subr.bf16.mxu1 %v345_v5  ;;  %v39_v21 = vsub.s32 0, %v38_v20  ;;  %v43_v23 = vsub.s32 1, %v38_v20 }
   0xa   :  { %v40_v24 = vrot.slane %v35_v22, %v39_v21  ;;  %v44_v25 = vrot.slane %v35_v22, %v43_v23 }
   0xb   :  { %144 = vmatpush1.bf16.msra.mxu0 %v347_v6  ;;  %332 = vmatpush1.bf16.msra.mxu1 %v347_v6 }
   0xc   :  { %145 = vmatprep.subr.bf16.mxu0 %v348_v7  ;;  %325 = vmatprep.subr.bf16.mxu1 %v348_v7 }
   0xf   :  { %146 = vmatpush1.bf16.msra.mxu0 %v350_v8  ;;  %333 = vmatpush1.bf16.msra.mxu1 %v350_v8 }
  0x10   :  { %147 = vmatprep.subr.bf16.mxu0 %v351_v9  ;;  %326 = vmatprep.subr.bf16.mxu1 %v351_v9 }
  0x13   :  { %148 = vmatpush1.bf16.msra.mxu0 %v353_v10  ;;  %334 = vmatpush1.bf16.msra.mxu1 %v353_v10 }
  0x14   :  { %149 = vmatprep.subr.bf16.mxu0 %v354_v11  ;;  %327 = vmatprep.subr.bf16.mxu1 %v354_v11 }
  0x17   :  { %150 = vmatpush1.bf16.msra.mxu0 %v356_v12  ;;  %335 = vmatpush1.bf16.msra.mxu1 %v356_v12 }
  0x18   :  { %151 = vmatprep.subr.bf16.mxu0 %v357_v13  ;;  %328 = vmatprep.subr.bf16.mxu1 %v357_v13 }
  0x1b   :  { %152 = vmatpush1.bf16.msra.mxu0 %v359_v14  ;;  %336 = vmatpush1.bf16.msra.mxu1 %v359_v14 }
  0x1c   :  { %153 = vmatprep.subr.bf16.mxu0 %v360_v15  ;;  %329 = vmatprep.subr.bf16.mxu1 %v360_v15 }
  0x1f   :  { %154 = vmatpush1.bf16.msra.mxu0 %v362_v16  ;;  %337 = vmatpush1.bf16.msra.mxu1 %v362_v16 }
  0x22   :  { %172 = vmatmul.mubr.bf16.vlgmr.msra.gmra.mrb[0].mxu0 %v363_v17  ;;  %182 = vmatmul.mubr.bf16.vlgmr.msra.gmra.mrb[0].mxu1 %v364_v18 }
  0xf5   :  { %v173_v26 = vpop.f32.mrb[0].mxu0  ;;  %v183_v27 = vpop.f32.mrb[0].mxu1 }
  0xf6   :  { %v459_v28 = vadd.f32 %v173_v26, %v40_v24  ;;  %v461_v29 = vadd.f32 %v183_v27, %v40_v24  ;;  %v175_v30 = vpop.f32.mrb[1].mxu0  ;;  %v185_v31 = vpop.f32.mrb[1].mxu1 }
  0xf7   :  { %v463_v32 = vadd.f32 %v175_v30, %v44_v25  ;;  %v465_v33 = vadd.f32 %v185_v31, %v44_v25  ;;  %v177_v34 = vpop.f32.mrb[2].mxu0  ;;  %v187_v35 = vpop.f32.mrb[2].mxu1 }
  0xf8   :  { %v192_v36 = vmul.f32 %v459_v28, %v459_v28  ;;  %v196_v37 = vmul.f32 %v461_v29, %v461_v29  ;;  %v471_v38 = vadd.f32 %v177_v34, %v40_v24  ;;  %v473_v39 = vadd.f32 %v187_v35, %v40_v24  ;;  %v179_v40 = vpop.f32.mrb[3].mxu0  ;;  %v189_v41 = vpop.f32.mrb[3].mxu1 }
  0xf9   :  { %v193_v42 = vmul.f32 %v463_v32, %v463_v32  ;;  %v197_v43 = vmul.f32 %v465_v33, %v465_v33  ;;  %v479_v44 = vadd.f32 %v179_v40, %v44_v25  ;;  %v481_v45 = vadd.f32 %v189_v41, %v44_v25 }
  0xfa   :  { %v200_v46 = vmul.f32 %v192_v36, %v459_v28  ;;  %v204_v47 = vmul.f32 %v196_v37, %v461_v29  ;;  %v194_v48 = vmul.f32 %v471_v38, %v471_v38  ;;  %v198_v49 = vmul.f32 %v473_v39, %v473_v39 }
  0xfb   :  { %v201_v50 = vmul.f32 %v193_v42, %v463_v32  ;;  %v205_v51 = vmul.f32 %v197_v43, %v465_v33  ;;  %v195_v52 = vmul.f32 %v479_v44, %v479_v44  ;;  %v199_v53 = vmul.f32 %v481_v45, %v481_v45 }
  0xfc   :  { %v208_v54 = vmul.f32 0.044715, %v200_v46  ;;  %v212_v55 = vmul.f32 0.044715, %v204_v47  ;;  %v202_v56 = vmul.f32 %v194_v48, %v471_v38  ;;  %v206_v57 = vmul.f32 %v198_v49, %v473_v39 }
  0xfd   :  { %v209_v58 = vmul.f32 0.044715, %v201_v50  ;;  %v213_v59 = vmul.f32 0.044715, %v205_v51  ;;  %v203_v60 = vmul.f32 %v195_v52, %v479_v44  ;;  %v207_v61 = vmul.f32 %v199_v53, %v481_v45 }
  0xfe   :  { %v216_v62 = vadd.f32 %v208_v54, %v459_v28  ;;  %v220_v63 = vadd.f32 %v212_v55, %v461_v29  ;;  %v210_v0 = vmul.f32 0.044715, %v202_v56  ;;  %v214_v1 = vmul.f32 0.044715, %v206_v57 }
  0xff   :  { %v217_v2 = vadd.f32 %v209_v58, %v463_v32  ;;  %v221_v3 = vadd.f32 %v213_v59, %v465_v33  ;;  %v211_v4 = vmul.f32 0.044715, %v203_v60  ;;  %v215_v5 = vmul.f32 0.044715, %v207_v61 }
 0x100   :  { %v224_v6 = vmul.f32 0.7978846, %v216_v62  ;;  %v228_v7 = vmul.f32 0.7978846, %v220_v63  ;;  %v218_v8 = vadd.f32 %v210_v0, %v471_v38  ;;  %v222_v9 = vadd.f32 %v214_v1, %v473_v39 }
 0x101   :  { %v225_v10 = vmul.f32 0.7978846, %v217_v2  ;;  %v229_v11 = vmul.f32 0.7978846, %v221_v3  ;;  %v219_v12 = vadd.f32 %v211_v4, %v479_v44  ;;  %v223_v13 = vadd.f32 %v215_v5, %v481_v45 }
 0x102   :  { %365 = vtanh.f32 %v224_v6  ;;  %v226_v14 = vmul.f32 0.7978846, %v218_v8  ;;  %v230_v15 = vmul.f32 0.7978846, %v222_v9 }
 0x103   :  { %367 = vtanh.f32 %v228_v7  ;;  %v227_v16 = vmul.f32 0.7978846, %v219_v12  ;;  %v231_v17 = vmul.f32 0.7978846, %v223_v13 }
 0x104   :  { %369 = vtanh.f32 %v225_v10 }
 0x105   :  { %371 = vtanh.f32 %v229_v11 }
 0x106   :  { %373 = vtanh.f32 %v226_v14 }
 0x107   :  { %375 = vtanh.f32 %v230_v15 }
 0x108   :  { %377 = vtanh.f32 %v227_v16 }
 0x109   :  { %379 = vtanh.f32 %v231_v17 }
 0x10c   :  { %v366_v18 = vpop.eup %365 }
 0x10d   :  { %v368_v19 = vpop.eup %367  ;;  %v240_v20 = vadd.f32 1.0, %v366_v18 }
 0x10e   :  { %v370_v21 = vpop.eup %369  ;;  %v244_v22 = vadd.f32 1.0, %v368_v19 }
 0x10f   :  { %v372_v23 = vpop.eup %371  ;;  %v248_v24 = vmul.f32 0.5, %v240_v20  ;;  %v241_v25 = vadd.f32 1.0, %v370_v21 }
 0x110   :  { %v374_v26 = vpop.eup %373  ;;  %v252_v27 = vmul.f32 0.5, %v244_v22  ;;  %v245_v30 = vadd.f32 1.0, %v372_v23 }
 0x111   :  { %v376_v31 = vpop.eup %375  ;;  %v256_v34 = vmul.f32 %v248_v24, %v459_v28  ;;  %v249_v35 = vmul.f32 0.5, %v241_v25  ;;  %v242_v36 = vadd.f32 1.0, %v374_v26 }
 0x112   :  { %v378_v37 = vpop.eup %377  ;;  %v260_v40 = vmul.f32 %v252_v27, %v461_v29  ;;  %v253_v41 = vmul.f32 0.5, %v245_v30  ;;  %v246_v42 = vadd.f32 1.0, %v376_v31 }
 0x113   :  { %v380_v43 = vpop.eup %379  ;;  %v257_v46 = vmul.f32 %v249_v35, %v463_v32  ;;  %v250_v47 = vmul.f32 0.5, %v242_v36  ;;  %v243_v48 = vadd.f32 1.0, %v378_v37 }
 0x114   :  { %v261_v49 = vmul.f32 %v253_v41, %v465_v33  ;;  %v254_v50 = vmul.f32 0.5, %v246_v42  ;;  %v247_v51 = vadd.f32 1.0, %v380_v43 }
 0x115   :  { %v318_v52 = vpack.c.bf16 %v257_v46, %v256_v34  ;;  %v258_v53 = vmul.f32 %v250_v47, %v471_v38  ;;  %v251_v28 = vmul.f32 0.5, %v243_v48 }
 0x116   :  { %v320_v54 = vpack.c.bf16 %v261_v49, %v260_v40  ;;  %v262_v55 = vmul.f32 %v254_v50, %v473_v39  ;;  %v255_v56 = vmul.f32 0.5, %v247_v51 }
 0x117   :  { %288 = vst [vmem:[%s530_s3] sm:$0xff] %v318_v52  ;;  %v259_v29 = vmul.f32 %v251_v28, %v479_v44 }
 0x118   :  { %290 = vst [vmem:[%s530_s3 + $0x10] sm:$0xff] %v320_v54  ;;  %v263_v32 = vmul.f32 %v255_v56, %v481_v45 }
 0x119   :  { %v319_v33 = vpack.c.bf16 %v259_v29, %v258_v53 }
 0x11a   :  { %v321_v57 = vpack.c.bf16 %v263_v32, %v262_v55 }
 0x11b   :  { %289 = vst [vmem:[%s530_s3 + $0x8] sm:$0xff] %v319_v33 }
 0x11c   :  { %291 = vst [vmem:[%s530_s3 + $0x18] sm:$0xff] %v321_v57 }

// kernel: medsam_forward.31
= control target key start
LH: loop header
LB: loop body
LE: loop exit
PB: predicated region body
PF: predicated region fallthrough
CT: control target
= control target key end

     0   :  { %s477_s1 = inlined_call_operand.vmem [shape: bf16[256,128], index: 1, kind: input, shape index: {}]   ;;  %s478_s0 = inlined_call_operand.vmem [shape: bf16[32,256], index: 0, kind: input, shape index: {}]   ;;  %s479_s3 = inlined_call_operand.vmem [shape: bf16[32,128], index: 3, kind: input, shape index: {}]   ;;  %s480_s2 = inlined_call_operand.vmem [shape: f32[1,128], index: 2, kind: input, shape index: {}]   ;;  %s481_s4 = inlined_call_operand.vmem [shape: bf16[32,128], index: 4, kind: output, shape index: {}]  }
   0x1   :  { %v355_v0 = vld [vmem:[%s477_s1 + $0x40] sm:$0xff]   ;;  %v357_v2 = vld [vmem:[%s477_s1 + $0x48] sm:$0xff]   ;;  %v359_v4 = vld [vmem:[%s477_s1 + $0x50] sm:$0xff]  }
   0x2   :  { %v356_v1 = vld [vmem:[%s477_s1] sm:$0xff]   ;;  %311 = vmatprep.subr.bf16.mxu0 %v355_v0  ;;  %339 = vmatprep.subr.bf16.mxu1 %v355_v0  ;;  %v358_v3 = vld [vmem:[%s477_s1 + $0x8] sm:$0xff]   ;;  %v360_v5 = vld [vmem:[%s477_s1 + $0x10] sm:$0xff]  }
   0x3   :  { %312 = vmatpush3.bf16.msra.mxu0 %v356_v1  ;;  %347 = vmatpush3.bf16.msra.mxu1 %v356_v1  ;;  %v361_v6 = vld [vmem:[%s477_s1 + $0x58] sm:$0xff]   ;;  %v363_v8 = vld [vmem:[%s477_s1 + $0x60] sm:$0xff]   ;;  %v365_v10 = vld [vmem:[%s477_s1 + $0x68] sm:$0xff]  }
   0x4   :  { %313 = vmatprep.subr.bf16.mxu0 %v357_v2  ;;  %340 = vmatprep.subr.bf16.mxu1 %v357_v2  ;;  %v362_v7 = vld [vmem:[%s477_s1 + $0x18] sm:$0xff]   ;;  %v364_v9 = vld [vmem:[%s477_s1 + $0x20] sm:$0xff]   ;;  %v366_v13 = vld [vmem:[%s477_s1 + $0x28] sm:$0xff]  }
   0x5   :  { %v373_v11 = vld [vmem:[%s478_s0 + $0x4] ss:$8 sps:$4 sm:$0xff]   ;;  %v376_v12 = vld [vmem:[%s478_s0 + $0x14] ss:$8 sps:$4 sm:$0xff]   ;;  %v371_v18 = vld [vmem:[%s478_s0] ss:$8 sps:$4 sm:$0xff]  }
   0x6   :  { %v367_v14 = vld [vmem:[%s477_s1 + $0x70] sm:$0xff]   ;;  %209 = vmatprep.mubr.bf16.mxu0 %v373_v11  ;;  %217 = vmatprep.mubr.bf16.mxu1 %v376_v12  ;;  %v369_v16 = vld [vmem:[%s477_s1 + $0x78] sm:$0xff]   ;;  %v292_v22 = vld [vmem:[%s479_s3] sm:$0xff]  }
   0x7   :  { %314 = vmatpush3.bf16.msra.mxu0 %v358_v3  ;;  %348 = vmatpush3.bf16.msra.mxu1 %v358_v3  ;;  %v368_v15 = vld [vmem:[%s477_s1 + $0x30] sm:$0xff]   ;;  %v370_v17 = vld [vmem:[%s477_s1 + $0x38] sm:$0xff]   ;;  %v309_v23 = vld [vmem:[%s479_s3 + $0x8] sm:$0xff]   ;;  %v293_v31 = vunpack.c.l.bf16 %v292_v22  ;;  %v294_v34 = vunpack.c.h.bf16 %v292_v22 }
   0x8   :  { %315 = vmatprep.subr.bf16.mxu0 %v359_v4  ;;  %341 = vmatprep.subr.bf16.mxu1 %v359_v4  ;;  %v374_v19 = vld [vmem:[%s478_s0 + $0x10] ss:$8 sps:$4 sm:$0xff]   ;;  %v262_v24 = vld [vmem:[%s480_s2] ss:$0 sm:$0xff]  ;;  %v297_v32 = vunpack.c.l.bf16 %v309_v23  ;;  %v298_v36 = vunpack.c.h.bf16 %v309_v23 }
   0xb   :  { %316 = vmatpush3.bf16.msra.mxu0 %v360_v5  ;;  %349 = vmatpush3.bf16.msra.mxu1 %v360_v5 }
   0xc   :  { %317 = vmatprep.subr.bf16.mxu0 %v361_v6  ;;  %342 = vmatprep.subr.bf16.mxu1 %v361_v6 }
   0xf   :  { %318 = vmatpush3.bf16.msra.mxu0 %v362_v7  ;;  %350 = vmatpush3.bf16.msra.mxu1 %v362_v7 }
  0x10   :  { %319 = vmatprep.subr.bf16.mxu0 %v363_v8  ;;  %343 = vmatprep.subr.bf16.mxu1 %v363_v8 }
  0x13   :  { %320 = vmatpush3.bf16.msra.mxu0 %v364_v9  ;;  %351 = vmatpush3.bf16.msra.mxu1 %v364_v9 }
  0x14   :  { %321 = vmatprep.subr.bf16.mxu0 %v365_v10  ;;  %344 = vmatprep.subr.bf16.mxu1 %v365_v10 }
  0x17   :  { %322 = vmatpush3.bf16.msra.mxu0 %v366_v13  ;;  %352 = vmatpush3.bf16.msra.mxu1 %v366_v13 }
  0x18   :  { %323 = vmatprep.subr.bf16.mxu0 %v367_v14  ;;  %345 = vmatprep.subr.bf16.mxu1 %v367_v14 }
  0x1b   :  { %324 = vmatpush3.bf16.msra.mxu0 %v368_v15  ;;  %353 = vmatpush3.bf16.msra.mxu1 %v368_v15 }
  0x1c   :  { %325 = vmatprep.subr.bf16.mxu0 %v369_v16  ;;  %346 = vmatprep.subr.bf16.mxu1 %v369_v16 }
  0x1f   :  { %326 = vmatpush3.bf16.msra.mxu0 %v370_v17  ;;  %354 = vmatpush3.bf16.msra.mxu1 %v370_v17 }
  0x22   :  { %210 = vmatmul.mubr.bf16.vlgmr.msra.gmra.mrb[0].mxu0 %v371_v18  ;;  %218 = vmatmul.mubr.bf16.vlgmr.msra.gmra.mrb[0].mxu1 %v374_v19 }
  0xf5   :  { %v327_v20 = vpop.f32.mrb[0].mxu0  ;;  %v333_v21 = vpop.f32.mrb[0].mxu1 }
  0xf6   :  { %v328_v25 = vpop.f32.mrb[1].mxu0  ;;  %v334_v26 = vpop.f32.mrb[1].mxu1 }
  0xf7   :  { %v329_v27 = vadd.f32 %v328_v25, %v327_v20  ;;  %v335_v28 = vadd.f32 %v334_v26, %v333_v21  ;;  %v330_v29 = vpop.f32.mrb[2].mxu0  ;;  %v336_v30 = vpop.f32.mrb[2].mxu1 }
  0xf8   :  { %v331_v33 = vpop.f32.mrb[3].mxu0  ;;  %v337_v35 = vpop.f32.mrb[3].mxu1 }
  0xf9   :  { %v212_v37 = vadd.f32 %v329_v27, %v262_v24  ;;  %v220_v38 = vadd.f32 %v335_v28, %v262_v24  ;;  %v332_v39 = vadd.f32 %v331_v33, %v330_v29  ;;  %v338_v40 = vadd.f32 %v337_v35, %v336_v30 }
  0xfb   :  { %v215_v41 = vadd.f32 %v332_v39, %v262_v24  ;;  %v223_v42 = vadd.f32 %v338_v40, %v262_v24  ;;  %v234_v43 = vadd.f32 %v293_v31, %v212_v37  ;;  %v236_v44 = vadd.f32 %v297_v32, %v220_v38 }
  0xfd   :  { %v235_v45 = vadd.f32 %v294_v34, %v215_v41  ;;  %v237_v46 = vadd.f32 %v298_v36, %v223_v42 }
  0xff   :  { %v302_v47 = vpack.c.bf16 %v235_v45, %v234_v43  ;;  %v307_v48 = vpack.c.bf16 %v237_v46, %v236_v44 }
 0x101   :  { %303 = vst [vmem:[%s481_s4] sm:$0xff] %v302_v47   ;;  %310 = vst [vmem:[%s481_s4 + $0x8] sm:$0xff] %v307_v48  }

// kernel: medsam_forward.32
= control target key start
LH: loop header
LB: loop body
LE: loop exit
PB: predicated region body
PF: predicated region fallthrough
CT: control target
= control target key end

     0   :  { %s304_s1 = inlined_call_operand.vmem [shape: bf16[128,128], index: 1, kind: input, shape index: {}]   ;;  %s305_s0 = inlined_call_operand.vmem [shape: bf16[32,128], index: 0, kind: input, shape index: {}]   ;;  %s306_s2 = inlined_call_operand.vmem [shape: f32[1,128], index: 2, kind: input, shape index: {}]   ;;  %s307_s3 = inlined_call_operand.vmem [shape: bf16[32,128], index: 3, kind: output, shape index: {}]  }
   0x1   :  { %v235_v0 = vld [vmem:[%s304_s1] sm:$0xff]   ;;  %v236_v1 = vld [vmem:[%s304_s1 + $0x8] sm:$0xff]   ;;  %v237_v2 = vld [vmem:[%s304_s1 + $0x10] sm:$0xff]  }
   0x2   :  { %215 = vmatprep.subr.bf16.mxu0 %v235_v0  ;;  %v238_v3 = vld [vmem:[%s304_s1 + $0x18] sm:$0xff]   ;;  %v243_v4 = vld [vmem:[%s305_s0] sm:$0xff]   ;;  %v240_v6 = vld [vmem:[%s304_s1 + $0x28] sm:$0xff]  }
   0x3   :  { %216 = vmatpush3.bf16.msra.mxu0 %v235_v0  ;;  %231 = vmatprep.mubr.bf16.mxu0 %v243_v4  ;;  %v239_v5 = vld [vmem:[%s304_s1 + $0x20] sm:$0xff]   ;;  %v241_v7 = vld [vmem:[%s304_s1 + $0x30] sm:$0xff]   ;;  %v242_v8 = vld [vmem:[%s304_s1 + $0x38] sm:$0xff]  }
   0x4   :  { %217 = vmatprep.subr.bf16.mxu0 %v236_v1  ;;  %v244_v9 = vld [vmem:[%s305_s0 + $0x8] sm:$0xff]   ;;  %v175_v11 = vld [vmem:[%s306_s2] ss:$0 sm:$0xff] }
   0x7   :  { %218 = vmatpush3.bf16.msra.mxu0 %v236_v1 }
   0x8   :  { %219 = vmatprep.subr.bf16.mxu0 %v237_v2 }
   0xb   :  { %220 = vmatpush3.bf16.msra.mxu0 %v237_v2 }
   0xc   :  { %221 = vmatprep.subr.bf16.mxu0 %v238_v3 }
   0xf   :  { %222 = vmatpush3.bf16.msra.mxu0 %v238_v3 }
  0x10   :  { %223 = vmatprep.subr.bf16.mxu0 %v239_v5 }
  0x13   :  { %224 = vmatpush3.bf16.msra.mxu0 %v239_v5 }
  0x14   :  { %225 = vmatprep.subr.bf16.mxu0 %v240_v6 }
  0x17   :  { %226 = vmatpush3.bf16.msra.mxu0 %v240_v6 }
  0x18   :  { %227 = vmatprep.subr.bf16.mxu0 %v241_v7 }
  0x1b   :  { %228 = vmatpush3.bf16.msra.mxu0 %v241_v7 }
  0x1c   :  { %229 = vmatprep.subr.bf16.mxu0 %v242_v8 }
  0x1f   :  { %230 = vmatpush3.bf16.msra.mxu0 %v242_v8 }
  0x22   :  { %232 = vmatmul.mubr.bf16.vlgmr.msra.gmra.mrb[0].mxu0 %v244_v9 }
  0xf5   :  { %v233_v10 = vpop.f32.mrb[0].mxu0 }
  0xf6   :  { %v136_v12 = vpop.f32.mrb[1].mxu0  ;;  %v145_v14 = vadd.f32 %v233_v10, %v175_v11 }
  0xf7   :  { %v234_v13 = vpop.f32.mrb[2].mxu0  ;;  %v137_v17 = vadd.f32 %v175_v11, %v136_v12 }
  0xf8   :  { %v148_v15 = vadd.f32 %v234_v13, %v175_v11  ;;  %v139_v16 = vpop.f32.mrb[3].mxu0 }
  0xf9   :  { %v140_v18 = vadd.f32 %v175_v11, %v139_v16 }
  0xfa   :  { %v202_v19 = vpack.c.bf16 %v148_v15, %v145_v14 }
  0xfb   :  { %v197_v20 = vpack.c.bf16 %v140_v18, %v137_v17 }
  0xfc   :  { %204 = vst [vmem:[%s307_s3 + $0x8] sm:$0xff] %v202_v19  }
  0xfd   :  { %198 = vst [vmem:[%s307_s3] sm:$0xff] %v197_v20  }

// kernel: medsam_forward.33
= control target key start
LH: loop header
LB: loop body
LE: loop exit
PB: predicated region body
PF: predicated region fallthrough
CT: control target
= control target key end

     0   :  { %s336_s1 = inlined_call_operand.vmem [shape: bf16[128,128], index: 1, kind: input, shape index: {}]   ;;  %s337_s0 = inlined_call_operand.vmem [shape: bf16[32,128], index: 0, kind: input, shape index: {}]   ;;  %s338_s3 = inlined_call_operand.vmem [shape: bf16[32,128], index: 3, kind: input, shape index: {}]   ;;  %s339_s2 = inlined_call_operand.vmem [shape: f32[1,128], index: 2, kind: input, shape index: {}]   ;;  %s340_s4 = inlined_call_operand.vmem [shape: bf16[32,128], index: 4, kind: output, shape index: {}]  }
   0x1   :  { %v246_v0 = vld [vmem:[%s336_s1] sm:$0xff]   ;;  %v247_v1 = vld [vmem:[%s336_s1 + $0x8] sm:$0xff]   ;;  %v248_v2 = vld [vmem:[%s336_s1 + $0x10] sm:$0xff]  }
   0x2   :  { %226 = vmatprep.subr.bf16.mxu0 %v246_v0  ;;  %v249_v3 = vld [vmem:[%s336_s1 + $0x18] sm:$0xff]   ;;  %v18_v4 = vld [vmem:[%s337_s0] sm:$0xf]  ;;  %v19_v5 = vld [vmem:[%s337_s0 + $0x4] sm:$0xf] }
   0x3   :  { %227 = vmatpush3.bf16.msra.mxu0 %v246_v0  ;;  %v22_v6 = vld [vmem:[%s338_s3] sm:$0xf]  ;;  %v23_v7 = vld [vmem:[%s338_s3 + $0x4] sm:$0xf]  ;;  %v251_v12 = vld [vmem:[%s336_s1 + $0x28] sm:$0xff]  }
   0x4   :  { %228 = vmatprep.subr.bf16.mxu0 %v247_v1  ;;  %v26_v8 = vadd.bf16 %v22_v6, %v18_v4  ;;  %v27_v9 = vadd.bf16 %v23_v7, %v19_v5  ;;  %v250_v10 = vld [vmem:[%s336_s1 + $0x20] sm:$0xff]   ;;  %v252_v13 = vld [vmem:[%s336_s1 + $0x30] sm:$0xff]   ;;  %v20_v14 = vld [vmem:[%s337_s0 + $0x8] sm:$0xf] }
   0x5   :  { %v21_v15 = vld [vmem:[%s337_s0 + $0xc] sm:$0xf]  ;;  %v24_v16 = vld [vmem:[%s338_s3 + $0x8] sm:$0xf]  ;;  %v253_v18 = vld [vmem:[%s336_s1 + $0x38] sm:$0xff]  }
   0x6   :  { %v187_v11 = vcombine.low %v26_v8, %v27_v9  ;;  %v25_v17 = vld [vmem:[%s338_s3 + $0xc] sm:$0xf]  ;;  %v28_v19 = vadd.bf16 %v24_v16, %v20_v14  ;;  %v186_v23 = vld [vmem:[%s339_s2] ss:$0 sm:$0xff] }
   0x7   :  { %229 = vmatpush3.bf16.msra.mxu0 %v247_v1  ;;  %v29_v20 = vadd.bf16 %v25_v17, %v21_v15 }
   0x8   :  { %230 = vmatprep.subr.bf16.mxu0 %v248_v2  ;;  %242 = vmatprep.mubr.bf16.mxu0 %v187_v11 }
   0x9   :  { %v188_v21 = vcombine.low %v28_v19, %v29_v20 }
   0xb   :  { %231 = vmatpush3.bf16.msra.mxu0 %v248_v2 }
   0xc   :  { %232 = vmatprep.subr.bf16.mxu0 %v249_v3 }
   0xf   :  { %233 = vmatpush3.bf16.msra.mxu0 %v249_v3 }
  0x10   :  { %234 = vmatprep.subr.bf16.mxu0 %v250_v10 }
  0x13   :  { %235 = vmatpush3.bf16.msra.mxu0 %v250_v10 }
  0x14   :  { %236 = vmatprep.subr.bf16.mxu0 %v251_v12 }
  0x17   :  { %237 = vmatpush3.bf16.msra.mxu0 %v251_v12 }
  0x18   :  { %238 = vmatprep.subr.bf16.mxu0 %v252_v13 }
  0x1b   :  { %239 = vmatpush3.bf16.msra.mxu0 %v252_v13 }
  0x1c   :  { %240 = vmatprep.subr.bf16.mxu0 %v253_v18 }
  0x1f   :  { %241 = vmatpush3.bf16.msra.mxu0 %v253_v18 }
  0x22   :  { %243 = vmatmul.mubr.bf16.vlgmr.msra.gmra.mrb[0].mxu0 %v188_v21 }
  0xf5   :  { %v244_v22 = vpop.f32.mrb[0].mxu0 }
  0xf6   :  { %v147_v24 = vpop.f32.mrb[1].mxu0  ;;  %v156_v26 = vadd.f32 %v244_v22, %v186_v23 }
  0xf7   :  { %v245_v25 = vpop.f32.mrb[2].mxu0  ;;  %v148_v29 = vadd.f32 %v186_v23, %v147_v24 }
  0xf8   :  { %v159_v27 = vadd.f32 %v245_v25, %v186_v23  ;;  %v150_v28 = vpop.f32.mrb[3].mxu0 }
  0xf9   :  { %v151_v30 = vadd.f32 %v186_v23, %v150_v28 }
  0xfa   :  { %v213_v31 = vpack.c.bf16 %v159_v27, %v156_v26 }
  0xfb   :  { %v208_v32 = vpack.c.bf16 %v151_v30, %v148_v29 }
  0xfc   :  { %215 = vst [vmem:[%s340_s4 + $0x8] sm:$0xff] %v213_v31  }
  0xfd   :  { %209 = vst [vmem:[%s340_s4] sm:$0xff] %v208_v32  }

// kernel: medsam_forward.37
= control target key start
LH: loop header
LB: loop body
LE: loop exit
PB: predicated region body
PF: predicated region fallthrough
CT: control target
= control target key end

     0   :  { %s785_s12 = smov 0   ;;  %s787_s13 = smov 0   ;;  %s843_s0 = inlined_call_operand.vmem [shape: bf16[2,16,128], index: 0, kind: input, shape index: {}]   ;;  %s844_s1 = inlined_call_operand.vmem [shape: bf16[2,16,128], index: 1, kind: input, shape index: {}]   ;;  %s845_s2 = inlined_call_operand.vmem [shape: bf16[2,16,128], index: 2, kind: input, shape index: {}]   ;;  %s846_s3 = inlined_call_operand.vmem [shape: bf16[2,16,128], index: 3, kind: output, shape index: {}]  }
   0x1   :  { %s789_s14 = smov 0  }
   0x2 LB: > { %s32_s15 = sadd.s32 1, %s755_s13  ;;  %p648_p0 = scmp.ge.s32.totalorder %s759_s14, 1  ;;  %s759_s14 = sphi %s789_s14, %s13_s14   ;;  %s755_s13 = sphi %s787_s13, %s848_s13   ;;  %s751_s12 = sphi %s785_s12, %s847_s12  }
   0x3   : > { %p34_p1 = scmp.ge.s32.totalorder %s32_s15, 2  ;;  %p199_p2 = scmp.lt.s32.totalorder %s759_s14, 3 }
   0x5   : > { %s850_s15 = smov (%p34_p1, %s32_s15), 0  ;;  %p200_p3 = pnand %p648_p0, %p199_p2 }
   0x6   : > { %p250_p4 = scmp.lt.s32.totalorder (!%p200_p3), %s751_s12, 1  ;;  %v761_v0 = vmov (!%p200_p3), 0.0   ;;  %vm762_vm0 = vmmov (!%p200_p3), 0   ;;  %vm294_vm1 = vcmask (!%p200_p3), 7168   ;;  %v763_v3 = vmov (!%p200_p3), -1e+30  }
   0x7   : > { %203 = sbr.rel (%p200_p3) target bundleno = 827 (0x33b), region = 32  ;;  %680 = vmatprep.subr.bf16.mxu0 (!%p200_p3), %v761_v0  ;;  %682 = vmatprep.mubr.msk.bf16.mxu0 (!%p200_p3), %vm762_vm0, %v761_v0  ;;  %295 = vst.msk [vmem:[#allocation2] sm:$0xff] (!%p200_p3), %vm294_vm1, %v763_v3  ;;  %296 = vst.msk [vmem:[#allocation2 + $0x8] sm:$0xff] (!%p200_p3), %vm294_vm1, %v763_v3  ;;  %v359_v4 = vlaneseq (!%p200_p3)  ;;  %vm368_vm3 = vcmask (!%p200_p3), 130048   ;;  %v764_v14 = vmov (!%p200_p3), 0  }
   0x8   : > { %686 = vmatprep.subr.bf16.mxu1 (!%p200_p3), %v761_v0  ;;  %688 = vmatprep.mubr.msk.bf16.mxu1 (!%p200_p3), %vm762_vm0, %v761_v0  ;;  %297 = vst.msk [vmem:[#allocation3] sm:$0xff] (!%p200_p3), %vm294_vm1, %v761_v0  ;;  %298 = vst.msk [vmem:[#allocation3 + $0x8] sm:$0xff] (!%p200_p3), %vm294_vm1, %v761_v0 }
   0x9   : > { %v360_v5 = vand.u32 (!%p200_p3), 127, %v359_v4  ;;  %720 = vset.pattern.permute.xlu1 (!%p200_p3), %v764_v14  ;;  %721 = vset.pattern.permute.xlu0 (!%p200_p3), %v764_v14 }
   0xb   : > { %vm363_vm2 = vcmp.lt.s32.totalorder (!%p200_p3), %v360_v5, 7 }
   0xe   : > { %s852_s12 = smov (!%p250_p4, %s751_s12), 1  ;;  %v366_v15 = vld [vmem:[#allocation2] sm:$0xff]  ;;  %v367_v18 = vld [vmem:[#allocation2 + $0x8] sm:$0xff] }
   0xf   : > { %s803_s16 = sshll.u32 %s852_s12, 3  ;;  %v399_v39 = vld [vmem:[#allocation3] sm:$0xff]  ;;  %v400_v42 = vld [vmem:[#allocation3 + $0x8] sm:$0xff] }
  0x10   : > { %s267_s19 = scalar_lea.vmem %s844_s1, %s803_s16  ;;  %s257_s22 = scalar_lea.vmem %s843_s0, %s803_s16 }
  0x11   : > { %v722_v1 = vld [vmem:[%s267_s19] sm:$0xff]   ;;  %s277_s25 = scalar_lea.vmem %s845_s2, %s803_s16  ;;  %s287_s28 = scalar_lea.vmem %s846_s3, %s803_s16 }
  0x12   : > { %681 = vmatpush3.bf16.xpose.msra.mxu0 %v722_v1  ;;  %v723_v2 = vld [vmem:[%s257_s22] sm:$0xff]  }
  0x13   : > { %v724_v23 = vld [vmem:[%s277_s25] sm:$0xff]  }
  0x14   : > { %687 = vmatpush3.bf16.msra.mxu1 %v724_v23 }
  0x19   : > { %683 = vmatmul.mubr.bf16.vlgmr.msra.gmra.mrb[0].mxu0 %v723_v2 }
  0xec   : > { %v351_v6 = vpop.f32.mrb[0].mxu0 }
  0xed   : > { %v364_v7 = vsel %vm363_vm2, %v351_v6, -1e+30  ;;  %v684_v8 = vpop.f32.mrb[1].mxu0 }
  0xee   : > { %v354_v9 = vpop.f32.mrb[2].mxu0  ;;  %v369_v10 = vsel %vm368_vm3, %v364_v7, -inf }
  0xef   : > { %v365_v11 = vsel %vm363_vm2, %v354_v9, -1e+30  ;;  %370 = vmax.xlane.f32.xlu0 %v369_v10  ;;  %v685_v12 = vpop.f32.mrb[3].mxu0 }
  0xf0   : > { %v372_v13 = vsel %vm368_vm3, %v365_v11, -inf }
  0xf3   : > { %373 = vmax.xlane.f32.xlu0 %v372_v13 }
 0x17c   : > { %v371_v16 = vpop.xlane.xlu0 %370 }
 0x17d   : > { %v375_v17 = vmax.f32 %v366_v15, %v371_v16 }
 0x17f   : > { %v377_v19 = vsub.f32 %v366_v15, %v375_v17  ;;  %485 = vst.msk [vmem:[#allocation2] sm:$0xff] %vm294_vm1, %v375_v17  ;;  %385 = vperm.xlu1 %720, %v375_v17  }
 0x180   : > { %v374_v20 = vpop.xlane.xlu0 %373 }
 0x181   : > { %v376_v21 = vmax.f32 %v367_v18, %v374_v20  ;;  %v379_v36 = vmul.f32 1.442695, %v377_v19 }
 0x183   : > { %v378_v22 = vsub.f32 %v367_v18, %v376_v21  ;;  %486 = vst.msk [vmem:[#allocation2 + $0x8] sm:$0xff] %vm294_vm1, %v376_v21  ;;  %390 = vperm.xlu1 %720, %v376_v21  }
 0x185   : > { %v381_v35 = vmul.f32 1.442695, %v378_v22 }
 0x1fe   : > { %v386_v24 = vpop.permute.xlu1 %385 }
 0x1ff   : > { %v393_v25 = vsub.f32 %v364_v7, %v386_v24 }
 0x201   : > { %v395_v26 = vmul.f32 1.442695, %v393_v25 }
 0x202   : > { %v391_v27 = vpop.permute.xlu1 %390 }
 0x203   : > { %725 = vpow2.f32 %v395_v26  ;;  %v394_v28 = vsub.f32 %v365_v11, %v391_v27 }
 0x205   : > { %v397_v29 = vmul.f32 1.442695, %v394_v28 }
 0x207   : > { %727 = vpow2.f32 %v397_v29 }
 0x208   : > { %729 = vpow2.f32 %v381_v35 }
 0x209   : > { %731 = vpow2.f32 %v379_v36 }
 0x20d   : > { %v726_v30 = vpop.eup %725 }
 0x20e   : > { %v403_v31 = vsel %vm368_vm3, %v726_v30, 0.0 }
 0x20f   : > { %404 = vadd.xlane.f32.xlu0 %v403_v31 }
 0x211   : > { %v728_v32 = vpop.eup %727 }
 0x212   : > { %v406_v33 = vsel %vm368_vm3, %v728_v32, 0.0  ;;  %v428_v34 = vpack.c.bf16 %v728_v32, %v726_v30  ;;  %v730_v37 = vpop.eup %729 }
 0x213   : > { %407 = vadd.xlane.f32.xlu1 %v406_v33  ;;  %v732_v38 = vpop.eup %731  ;;  %v402_v44 = vmul.f32 %v730_v37, %v400_v42 }
 0x214   : > { %689 = vmatmul.mubr.msk.bf16.vlgmr.msra.gmra.mrb[0].mxu1 %vm368_vm3, %v428_v34  ;;  %v401_v40 = vmul.f32 %v732_v38, %v399_v39 }
 0x224   : > { %423 = vperm.xlu1 %720, %v730_v37  }
 0x225   : > { %418 = vperm.xlu0 %721, %v732_v38  }
 0x29c   : > { %v405_v41 = vpop.xlane.xlu0 %404 }
 0x29d   : > { %v409_v43 = vadd.f32 %v405_v41, %v401_v40 }
 0x29f   : > { %412 = vst.msk [vmem:[#allocation3] sm:$0xff] %vm294_vm1, %v409_v43 }
 0x2a0   : > { %v408_v45 = vpop.xlane.xlu1 %407 }
 0x2a1   : > { %v410_v46 = vadd.f32 %v408_v45, %v402_v44 }
 0x2a3   : > { %413 = vst.msk [vmem:[#allocation3 + $0x8] sm:$0xff] %vm294_vm1, %v410_v46 }
 0x2a4   : > { %v419_v55 = vpop.permute.xlu0 %418  ;;  %v424_v56 = vpop.permute.xlu1 %423 }
 0x2a5   : > { %v427_v58 = vmul.f32 0.0, %v424_v56  ;;  %v426_v59 = vmul.f32 0.0, %v419_v55 }
 0x2a6   : > { %v492_v47 = vld [vmem:[#allocation3] sm:$0xff] }
 0x2a7   : > { %733 = vrcp.f32 %v492_v47 }
 0x2aa   : > { %v493_v48 = vld [vmem:[#allocation3 + $0x8] sm:$0xff] }
 0x2ab   : > { %735 = vrcp.f32 %v493_v48 }
 0x2b1   : > { %v734_v49 = vpop.eup %733 }
 0x2b2   : > { %498 = vperm.xlu0 %721, %v734_v49  }
 0x2b5   : > { %v736_v50 = vpop.eup %735 }
 0x2b6   : > { %503 = vperm.xlu0 %721, %v736_v50  }
 0x2e7   : > { %v474_v51 = vpop.f32.mrb[0].mxu1 }
 0x2e8   : > { %v690_v52 = vpop.f32.mrb[1].mxu1  ;;  %v481_v60 = vadd.f32 %v474_v51, %v426_v59 }
 0x2e9   : > { %v477_v53 = vpop.f32.mrb[2].mxu1 }
 0x2ea   : > { %v691_v54 = vpop.f32.mrb[3].mxu1  ;;  %v482_v61 = vadd.f32 %v477_v53, %v427_v58 }
 0x331   : > { %v499_v57 = vpop.permute.xlu0 %498 }
 0x332   : > { %v506_v63 = vmul.f32 %v499_v57, %v481_v60 }
 0x335   : > { %v504_v62 = vpop.permute.xlu0 %503 }
 0x336   : > { %v507_v0 = vmul.f32 %v504_v62, %v482_v61 }
 0x338   : > { %v674_v1 = vpack.c.bf16 %v507_v0, %v506_v63 }
 0x33a   : > { %675 = vst [vmem:[%s287_s28] sm:$0xff] %v674_v1  }
 0x33b PF: > { %s13_s14 = sadd.s32 1, %s759_s14   ;;  %s847_s12 = smov %s755_s13 }
 0x33c   : > { %p10_p5 = scmp.ge.s32.totalorder %s13_s14, 4   ;;  %s848_s13 = smov %s850_s15 }
 0x33e   :  { %12 = sbr.rel (!%p10_p5) target bundleno = 2 (0x2), region = 76 }

// kernel: medsam_forward.44
= control target key start
LH: loop header
LB: loop body
LE: loop exit
PB: predicated region body
PF: predicated region fallthrough
CT: control target
= control target key end

     0   :  { %vm46_vm0 = vcmask 261120   ;;  %vm510_vm1 = vcmask 257024   ;;  %s1112_s0 = inlined_call_operand.vmem [shape: bf16[128,32], index: 0, kind: input, shape index: {}]   ;;  %s1113_s1 = inlined_call_operand.vmem [shape: f32[1,32], index: 1, kind: input, shape index: {}]   ;;  %s1114_s2 = inlined_call_operand.vmem [shape: f32[1,32], index: 2, kind: input, shape index: {}]   ;;  %s1115_s3 = inlined_call_operand.vmem [shape: bf16[128,32], index: 3, kind: output, shape index: {}]  }
   0x1   :  { %v691_v0 = vld [vmem:[%s1112_s0] sm:$0xff]   ;;  %v696_v1 = vld [vmem:[%s1112_s0 + $0x8] sm:$0xff]   ;;  %v705_v6 = vld [vmem:[%s1112_s0 + $0x10] sm:$0xff]  }
   0x2   :  { %v567_v2 = vunpack.c.l.bf16 %v691_v0  ;;  %v571_v3 = vunpack.c.l.bf16 %v696_v1  ;;  %v568_v4 = vunpack.c.h.bf16 %v691_v0  ;;  %v572_v5 = vunpack.c.h.bf16 %v696_v1  ;;  %v720_v13 = vld [vmem:[%s1112_s0 + $0x18] sm:$0xff]   ;;  %v733_v18 = vld [vmem:[%s1112_s0 + $0x20] sm:$0xff]   ;;  %v746_v23 = vld [vmem:[%s1112_s0 + $0x28] sm:$0xff]  }
   0x3   :  { %v575_v11 = vunpack.c.l.bf16 %v705_v6  ;;  %v576_v12 = vunpack.c.h.bf16 %v705_v6  ;;  %v579_v16 = vunpack.c.l.bf16 %v720_v13  ;;  %v580_v17 = vunpack.c.h.bf16 %v720_v13  ;;  %v759_v28 = vld [vmem:[%s1112_s0 + $0x30] sm:$0xff]   ;;  %v772_v33 = vld [vmem:[%s1112_s0 + $0x38] sm:$0xff]  }
   0x4   :  { %v47_v7 = vsel %vm46_vm0, %v567_v2, 0.0  ;;  %v53_v8 = vsel %vm46_vm0, %v571_v3, 0.0  ;;  %v50_v9 = vsel %vm46_vm0, %v568_v4, 0.0  ;;  %v56_v10 = vsel %vm46_vm0, %v572_v5, 0.0 }
   0x5   :  { %48 = vadd.xlane.f32.xlu0 %v47_v7  ;;  %54 = vadd.xlane.f32.xlu1 %v53_v8  ;;  %v59_v14 = vsel %vm46_vm0, %v575_v11, 0.0  ;;  %v62_v15 = vsel %vm46_vm0, %v576_v12, 0.0  ;;  %v65_v19 = vsel %vm46_vm0, %v579_v16, 0.0  ;;  %v68_v20 = vsel %vm46_vm0, %v580_v17, 0.0 }
   0x6   :  { %v583_v21 = vunpack.c.l.bf16 %v733_v18  ;;  %v584_v22 = vunpack.c.h.bf16 %v733_v18  ;;  %v587_v26 = vunpack.c.l.bf16 %v746_v23  ;;  %v588_v27 = vunpack.c.h.bf16 %v746_v23 }
   0x7   :  { %v591_v31 = vunpack.c.l.bf16 %v759_v28  ;;  %v592_v32 = vunpack.c.h.bf16 %v759_v28  ;;  %v595_v36 = vunpack.c.l.bf16 %v772_v33  ;;  %v596_v37 = vunpack.c.h.bf16 %v772_v33 }
   0x8   :  { %v71_v24 = vsel %vm46_vm0, %v583_v21, 0.0  ;;  %v74_v25 = vsel %vm46_vm0, %v584_v22, 0.0  ;;  %v77_v29 = vsel %vm46_vm0, %v587_v26, 0.0  ;;  %v80_v30 = vsel %vm46_vm0, %v588_v27, 0.0 }
   0x9   :  { %51 = vadd.xlane.f32.xlu0 %v50_v9  ;;  %57 = vadd.xlane.f32.xlu1 %v56_v10  ;;  %v83_v34 = vsel %vm46_vm0, %v591_v31, 0.0  ;;  %v86_v35 = vsel %vm46_vm0, %v592_v32, 0.0  ;;  %v89_v38 = vsel %vm46_vm0, %v595_v36, 0.0  ;;  %v92_v39 = vsel %vm46_vm0, %v596_v37, 0.0 }
   0xd   :  { %60 = vadd.xlane.f32.xlu0 %v59_v14  ;;  %63 = vadd.xlane.f32.xlu1 %v62_v15 }
  0x11   :  { %66 = vadd.xlane.f32.xlu0 %v65_v19  ;;  %69 = vadd.xlane.f32.xlu1 %v68_v20 }
  0x15   :  { %72 = vadd.xlane.f32.xlu0 %v71_v24  ;;  %75 = vadd.xlane.f32.xlu1 %v74_v25 }
  0x19   :  { %78 = vadd.xlane.f32.xlu0 %v77_v29  ;;  %81 = vadd.xlane.f32.xlu1 %v80_v30 }
  0x1d   :  { %84 = vadd.xlane.f32.xlu0 %v83_v34  ;;  %87 = vadd.xlane.f32.xlu1 %v86_v35 }
  0x21   :  { %90 = vadd.xlane.f32.xlu0 %v89_v38  ;;  %93 = vadd.xlane.f32.xlu1 %v92_v39 }
  0x92   :  { %v49_v40 = vpop.xlane.xlu0 %48  ;;  %v55_v41 = vpop.xlane.xlu1 %54 }
  0x93   :  { %v96_v42 = vmul.f32 0.03125, %v49_v40  ;;  %v98_v43 = vmul.f32 0.03125, %v55_v41 }
  0x95   :  { %v788_v44 = vsub.f32 %v567_v2, %v96_v42  ;;  %v790_v45 = vsub.f32 %v571_v3, %v98_v43 }
  0x96   :  { %v52_v46 = vpop.xlane.xlu0 %51  ;;  %v58_v47 = vpop.xlane.xlu1 %57 }
  0x97   :  { %v97_v48 = vmul.f32 0.03125, %v52_v46  ;;  %v99_v49 = vmul.f32 0.03125, %v58_v47  ;;  %v128_v50 = vmul.f32 %v788_v44, %v788_v44  ;;  %v130_v51 = vmul.f32 %v790_v45, %v790_v45 }
  0x99   :  { %v798_v52 = vsub.f32 %v568_v4, %v97_v48  ;;  %v802_v53 = vsub.f32 %v572_v5, %v99_v49  ;;  %v144_v54 = vsel %vm46_vm0, %v128_v50, 0.0  ;;  %v150_v57 = vsel %vm46_vm0, %v130_v51, 0.0 }
  0x9a   :  { %145 = vadd.xlane.f32.xlu0 %v144_v54  ;;  %v61_v55 = vpop.xlane.xlu0 %60  ;;  %v64_v56 = vpop.xlane.xlu1 %63 }
  0x9b   :  { %v100_v58 = vmul.f32 0.03125, %v61_v55  ;;  %v101_v59 = vmul.f32 0.03125, %v64_v56  ;;  %v129_v60 = vmul.f32 %v798_v52, %v798_v52  ;;  %v131_v61 = vmul.f32 %v802_v53, %v802_v53 }
  0x9d   :  { %v812_v62 = vsub.f32 %v575_v11, %v100_v58  ;;  %v816_v63 = vsub.f32 %v576_v12, %v101_v59  ;;  %v147_v0 = vsel %vm46_vm0, %v129_v60, 0.0  ;;  %v153_v3 = vsel %vm46_vm0, %v131_v61, 0.0 }
  0x9e   :  { %151 = vadd.xlane.f32.xlu0 %v150_v57  ;;  %148 = vadd.xlane.f32.xlu1 %v147_v0  ;;  %v67_v1 = vpop.xlane.xlu0 %66  ;;  %v70_v2 = vpop.xlane.xlu1 %69 }
  0x9f   :  { %v102_v4 = vmul.f32 0.03125, %v67_v1  ;;  %v103_v5 = vmul.f32 0.03125, %v70_v2  ;;  %v132_v7 = vmul.f32 %v812_v62, %v812_v62  ;;  %v133_v8 = vmul.f32 %v816_v63, %v816_v63 }
  0xa1   :  { %v826_v6 = vsub.f32 %v579_v16, %v102_v4  ;;  %v830_v9 = vsub.f32 %v580_v17, %v103_v5  ;;  %v156_v10 = vsel %vm46_vm0, %v132_v7, 0.0  ;;  %v159_v14 = vsel %vm46_vm0, %v133_v8, 0.0 }
  0xa2   :  { %154 = vadd.xlane.f32.xlu1 %v153_v3  ;;  %157 = vadd.xlane.f32.xlu0 %v156_v10  ;;  %v73_v11 = vpop.xlane.xlu0 %72  ;;  %v76_v12 = vpop.xlane.xlu1 %75 }
  0xa3   :  { %v104_v15 = vmul.f32 0.03125, %v73_v11  ;;  %v105_v19 = vmul.f32 0.03125, %v76_v12  ;;  %v134_v20 = vmul.f32 %v826_v6, %v826_v6  ;;  %v135_v16 = vmul.f32 %v830_v9, %v830_v9 }
  0xa5   :  { %v840_v13 = vsub.f32 %v583_v21, %v104_v15  ;;  %v844_v17 = vsub.f32 %v584_v22, %v105_v19  ;;  %v162_v24 = vsel %vm46_vm0, %v134_v20, 0.0  ;;  %v165_v30 = vsel %vm46_vm0, %v135_v16, 0.0 }
  0xa6   :  { %160 = vadd.xlane.f32.xlu1 %v159_v14  ;;  %163 = vadd.xlane.f32.xlu0 %v162_v24  ;;  %v79_v25 = vpop.xlane.xlu0 %78  ;;  %v82_v29 = vpop.xlane.xlu1 %81 }
  0xa7   :  { %v106_v34 = vmul.f32 0.03125, %v79_v25  ;;  %v107_v35 = vmul.f32 0.03125, %v82_v29  ;;  %v136_v38 = vmul.f32 %v840_v13, %v840_v13  ;;  %v137_v21 = vmul.f32 %v844_v17, %v844_v17  ;;  %v899_v29 = vld [vmem:[%s1113_s1] ss:$0 sm:$0xff] }
  0xa9   :  { %v854_v18 = vsub.f32 %v587_v26, %v106_v34  ;;  %v858_v22 = vsub.f32 %v588_v27, %v107_v35  ;;  %v168_v39 = vsel %vm46_vm0, %v136_v38, 0.0  ;;  %v171_v42 = vsel %vm46_vm0, %v137_v21, 0.0 }
  0xaa   :  { %166 = vadd.xlane.f32.xlu1 %v165_v30  ;;  %169 = vadd.xlane.f32.xlu0 %v168_v39  ;;  %v85_v40 = vpop.xlane.xlu0 %84  ;;  %v88_v41 = vpop.xlane.xlu1 %87  ;;  %v905_v39 = vld [vmem:[%s1114_s2] ss:$0 sm:$0xff] }
  0xab   :  { %v108_v43 = vmul.f32 0.03125, %v85_v40  ;;  %v109_v46 = vmul.f32 0.03125, %v88_v41  ;;  %v138_v47 = vmul.f32 %v854_v18, %v854_v18  ;;  %v139_v26 = vmul.f32 %v858_v22, %v858_v22 }
  0xad   :  { %v868_v23 = vsub.f32 %v591_v31, %v108_v43  ;;  %v872_v27 = vsub.f32 %v592_v32, %v109_v46  ;;  %v174_v48 = vsel %vm46_vm0, %v138_v47, 0.0  ;;  %v177_v51 = vsel %vm46_vm0, %v139_v26, 0.0 }
  0xae   :  { %172 = vadd.xlane.f32.xlu1 %v171_v42  ;;  %175 = vadd.xlane.f32.xlu0 %v174_v48  ;;  %v91_v49 = vpop.xlane.xlu0 %90  ;;  %v94_v50 = vpop.xlane.xlu1 %93 }
  0xaf   :  { %v110_v54 = vmul.f32 0.03125, %v91_v49  ;;  %v111_v55 = vmul.f32 0.03125, %v94_v50  ;;  %v140_v56 = vmul.f32 %v868_v23, %v868_v23  ;;  %v141_v31 = vmul.f32 %v872_v27, %v872_v27 }
  0xb1   :  { %v882_v28 = vsub.f32 %v595_v36, %v110_v54  ;;  %v886_v32 = vsub.f32 %v596_v37, %v111_v55  ;;  %v180_v57 = vsel %vm46_vm0, %v140_v56, 0.0  ;;  %v183_v58 = vsel %vm46_vm0, %v141_v31, 0.0 }
  0xb2   :  { %178 = vadd.xlane.f32.xlu1 %v177_v51  ;;  %181 = vadd.xlane.f32.xlu0 %v180_v57 }
  0xb3   :  { %v142_v59 = vmul.f32 %v882_v28, %v882_v28  ;;  %v143_v60 = vmul.f32 %v886_v32, %v886_v32 }
  0xb5   :  { %v186_v61 = vsel %vm46_vm0, %v142_v59, 0.0  ;;  %v189_v33 = vsel %vm46_vm0, %v143_v60, 0.0 }
  0xb6   :  { %184 = vadd.xlane.f32.xlu1 %v183_v58  ;;  %187 = vadd.xlane.f32.xlu0 %v186_v61 }
  0xba   :  { %190 = vadd.xlane.f32.xlu1 %v189_v33 }
 0x127   :  { %v146_v36 = vpop.xlane.xlu0 %145 }
 0x128   :  { %v192_v37 = vmul.f32 0.03125, %v146_v36 }
 0x12a   :  { %v208_v0 = vadd.f32 1e-06, %v192_v37 }
 0x12b   :  { %v149_v1 = vpop.xlane.xlu1 %148  ;;  %v152_v2 = vpop.xlane.xlu0 %151 }
 0x12c   :  { %604 = vrsqrt.f32 %v208_v0  ;;  %v193_v3 = vmul.f32 0.03125, %v149_v1  ;;  %v194_v4 = vmul.f32 0.03125, %v152_v2 }
 0x12e   :  { %v209_v5 = vadd.f32 1e-06, %v193_v3  ;;  %v210_v7 = vadd.f32 1e-06, %v194_v4 }
 0x12f   :  { %v155_v8 = vpop.xlane.xlu1 %154  ;;  %v158_v10 = vpop.xlane.xlu0 %157 }
 0x130   :  { %606 = vrsqrt.f32 %v209_v5  ;;  %v195_v11 = vmul.f32 0.03125, %v155_v8  ;;  %v196_v12 = vmul.f32 0.03125, %v158_v10 }
 0x131   :  { %608 = vrsqrt.f32 %v210_v7 }
 0x132   :  { %v211_v14 = vadd.f32 1e-06, %v195_v11  ;;  %v212_v15 = vadd.f32 1e-06, %v196_v12 }
 0x133   :  { %v161_v19 = vpop.xlane.xlu1 %160  ;;  %v164_v20 = vpop.xlane.xlu0 %163 }
 0x134   :  { %610 = vrsqrt.f32 %v211_v14  ;;  %v197_v16 = vmul.f32 0.03125, %v161_v19  ;;  %v198_v24 = vmul.f32 0.03125, %v164_v20 }
 0x135   :  { %612 = vrsqrt.f32 %v212_v15 }
 0x136   :  { %v605_v25 = vpop.eup %604  ;;  %v213_v30 = vadd.f32 1e-06, %v197_v16  ;;  %v214_v34 = vadd.f32 1e-06, %v198_v24 }
 0x137   :  { %v240_v35 = vmul.f32 %v605_v25, %v788_v44  ;;  %v167_v38 = vpop.xlane.xlu1 %166  ;;  %v170_v21 = vpop.xlane.xlu0 %169 }
 0x138   :  { %614 = vrsqrt.f32 %v213_v30  ;;  %v199_v40 = vmul.f32 0.03125, %v167_v38  ;;  %v200_v41 = vmul.f32 0.03125, %v170_v21 }
 0x139   :  { %v263_v42 = vmul.f32 %v899_v29, %v240_v35  ;;  %616 = vrsqrt.f32 %v214_v34 }
 0x13a   :  { %v607_v43 = vpop.eup %606  ;;  %v215_v46 = vadd.f32 1e-06, %v199_v40  ;;  %v216_v47 = vadd.f32 1e-06, %v200_v41 }
 0x13b   :  { %v609_v26 = vpop.eup %608  ;;  %v909_v48 = vadd.f32 %v905_v39, %v263_v42  ;;  %v241_v44 = vmul.f32 %v607_v43, %v798_v52  ;;  %v173_v49 = vpop.xlane.xlu1 %172 }
 0x13c   :  { %v176_v50 = vpop.xlane.xlu0 %175  ;;  %v242_v51 = vmul.f32 %v609_v26, %v790_v45  ;;  %618 = vrsqrt.f32 %v215_v46  ;;  %v201_v54 = vmul.f32 0.03125, %v173_v49 }
 0x13d   :  { %v202_v55 = vmul.f32 0.03125, %v176_v50  ;;  %v302_v56 = vmul.f32 %v909_v48, %v909_v48  ;;  %v264_v31 = vmul.f32 %v899_v29, %v241_v44  ;;  %620 = vrsqrt.f32 %v216_v47 }
 0x13e   :  { %v611_v57 = vpop.eup %610  ;;  %v265_v58 = vmul.f32 %v899_v29, %v242_v51  ;;  %v217_v59 = vadd.f32 1e-06, %v201_v54 }
 0x13f   :  { %v218_v60 = vadd.f32 1e-06, %v202_v55  ;;  %v613_v61 = vpop.eup %612  ;;  %v318_v52 = vmul.f32 %v302_v56, %v909_v48  ;;  %v919_v33 = vadd.f32 %v905_v39, %v264_v31  ;;  %v243_v45 = vmul.f32 %v611_v57, %v802_v53  ;;  %v179_v36 = vpop.xlane.xlu1 %178 }
 0x140   :  { %v182_v37 = vpop.xlane.xlu0 %181  ;;  %v923_v0 = vadd.f32 %v905_v39, %v265_v58  ;;  %v244_v1 = vmul.f32 %v613_v61, %v812_v62  ;;  %622 = vrsqrt.f32 %v217_v59  ;;  %v203_v2 = vmul.f32 0.03125, %v179_v36 }
 0x141   :  { %v334_v3 = vmul.f32 0.044715, %v318_v52  ;;  %v303_v4 = vmul.f32 %v919_v33, %v919_v33  ;;  %v266_v5 = vmul.f32 %v899_v29, %v243_v45  ;;  %624 = vrsqrt.f32 %v218_v60 }
 0x142   :  { %v615_v7 = vpop.eup %614  ;;  %v304_v53 = vmul.f32 %v923_v0, %v923_v0  ;;  %v267_v8 = vmul.f32 %v899_v29, %v244_v1  ;;  %v219_v10 = vadd.f32 1e-06, %v203_v2  ;;  %v204_v11 = vmul.f32 0.03125, %v182_v37 }
 0x143   :  { %v617_v12 = vpop.eup %616  ;;  %v350_v62 = vadd.f32 %v334_v3, %v909_v48  ;;  %v319_v14 = vmul.f32 %v303_v4, %v919_v33  ;;  %v935_v15 = vadd.f32 %v905_v39, %v266_v5  ;;  %v245_v19 = vmul.f32 %v615_v7, %v816_v63 }
 0x144   :  { %v320_v20 = vmul.f32 %v304_v53, %v923_v0  ;;  %v940_v16 = vadd.f32 %v905_v39, %v267_v8  ;;  %v246_v24 = vmul.f32 %v617_v12, %v826_v6  ;;  %626 = vrsqrt.f32 %v219_v10 }
 0x145   :  { %v366_v25 = vmul.f32 0.7978846, %v350_v62  ;;  %v335_v30 = vmul.f32 0.044715, %v319_v14  ;;  %v305_v34 = vmul.f32 %v935_v15, %v935_v15  ;;  %v268_v35 = vmul.f32 %v899_v29, %v245_v19 }
 0x146   :  { %v619_v38 = vpop.eup %618  ;;  %v336_v21 = vmul.f32 0.044715, %v320_v20  ;;  %v306_v63 = vmul.f32 %v940_v16, %v940_v16  ;;  %v269_v40 = vmul.f32 %v899_v29, %v246_v24  ;;  %v949_v41 = vadd.f32 1e-06, %v204_v11 }
 0x147   :  { %v621_v42 = vpop.eup %620  ;;  %628 = vtanh.f32 %v366_v25  ;;  %v351_v6 = vadd.f32 %v335_v30, %v919_v33  ;;  %v321_v43 = vmul.f32 %v305_v34, %v935_v15  ;;  %v954_v46 = vadd.f32 %v905_v39, %v268_v35 }
 0x148   :  { %v352_v47 = vadd.f32 %v336_v21, %v923_v0  ;;  %v322_v26 = vmul.f32 %v306_v63, %v940_v16  ;;  %v959_v44 = vadd.f32 %v905_v39, %v269_v40  ;;  %v247_v49 = vmul.f32 %v619_v38, %v830_v9 }
 0x149   :  { %v367_v50 = vmul.f32 0.7978846, %v351_v6  ;;  %v337_v51 = vmul.f32 0.044715, %v321_v43  ;;  %v307_v54 = vmul.f32 %v954_v46, %v954_v46  ;;  %v248_v55 = vmul.f32 %v621_v42, %v840_v13 }
 0x14a   :  { %v623_v56 = vpop.eup %622  ;;  %v368_v31 = vmul.f32 0.7978846, %v352_v47  ;;  %v338_v57 = vmul.f32 0.044715, %v322_v26  ;;  %v308_v58 = vmul.f32 %v959_v44, %v959_v44  ;;  %v270_v59 = vmul.f32 %v899_v29, %v247_v49 }
 0x14b   :  { %v625_v60 = vpop.eup %624  ;;  %630 = vtanh.f32 %v367_v50  ;;  %v353_v61 = vadd.f32 %v337_v51, %v935_v15  ;;  %v323_v9 = vmul.f32 %v307_v54, %v954_v46  ;;  %v271_v52 = vmul.f32 %v899_v29, %v248_v55 }
 0x14c   :  { %632 = vtanh.f32 %v368_v31  ;;  %v354_v45 = vadd.f32 %v338_v57, %v940_v16  ;;  %v324_v13 = vmul.f32 %v308_v58, %v959_v44  ;;  %v974_v36 = vadd.f32 %v905_v39, %v270_v59 }
 0x14d   :  { %v369_v37 = vmul.f32 0.7978846, %v353_v61  ;;  %v339_v1 = vmul.f32 0.044715, %v323_v9  ;;  %v977_v2 = vadd.f32 %v905_v39, %v271_v52  ;;  %v249_v3 = vmul.f32 %v623_v56, %v844_v17 }
 0x14e   :  { %v627_v4 = vpop.eup %626  ;;  %v370_v5 = vmul.f32 0.7978846, %v354_v45  ;;  %v340_v7 = vmul.f32 0.044715, %v324_v13  ;;  %v309_v53 = vmul.f32 %v974_v36, %v974_v36  ;;  %v250_v8 = vmul.f32 %v625_v60, %v854_v18  ;;  %v185_v60 = vpop.xlane.xlu1 %184 }
 0x14f   :  { %634 = vtanh.f32 %v369_v37  ;;  %v355_v10 = vadd.f32 %v339_v1, %v954_v46  ;;  %v310_v11 = vmul.f32 %v977_v2, %v977_v2  ;;  %v272_v12 = vmul.f32 %v899_v29, %v249_v3 }
 0x150   :  { %636 = vtanh.f32 %v370_v5  ;;  %v356_v17 = vadd.f32 %v340_v7, %v959_v44  ;;  %v325_v62 = vmul.f32 %v309_v53, %v974_v36  ;;  %v273_v14 = vmul.f32 %v899_v29, %v250_v8 }
 0x151   :  { %v629_v19 = vpop.eup %628  ;;  %v371_v20 = vmul.f32 0.7978846, %v355_v10  ;;  %v326_v18 = vmul.f32 %v310_v11, %v977_v2  ;;  %v992_v24 = vadd.f32 %v905_v39, %v272_v12  ;;  %v251_v25 = vmul.f32 %v627_v4, %v858_v22  ;;  %v188_v11 = vpop.xlane.xlu0 %187 }
 0x152   :  { %v398_v30 = vadd.f32 1.0, %v629_v19  ;;  %v372_v34 = vmul.f32 0.7978846, %v356_v17  ;;  %v341_v35 = vmul.f32 0.044715, %v325_v62  ;;  %v996_v38 = vadd.f32 %v905_v39, %v273_v14 }
 0x153   :  { %638 = vtanh.f32 %v371_v20  ;;  %v342_v21 = vmul.f32 0.044715, %v326_v18  ;;  %v311_v63 = vmul.f32 %v992_v24, %v992_v24  ;;  %v274_v40 = vmul.f32 %v899_v29, %v251_v25 }
 0x154   :  { %v414_v42 = vmul.f32 0.5, %v398_v30  ;;  %640 = vtanh.f32 %v372_v34  ;;  %v357_v6 = vadd.f32 %v341_v35, %v974_v36  ;;  %v312_v22 = vmul.f32 %v996_v38, %v996_v38  ;;  %v191_v35 = vpop.xlane.xlu1 %190 }
 0x155   :  { %v631_v43 = vpop.eup %630  ;;  %v358_v47 = vadd.f32 %v342_v21, %v977_v2  ;;  %v327_v26 = vmul.f32 %v311_v63, %v992_v24  ;;  %v1007_v49 = vadd.f32 %v905_v39, %v274_v40  ;;  %642 = vrsqrt.f32 %v949_v41 }
 0x156   :  { %v633_v50 = vpop.eup %632  ;;  %v430_v51 = vmul.f32 %v414_v42, %v909_v48  ;;  %v399_v54 = vadd.f32 1.0, %v631_v43  ;;  %v373_v55 = vmul.f32 0.7978846, %v357_v6  ;;  %v328_v56 = vmul.f32 %v312_v22, %v996_v38 }
 0x157   :  { %v400_v31 = vadd.f32 1.0, %v633_v50  ;;  %v374_v57 = vmul.f32 0.7978846, %v358_v47  ;;  %v343_v58 = vmul.f32 0.044715, %v327_v26  ;;  %v313_v59 = vmul.f32 %v1007_v49, %v1007_v49 }
 0x158   :  { %v549_v61 = vpack.c.bf16 %v430_v51, %v430_v51  ;;  %v415_v9 = vmul.f32 0.5, %v399_v54  ;;  %644 = vtanh.f32 %v373_v55  ;;  %v344_v52 = vmul.f32 0.044715, %v328_v56 }
 0x159   :  { %v635_v45 = vpop.eup %634  ;;  %v416_v41 = vmul.f32 0.5, %v400_v31  ;;  %646 = vtanh.f32 %v374_v57  ;;  %v359_v48 = vadd.f32 %v343_v58, %v992_v24  ;;  %v329_v13 = vmul.f32 %v313_v59, %v1007_v49 }
 0x15a   :  { %v637_v37 = vpop.eup %636  ;;  %511 = vst.msk [vmem:[%s1115_s3] sm:$0xf] %vm510_vm1, %v549_v61  ;;  %v431_v1 = vmul.f32 %v415_v9, %v919_v33  ;;  %v401_v3 = vadd.f32 1.0, %v635_v45  ;;  %v360_v4 = vadd.f32 %v344_v52, %v996_v38  ;;  %v205_v5 = vmul.f32 0.03125, %v185_v60 }
 0x15b   :  { %v432_v7 = vmul.f32 %v416_v41, %v923_v0  ;;  %v402_v53 = vadd.f32 1.0, %v637_v37  ;;  %v375_v8 = vmul.f32 0.7978846, %v359_v48  ;;  %v345_v10 = vmul.f32 0.044715, %v329_v13 }
 0x15c   :  { %v550_v12 = vpack.c.bf16 %v431_v1, %v431_v1  ;;  %v417_v17 = vmul.f32 0.5, %v401_v3  ;;  %v376_v62 = vmul.f32 0.7978846, %v360_v4  ;;  %v221_v14 = vadd.f32 1e-06, %v205_v5 }
 0x15d   :  { %v639_v19 = vpop.eup %638  ;;  %v551_v20 = vpack.c.bf16 %v432_v7, %v432_v7  ;;  %v418_v18 = vmul.f32 0.5, %v402_v53  ;;  %648 = vtanh.f32 %v375_v8  ;;  %v361_v33 = vadd.f32 %v345_v10, %v1007_v49 }
 0x15e   :  { %v641_v25 = vpop.eup %640  ;;  %512 = vst.msk [vmem:[%s1115_s3 + $0x4] sm:$0xf] %vm510_vm1, %v550_v12  ;;  %v433_v0 = vmul.f32 %v417_v17, %v935_v15  ;;  %v403_v30 = vadd.f32 1.0, %v639_v19  ;;  %650 = vtanh.f32 %v376_v62  ;;  %v206_v34 = vmul.f32 0.03125, %v188_v11 }
 0x15f   :  { %v643_v21 = vpop.eup %642  ;;  %513 = vst.msk [vmem:[%s1115_s3 + $0x8] sm:$0xf] %vm510_vm1, %v551_v20  ;;  %v434_v63 = vmul.f32 %v418_v18, %v940_v16  ;;  %v404_v40 = vadd.f32 1.0, %v641_v25  ;;  %v377_v42 = vmul.f32 0.7978846, %v361_v33  ;;  %652 = vrsqrt.f32 %v221_v14 }
 0x160   :  { %v552_v6 = vpack.c.bf16 %v433_v0, %v433_v0  ;;  %v419_v22 = vmul.f32 0.5, %v403_v30  ;;  %v252_v43 = vmul.f32 %v643_v21, %v868_v23  ;;  %v222_v15 = vadd.f32 1e-06, %v206_v34 }
 0x161   :  { %v553_v47 = vpack.c.bf16 %v434_v63, %v434_v63  ;;  %v420_v26 = vmul.f32 0.5, %v404_v40  ;;  %654 = vtanh.f32 %v377_v42  ;;  %v207_v50 = vmul.f32 0.03125, %v191_v35 }
 0x162   :  { %v645_v51 = vpop.eup %644  ;;  %514 = vst.msk [vmem:[%s1115_s3 + $0xc] sm:$0xf] %vm510_vm1, %v552_v6  ;;  %v435_v16 = vmul.f32 %v419_v22, %v954_v46  ;;  %v275_v54 = vmul.f32 %v899_v29, %v252_v43  ;;  %656 = vrsqrt.f32 %v222_v15 }
 0x163   :  { %v647_v55 = vpop.eup %646  ;;  %515 = vst.msk [vmem:[%s1115_s3 + $0x10] sm:$0xf] %vm510_vm1, %v553_v47  ;;  %v436_v23 = vmul.f32 %v420_v26, %v959_v44  ;;  %v405_v56 = vadd.f32 1.0, %v645_v51  ;;  %v223_v31 = vadd.f32 1e-06, %v207_v50 }
 0x164   :  { %v554_v57 = vpack.c.bf16 %v435_v16, %v435_v16  ;;  %v406_v58 = vadd.f32 1.0, %v647_v55  ;;  %v1047_v59 = vadd.f32 %v905_v39, %v275_v54 }
 0x165   :  { %v555_v60 = vpack.c.bf16 %v436_v23, %v436_v23  ;;  %v421_v46 = vmul.f32 0.5, %v405_v56  ;;  %658 = vrsqrt.f32 %v223_v31 }
 0x166   :  { %516 = vst.msk [vmem:[%s1115_s3 + $0x14] sm:$0xf] %vm510_vm1, %v554_v57  ;;  %v422_v61 = vmul.f32 0.5, %v406_v58  ;;  %v314_v9 = vmul.f32 %v1047_v59, %v1047_v59 }
 0x167   :  { %v649_v44 = vpop.eup %648  ;;  %517 = vst.msk [vmem:[%s1115_s3 + $0x18] sm:$0xf] %vm510_vm1, %v555_v60  ;;  %v437_v52 = vmul.f32 %v421_v46, %v974_v36 }
 0x168   :  { %v651_v45 = vpop.eup %650  ;;  %v438_v41 = vmul.f32 %v422_v61, %v977_v2  ;;  %v407_v48 = vadd.f32 1.0, %v649_v44  ;;  %v330_v13 = vmul.f32 %v314_v9, %v1047_v59 }
 0x169   :  { %v653_v37 = vpop.eup %652  ;;  %v556_v1 = vpack.c.bf16 %v437_v52, %v437_v52  ;;  %v408_v3 = vadd.f32 1.0, %v651_v45 }
 0x16a   :  { %v557_v4 = vpack.c.bf16 %v438_v41, %v438_v41  ;;  %v423_v5 = vmul.f32 0.5, %v407_v48  ;;  %v346_v7 = vmul.f32 0.044715, %v330_v13  ;;  %v253_v53 = vmul.f32 %v653_v37, %v872_v27 }
 0x16b   :  { %v655_v8 = vpop.eup %654  ;;  %518 = vst.msk [vmem:[%s1115_s3 + $0x1c] sm:$0xf] %vm510_vm1, %v556_v1  ;;  %v424_v36 = vmul.f32 0.5, %v408_v3 }
 0x16c   :  { %v657_v10 = vpop.eup %656  ;;  %519 = vst.msk [vmem:[%s1115_s3 + $0x20] sm:$0xf] %vm510_vm1, %v557_v4  ;;  %v439_v2 = vmul.f32 %v423_v5, %v992_v24  ;;  %v409_v11 = vadd.f32 1.0, %v655_v8  ;;  %v362_v12 = vadd.f32 %v346_v7, %v1047_v59  ;;  %v276_v27 = vmul.f32 %v899_v29, %v253_v53 }
 0x16d   :  { %v440_v17 = vmul.f32 %v424_v36, %v996_v38  ;;  %v254_v62 = vmul.f32 %v657_v10, %v882_v28 }
 0x16e   :  { %v558_v14 = vpack.c.bf16 %v439_v2, %v439_v2  ;;  %v425_v19 = vmul.f32 0.5, %v409_v11  ;;  %v378_v20 = vmul.f32 0.7978846, %v362_v12  ;;  %v299_v18 = vadd.f32 %v905_v39, %v276_v27 }
 0x16f   :  { %v659_v33 = vpop.eup %658  ;;  %v559_v25 = vpack.c.bf16 %v440_v17, %v440_v17  ;;  %v277_v0 = vmul.f32 %v899_v29, %v254_v62 }
 0x170   :  { %520 = vst.msk [vmem:[%s1115_s3 + $0x24] sm:$0xf] %vm510_vm1, %v558_v14  ;;  %v441_v24 = vmul.f32 %v425_v19, %v1007_v49  ;;  %660 = vtanh.f32 %v378_v20  ;;  %v315_v38 = vmul.f32 %v299_v18, %v299_v18  ;;  %v255_v28 = vmul.f32 %v659_v33, %v886_v32 }
 0x171   :  { %521 = vst.msk [vmem:[%s1115_s3 + $0x28] sm:$0xf] %vm510_vm1, %v559_v25  ;;  %v300_v30 = vadd.f32 %v905_v39, %v277_v0 }
 0x172   :  { %v560_v34 = vpack.c.bf16 %v441_v24, %v441_v24  ;;  %v331_v35 = vmul.f32 %v315_v38, %v299_v18  ;;  %v278_v21 = vmul.f32 %v899_v29, %v255_v28 }
 0x173   :  { %v316_v63 = vmul.f32 %v300_v30, %v300_v30 }
 0x174   :  { %522 = vst.msk [vmem:[%s1115_s3 + $0x2c] sm:$0xf] %vm510_vm1, %v560_v34  ;;  %v347_v49 = vmul.f32 0.044715, %v331_v35  ;;  %v301_v32 = vadd.f32 %v905_v39, %v278_v21 }
 0x175   :  { %v332_v40 = vmul.f32 %v316_v63, %v300_v30 }
 0x176   :  { %v363_v42 = vadd.f32 %v347_v49, %v299_v18  ;;  %v317_v6 = vmul.f32 %v301_v32, %v301_v32 }
 0x177   :  { %v348_v22 = vmul.f32 0.044715, %v332_v40 }
 0x178   :  { %v379_v43 = vmul.f32 0.7978846, %v363_v42  ;;  %v333_v15 = vmul.f32 %v317_v6, %v301_v32 }
 0x179   :  { %v364_v47 = vadd.f32 %v348_v22, %v300_v30 }
 0x17a   :  { %v661_v26 = vpop.eup %660  ;;  %662 = vtanh.f32 %v379_v43  ;;  %v349_v50 = vmul.f32 0.044715, %v333_v15 }
 0x17b   :  { %v410_v29 = vadd.f32 1.0, %v661_v26  ;;  %v380_v51 = vmul.f32 0.7978846, %v364_v47 }
 0x17c   :  { %v365_v16 = vadd.f32 %v349_v50, %v301_v32 }
 0x17d   :  { %v426_v54 = vmul.f32 0.5, %v410_v29  ;;  %664 = vtanh.f32 %v380_v51 }
 0x17e   :  { %v381_v55 = vmul.f32 0.7978846, %v365_v16 }
 0x17f   :  { %v442_v23 = vmul.f32 %v426_v54, %v1047_v59 }
 0x180   :  { %666 = vtanh.f32 %v381_v55 }
 0x181   :  { %v561_v39 = vpack.c.bf16 %v442_v23, %v442_v23 }
 0x183   :  { %523 = vst.msk [vmem:[%s1115_s3 + $0x30] sm:$0xf] %vm510_vm1, %v561_v39 }
 0x184   :  { %v663_v56 = vpop.eup %662 }
 0x185   :  { %v411_v31 = vadd.f32 1.0, %v663_v56 }
 0x187   :  { %v665_v57 = vpop.eup %664  ;;  %v427_v58 = vmul.f32 0.5, %v411_v31 }
 0x188   :  { %v412_v60 = vadd.f32 1.0, %v665_v57 }
 0x189   :  { %v443_v46 = vmul.f32 %v427_v58, %v299_v18 }
 0x18a   :  { %v667_v61 = vpop.eup %666  ;;  %v428_v9 = vmul.f32 0.5, %v412_v60 }
 0x18b   :  { %v562_v44 = vpack.c.bf16 %v443_v46, %v443_v46  ;;  %v413_v52 = vadd.f32 1.0, %v667_v61 }
 0x18c   :  { %v444_v45 = vmul.f32 %v428_v9, %v300_v30 }
 0x18d   :  { %524 = vst.msk [vmem:[%s1115_s3 + $0x34] sm:$0xf] %vm510_vm1, %v562_v44  ;;  %v429_v59 = vmul.f32 0.5, %v413_v52 }
 0x18e   :  { %v563_v41 = vpack.c.bf16 %v444_v45, %v444_v45 }
 0x18f   :  { %v445_v48 = vmul.f32 %v429_v59, %v301_v32 }
 0x190   :  { %525 = vst.msk [vmem:[%s1115_s3 + $0x38] sm:$0xf] %vm510_vm1, %v563_v41 }
 0x191   :  { %v564_v13 = vpack.c.bf16 %v445_v48, %v445_v48 }
 0x193   :  { %526 = vst.msk [vmem:[%s1115_s3 + $0x3c] sm:$0xf] %vm510_vm1, %v564_v13 }

// kernel: medsam_forward.45
= control target key start
LH: loop header
LB: loop body
LE: loop exit
PB: predicated region body
PF: predicated region fallthrough
CT: control target
= control target key end

     0   :  { %vm94_vm0 = vcmask 261120   ;;  %vm424_vm1 = vcmask 519168   ;;  %s827_s1 = inlined_call_operand.vmem [shape: bf16[32,64], index: 1, kind: input, shape index: {}]   ;;  %s828_s0 = inlined_call_operand.vmem [shape: bf16[128,32], index: 0, kind: input, shape index: {}]   ;;  %s829_s2 = inlined_call_operand.vmem [shape: f32[1,64], index: 2, kind: input, shape index: {}]   ;;  %s830_s3 = inlined_call_operand.vmem [shape: bf16[128,64], index: 3, kind: output, shape index: {}]  }
   0x1   :  { %v530_v0 = vld [vmem:[%s827_s1] sm:$0xff]   ;;  %v531_v1 = vld [vmem:[%s827_s1 + $0x8] sm:$0xff]   ;;  %v536_v6 = vld [vmem:[%s828_s0 + $0x10] sm:$0xff]  }
   0x2   :  { %506 = vmatprep.subr.bf16.mxu0 %v530_v0  ;;  %526 = vmatprep.subr.bf16.mxu1 %v530_v0  ;;  %v532_v2 = vld [vmem:[%s828_s0] sm:$0xff]   ;;  %v534_v4 = vld [vmem:[%s828_s0 + $0x8] sm:$0xff]   ;;  %v537_v7 = vld [vmem:[%s828_s0 + $0x30] sm:$0xff]  }
   0x3   :  { %507 = vmatpush3.bf16.msra.mxu0 %v530_v0  ;;  %528 = vmatpush3.bf16.msra.mxu1 %v530_v0  ;;  %v533_v3 = vld [vmem:[%s828_s0 + $0x20] sm:$0xff]   ;;  %v535_v5 = vld [vmem:[%s828_s0 + $0x28] sm:$0xff]   ;;  %v538_v8 = vld [vmem:[%s828_s0 + $0x18] sm:$0xff]  }
   0x4   :  { %508 = vmatprep.subr.bf16.mxu0 %v531_v1  ;;  %527 = vmatprep.subr.bf16.mxu1 %v531_v1  ;;  %v539_v9 = vld [vmem:[%s828_s0 + $0x38] sm:$0xff]   ;;  %v633_v10 = vld [vmem:[%s829_s2] ss:$0 sm:$0xff] }
   0x5   :  { %510 = vmatprep.mubr.msk.bf16.mxu0 %vm94_vm0, %v532_v2  ;;  %518 = vmatprep.mubr.msk.bf16.mxu1 %vm94_vm0, %v533_v3 }
   0x7   :  { %509 = vmatpush3.bf16.msra.mxu0 %v531_v1  ;;  %529 = vmatpush3.bf16.msra.mxu1 %v531_v1 }
   0xa   :  { %511 = vmatmul.mubr.msk.bf16.vlgmr.msra.gmra.mrb[0].mxu0 %vm94_vm0, %v534_v4  ;;  %519 = vmatmul.mubr.msk.bf16.vlgmr.msra.gmra.mrb[0].mxu1 %vm94_vm0, %v535_v5 }
   0xb   :  { %514 = vmatprep.mubr.msk.bf16.mxu0 %vm94_vm0, %v536_v6  ;;  %522 = vmatprep.mubr.msk.bf16.mxu1 %vm94_vm0, %v537_v7 }
  0x12   :  { %515 = vmatmul.mubr.msk.bf16.gmra.mrb[4].mxu0 %vm94_vm0, %v538_v8  ;;  %523 = vmatmul.mubr.msk.bf16.gmra.mrb[4].mxu1 %vm94_vm0, %v539_v9 }
  0xdd   :  { %v512_v11 = vpop.f32.mrb[0].mxu0  ;;  %v520_v12 = vpop.f32.mrb[0].mxu1 }
  0xde   :  { %v636_v13 = vadd.f32 %v512_v11, %v633_v10  ;;  %v639_v14 = vadd.f32 %v520_v12, %v633_v10  ;;  %v153_v15 = vpop.f32.mrb[1].mxu0  ;;  %v185_v16 = vpop.f32.mrb[1].mxu1 }
  0xdf   :  { %v642_v17 = vadd.f32 %v633_v10, %v153_v15  ;;  %v645_v18 = vadd.f32 %v633_v10, %v185_v16  ;;  %v513_v19 = vpop.f32.mrb[2].mxu0  ;;  %v521_v20 = vpop.f32.mrb[2].mxu1 }
  0xe0   :  { %v218_v21 = vmul.f32 %v636_v13, %v636_v13  ;;  %v226_v22 = vmul.f32 %v639_v14, %v639_v14  ;;  %v652_v23 = vadd.f32 %v513_v19, %v633_v10  ;;  %v655_v24 = vadd.f32 %v521_v20, %v633_v10  ;;  %v156_v25 = vpop.f32.mrb[3].mxu0  ;;  %v188_v26 = vpop.f32.mrb[3].mxu1 }
  0xe1   :  { %v216_v27 = vmul.f32 %v642_v17, %v642_v17  ;;  %v224_v28 = vmul.f32 %v645_v18, %v645_v18  ;;  %v662_v29 = vadd.f32 %v633_v10, %v156_v25  ;;  %v665_v30 = vadd.f32 %v633_v10, %v188_v26 }
  0xe2   :  { %v234_v31 = vmul.f32 %v218_v21, %v636_v13  ;;  %v242_v32 = vmul.f32 %v226_v22, %v639_v14  ;;  %v219_v33 = vmul.f32 %v652_v23, %v652_v23  ;;  %v227_v34 = vmul.f32 %v655_v24, %v655_v24 }
  0xe3   :  { %v232_v35 = vmul.f32 %v216_v27, %v642_v17  ;;  %v240_v36 = vmul.f32 %v224_v28, %v645_v18  ;;  %v217_v37 = vmul.f32 %v662_v29, %v662_v29  ;;  %v225_v38 = vmul.f32 %v665_v30, %v665_v30 }
  0xe4   :  { %v250_v39 = vmul.f32 0.044715, %v234_v31  ;;  %v258_v40 = vmul.f32 0.044715, %v242_v32  ;;  %v235_v41 = vmul.f32 %v219_v33, %v652_v23  ;;  %v243_v42 = vmul.f32 %v227_v34, %v655_v24 }
  0xe5   :  { %v248_v43 = vmul.f32 0.044715, %v232_v35  ;;  %v256_v44 = vmul.f32 0.044715, %v240_v36  ;;  %v233_v45 = vmul.f32 %v217_v37, %v662_v29  ;;  %v241_v46 = vmul.f32 %v225_v38, %v665_v30  ;;  %v516_v47 = vpop.f32.mrb[4].mxu0  ;;  %v524_v48 = vpop.f32.mrb[4].mxu1 }
  0xe6   :  { %v266_v49 = vadd.f32 %v250_v39, %v636_v13  ;;  %v274_v50 = vadd.f32 %v258_v40, %v639_v14  ;;  %v251_v51 = vmul.f32 0.044715, %v235_v41  ;;  %v259_v52 = vmul.f32 0.044715, %v243_v42  ;;  %v169_v53 = vpop.f32.mrb[5].mxu0  ;;  %v201_v54 = vpop.f32.mrb[5].mxu1 }
  0xe7   :  { %v264_v55 = vadd.f32 %v248_v43, %v642_v17  ;;  %v272_v56 = vadd.f32 %v256_v44, %v645_v18  ;;  %v249_v57 = vmul.f32 0.044715, %v233_v45  ;;  %v257_v58 = vmul.f32 0.044715, %v241_v46  ;;  %v517_v59 = vpop.f32.mrb[6].mxu0  ;;  %v525_v60 = vpop.f32.mrb[6].mxu1 }
  0xe8   :  { %v282_v61 = vmul.f32 0.7978846, %v266_v49  ;;  %v290_v62 = vmul.f32 0.7978846, %v274_v50  ;;  %v267_v63 = vadd.f32 %v251_v51, %v652_v23  ;;  %v275_v0 = vadd.f32 %v259_v52, %v655_v24  ;;  %v172_v1 = vpop.f32.mrb[7].mxu0  ;;  %v204_v2 = vpop.f32.mrb[7].mxu1 }
  0xe9   :  { %v280_v3 = vmul.f32 0.7978846, %v264_v55  ;;  %v288_v4 = vmul.f32 0.7978846, %v272_v56  ;;  %v265_v5 = vadd.f32 %v249_v57, %v662_v29  ;;  %v273_v6 = vadd.f32 %v257_v58, %v665_v30 }
  0xea   :  { %540 = vtanh.f32 %v282_v61  ;;  %v283_v7 = vmul.f32 0.7978846, %v267_v63  ;;  %v291_v8 = vmul.f32 0.7978846, %v275_v0  ;;  %v692_v9 = vadd.f32 %v516_v47, %v633_v10 }
  0xeb   :  { %542 = vtanh.f32 %v290_v62  ;;  %v281_v11 = vmul.f32 0.7978846, %v265_v5  ;;  %v289_v12 = vmul.f32 0.7978846, %v273_v6  ;;  %v695_v15 = vadd.f32 %v524_v48, %v633_v10 }
  0xec   :  { %544 = vtanh.f32 %v280_v3  ;;  %v222_v16 = vmul.f32 %v692_v9, %v692_v9  ;;  %v700_v19 = vadd.f32 %v633_v10, %v169_v53  ;;  %v703_v20 = vadd.f32 %v633_v10, %v201_v54 }
  0xed   :  { %546 = vtanh.f32 %v288_v4  ;;  %v230_v21 = vmul.f32 %v695_v15, %v695_v15  ;;  %v708_v22 = vadd.f32 %v517_v59, %v633_v10  ;;  %v711_v25 = vadd.f32 %v525_v60, %v633_v10 }
  0xee   :  { %548 = vtanh.f32 %v283_v7  ;;  %v238_v26 = vmul.f32 %v222_v16, %v692_v9  ;;  %v220_v27 = vmul.f32 %v700_v19, %v700_v19  ;;  %v228_v28 = vmul.f32 %v703_v20, %v703_v20 }
  0xef   :  { %550 = vtanh.f32 %v291_v8  ;;  %v246_v31 = vmul.f32 %v230_v21, %v695_v15  ;;  %v223_v32 = vmul.f32 %v708_v22, %v708_v22  ;;  %v231_v33 = vmul.f32 %v711_v25, %v711_v25 }
  0xf0   :  { %552 = vtanh.f32 %v281_v11  ;;  %v254_v34 = vmul.f32 0.044715, %v238_v26  ;;  %v236_v35 = vmul.f32 %v220_v27, %v700_v19  ;;  %v244_v36 = vmul.f32 %v228_v28, %v703_v20 }
  0xf1   :  { %554 = vtanh.f32 %v289_v12  ;;  %v262_v37 = vmul.f32 0.044715, %v246_v31  ;;  %v239_v38 = vmul.f32 %v223_v32, %v708_v22  ;;  %v247_v39 = vmul.f32 %v231_v33, %v711_v25 }
  0xf2   :  { %v270_v40 = vadd.f32 %v254_v34, %v692_v9  ;;  %v252_v41 = vmul.f32 0.044715, %v236_v35  ;;  %v260_v42 = vmul.f32 0.044715, %v244_v36  ;;  %v729_v43 = vadd.f32 %v633_v10, %v172_v1 }
  0xf3   :  { %v278_v44 = vadd.f32 %v262_v37, %v695_v15  ;;  %v255_v45 = vmul.f32 0.044715, %v239_v38  ;;  %v263_v46 = vmul.f32 0.044715, %v247_v39  ;;  %v733_v47 = vadd.f32 %v633_v10, %v204_v2 }
  0xf4   :  { %v541_v48 = vpop.eup %540  ;;  %v286_v49 = vmul.f32 0.7978846, %v270_v40  ;;  %v268_v50 = vadd.f32 %v252_v41, %v700_v19  ;;  %v276_v51 = vadd.f32 %v260_v42, %v703_v20  ;;  %v221_v52 = vmul.f32 %v729_v43, %v729_v43 }
  0xf5   :  { %v543_v53 = vpop.eup %542  ;;  %v314_v54 = vadd.f32 1.0, %v541_v48  ;;  %v294_v55 = vmul.f32 0.7978846, %v278_v44  ;;  %v271_v56 = vadd.f32 %v255_v45, %v708_v22  ;;  %v279_v57 = vadd.f32 %v263_v46, %v711_v25 }
  0xf6   :  { %v545_v58 = vpop.eup %544  ;;  %v322_v59 = vadd.f32 1.0, %v543_v53  ;;  %556 = vtanh.f32 %v286_v49  ;;  %v284_v10 = vmul.f32 0.7978846, %v268_v50  ;;  %v292_v60 = vmul.f32 0.7978846, %v276_v51 }
  0xf7   :  { %v547_v61 = vpop.eup %546  ;;  %v330_v62 = vmul.f32 0.5, %v314_v54  ;;  %v312_v63 = vadd.f32 1.0, %v545_v58  ;;  %558 = vtanh.f32 %v294_v55  ;;  %v287_v0 = vmul.f32 0.7978846, %v271_v56 }
  0xf8   :  { %v549_v1 = vpop.eup %548  ;;  %v338_v2 = vmul.f32 0.5, %v322_v59  ;;  %v320_v3 = vadd.f32 1.0, %v547_v61  ;;  %560 = vtanh.f32 %v284_v10  ;;  %v295_v4 = vmul.f32 0.7978846, %v279_v57 }
  0xf9   :  { %v551_v5 = vpop.eup %550  ;;  %v346_v6 = vmul.f32 %v330_v62, %v636_v13  ;;  %v328_v7 = vmul.f32 0.5, %v312_v63  ;;  %v315_v8 = vadd.f32 1.0, %v549_v1  ;;  %562 = vtanh.f32 %v292_v60 }
  0xfa   :  { %v553_v11 = vpop.eup %552  ;;  %v354_v12 = vmul.f32 %v338_v2, %v639_v14  ;;  %v336_v16 = vmul.f32 0.5, %v320_v3  ;;  %v323_v21 = vadd.f32 1.0, %v551_v5  ;;  %564 = vtanh.f32 %v287_v0 }
  0xfb   :  { %v555_v26 = vpop.eup %554  ;;  %v482_v27 = vpack.c.bf16 %v346_v6, %v346_v6  ;;  %v344_v28 = vmul.f32 %v328_v7, %v642_v17  ;;  %v331_v31 = vmul.f32 0.5, %v315_v8  ;;  %v313_v32 = vadd.f32 1.0, %v553_v11 }
  0xfc   :  { %v490_v33 = vpack.c.bf16 %v354_v12, %v354_v12  ;;  %v352_v34 = vmul.f32 %v336_v16, %v645_v18  ;;  %v339_v35 = vmul.f32 0.5, %v323_v21  ;;  %v321_v13 = vadd.f32 1.0, %v555_v26 }
  0xfd   :  { %427 = vst.msk [vmem:[%s830_s3 + $0x8] sm:$0xf] %vm424_vm1, %v482_v27  ;;  %v480_v14 = vpack.c.bf16 %v344_v28, %v344_v28  ;;  %v347_v36 = vmul.f32 %v331_v31, %v652_v23  ;;  %v329_v37 = vmul.f32 0.5, %v313_v32  ;;  %566 = vtanh.f32 %v295_v4 }
  0xfe   :  { %435 = vst.msk [vmem:[%s830_s3 + $0x28] sm:$0xf] %vm424_vm1, %v490_v33  ;;  %v488_v17 = vpack.c.bf16 %v352_v34, %v352_v34  ;;  %v355_v18 = vmul.f32 %v339_v35, %v655_v24  ;;  %v337_v38 = vmul.f32 0.5, %v321_v13  ;;  %v237_v39 = vmul.f32 %v221_v52, %v729_v43 }
  0xff   :  { %425 = vst.msk [vmem:[%s830_s3] sm:$0xf] %vm424_vm1, %v480_v14  ;;  %v483_v40 = vpack.c.bf16 %v347_v36, %v347_v36  ;;  %v345_v23 = vmul.f32 %v329_v37, %v662_v29  ;;  %v229_v41 = vmul.f32 %v733_v47, %v733_v47 }
 0x100   :  { %v557_v42 = vpop.eup %556  ;;  %433 = vst.msk [vmem:[%s830_s3 + $0x20] sm:$0xf] %vm424_vm1, %v488_v17  ;;  %v491_v24 = vpack.c.bf16 %v355_v18, %v355_v18  ;;  %v353_v44 = vmul.f32 %v337_v38, %v665_v30  ;;  %v253_v45 = vmul.f32 0.044715, %v237_v39 }
 0x101   :  { %v559_v46 = vpop.eup %558  ;;  %428 = vst.msk [vmem:[%s830_s3 + $0xc] sm:$0xf] %vm424_vm1, %v483_v40  ;;  %v481_v29 = vpack.c.bf16 %v345_v23, %v345_v23  ;;  %v318_v48 = vadd.f32 1.0, %v557_v42  ;;  %v245_v49 = vmul.f32 %v229_v41, %v733_v47 }
 0x102   :  { %v561_v50 = vpop.eup %560  ;;  %436 = vst.msk [vmem:[%s830_s3 + $0x2c] sm:$0xf] %vm424_vm1, %v491_v24  ;;  %v489_v51 = vpack.c.bf16 %v353_v44, %v353_v44  ;;  %v326_v52 = vadd.f32 1.0, %v559_v46  ;;  %v269_v30 = vadd.f32 %v253_v45, %v729_v43 }
 0x103   :  { %v563_v53 = vpop.eup %562  ;;  %426 = vst.msk [vmem:[%s830_s3 + $0x4] sm:$0xf] %vm424_vm1, %v481_v29  ;;  %v334_v54 = vmul.f32 0.5, %v318_v48  ;;  %v316_v55 = vadd.f32 1.0, %v561_v50  ;;  %v261_v56 = vmul.f32 0.044715, %v245_v49 }
 0x104   :  { %v565_v57 = vpop.eup %564  ;;  %434 = vst.msk [vmem:[%s830_s3 + $0x24] sm:$0xf] %vm424_vm1, %v489_v51  ;;  %v342_v58 = vmul.f32 0.5, %v326_v52  ;;  %v324_v59 = vadd.f32 1.0, %v563_v53  ;;  %v285_v10 = vmul.f32 0.7978846, %v269_v30 }
 0x105   :  { %v350_v60 = vmul.f32 %v334_v54, %v692_v9  ;;  %v332_v61 = vmul.f32 0.5, %v316_v55  ;;  %v319_v62 = vadd.f32 1.0, %v565_v57  ;;  %v277_v63 = vadd.f32 %v261_v56, %v733_v47 }
 0x106   :  { %v358_v0 = vmul.f32 %v342_v58, %v695_v15  ;;  %v340_v1 = vmul.f32 0.5, %v324_v59  ;;  %568 = vtanh.f32 %v285_v10 }
 0x107   :  { %v567_v2 = vpop.eup %566  ;;  %v486_v3 = vpack.c.bf16 %v350_v60, %v350_v60  ;;  %v348_v4 = vmul.f32 %v332_v61, %v700_v19  ;;  %v335_v5 = vmul.f32 0.5, %v319_v62  ;;  %v293_v6 = vmul.f32 0.7978846, %v277_v63 }
 0x108   :  { %v494_v7 = vpack.c.bf16 %v358_v0, %v358_v0  ;;  %v356_v8 = vmul.f32 %v340_v1, %v703_v20  ;;  %v327_v11 = vadd.f32 1.0, %v567_v2 }
 0x109   :  { %431 = vst.msk [vmem:[%s830_s3 + $0x18] sm:$0xf] %vm424_vm1, %v486_v3  ;;  %v484_v9 = vpack.c.bf16 %v348_v4, %v348_v4  ;;  %v351_v15 = vmul.f32 %v335_v5, %v708_v22  ;;  %570 = vtanh.f32 %v293_v6 }
 0x10a   :  { %439 = vst.msk [vmem:[%s830_s3 + $0x38] sm:$0xf] %vm424_vm1, %v494_v7  ;;  %v492_v19 = vpack.c.bf16 %v356_v8, %v356_v8  ;;  %v343_v12 = vmul.f32 0.5, %v327_v11 }
 0x10b   :  { %429 = vst.msk [vmem:[%s830_s3 + $0x10] sm:$0xf] %vm424_vm1, %v484_v9  ;;  %v487_v20 = vpack.c.bf16 %v351_v15, %v351_v15 }
 0x10c   :  { %437 = vst.msk [vmem:[%s830_s3 + $0x30] sm:$0xf] %vm424_vm1, %v492_v19  ;;  %v359_v22 = vmul.f32 %v343_v12, %v711_v25 }
 0x10d   :  { %432 = vst.msk [vmem:[%s830_s3 + $0x1c] sm:$0xf] %vm424_vm1, %v487_v20 }
 0x10e   :  { %v495_v16 = vpack.c.bf16 %v359_v22, %v359_v22 }
 0x110   :  { %v569_v21 = vpop.eup %568  ;;  %440 = vst.msk [vmem:[%s830_s3 + $0x3c] sm:$0xf] %vm424_vm1, %v495_v16 }
 0x111   :  { %v317_v26 = vadd.f32 1.0, %v569_v21 }
 0x113   :  { %v571_v27 = vpop.eup %570  ;;  %v333_v28 = vmul.f32 0.5, %v317_v26 }
 0x114   :  { %v325_v31 = vadd.f32 1.0, %v571_v27 }
 0x115   :  { %v349_v32 = vmul.f32 %v333_v28, %v729_v43 }
 0x116   :  { %v341_v33 = vmul.f32 0.5, %v325_v31 }
 0x117   :  { %v485_v25 = vpack.c.bf16 %v349_v32, %v349_v32 }
 0x118   :  { %v357_v34 = vmul.f32 %v341_v33, %v733_v47 }
 0x119   :  { %430 = vst.msk [vmem:[%s830_s3 + $0x14] sm:$0xf] %vm424_vm1, %v485_v25 }
 0x11a   :  { %v493_v35 = vpack.c.bf16 %v357_v34, %v357_v34 }
 0x11c   :  { %438 = vst.msk [vmem:[%s830_s3 + $0x34] sm:$0xf] %vm424_vm1, %v493_v35 }

// kernel: medsam_forward.46
= control target key start
LH: loop header
LB: loop body
LE: loop exit
PB: predicated region body
PF: predicated region fallthrough
CT: control target
= control target key end

     0   :  { %s661_s9 = smov 0   ;;  %s663_s10 = smov 0   ;;  %s738_s0 = inlined_call_operand.vmem [shape: bf16[2,16,16], index: 0, kind: input, shape index: {}]   ;;  %s739_s1 = inlined_call_operand.vmem [shape: bf16[2,256,16], index: 1, kind: input, shape index: {}]   ;;  %s740_s2 = inlined_call_operand.vmem [shape: f32[2,16,256], index: 2, kind: output, shape index: {}]  }
   0x1   :  { %s665_s11 = smov 0  }
   0x2 LB: > { %s24_s12 = sadd.s32 1, %s640_s10  ;;  %p525_p0 = scmp.ge.s32.totalorder %s644_s11, 1  ;;  %s644_s11 = sphi %s665_s11, %s12_s11   ;;  %s640_s10 = sphi %s663_s10, %s742_s10   ;;  %s636_s9 = sphi %s661_s9, %s741_s9  }
   0x3   : > { %p26_p1 = scmp.ge.s32.totalorder %s24_s12, 2  ;;  %p143_p2 = scmp.lt.s32.totalorder %s644_s11, 3 }
   0x5   : > { %s744_s12 = smov (%p26_p1, %s24_s12), 0  ;;  %p144_p3 = pnand %p525_p0, %p143_p2 }
   0x6   : > { %p178_p4 = scmp.lt.s32.totalorder (!%p144_p3), %s636_s9, 1  ;;  %vm323_vm0 = vcmask (!%p144_p3), 130048  }
   0x7   : > { %147 = sbr.rel (%p144_p3) target bundleno = 299 (0x12b), region = 28 }
   0xe   : > { %s746_s9 = smov (!%p178_p4, %s636_s9), 1 }
   0xf   : > { %s553_s13 = sshll.u32 %s746_s9, 7  ;;  %s552_s17 = sshll.u32 %s746_s9, 3 }
  0x10   : > { %s685_s16 = scalar_lea.vmem %s739_s1, %s553_s13  ;;  %s182_s20 = scalar_lea.vmem %s738_s0, %s552_s17 }
  0x11   : > { %v605_v0 = vld [vmem:[%s685_s16 + $0x40] sm:$0xff]   ;;  %v607_v2 = vld [vmem:[%s685_s16 + $0x48] sm:$0xff]   ;;  %v609_v6 = vld [vmem:[%s685_s16 + $0x50] sm:$0xff]   ;;  %s554_s21 = sshll.u32 %s746_s9, 5 }
  0x12   : > { %v606_v1 = vld [vmem:[%s685_s16] sm:$0xff]   ;;  %573 = vmatprep.subr.msk.bf16.mxu0 %vm323_vm0, %v605_v0  ;;  %v608_v4 = vld [vmem:[%s685_s16 + $0x8] sm:$0xff]   ;;  %v610_v7 = vld [vmem:[%s685_s16 + $0x10] sm:$0xff]   ;;  %s201_s24 = scalar_lea.vmem %s740_s2, %s554_s21 }
  0x13   : > { %v328_v3 = vsel %vm323_vm0, %v606_v1, 0  ;;  %v331_v5 = vsel %vm323_vm0, %v608_v4, 0  ;;  %v621_v8 = vld [vmem:[%s182_s20] sm:$0xff]   ;;  %v334_v9 = vsel %vm323_vm0, %v610_v7, 0  ;;  %v611_v10 = vld [vmem:[%s685_s16 + $0x58] sm:$0xff]   ;;  %v615_v16 = vld [vmem:[%s685_s16 + $0x68] sm:$0xff]  }
  0x14   : > { %556 = vmatpush3.bf16.xpose.msra.mxu0 %v328_v3  ;;  %571 = vmatprep.mubr.msk.bf16.mxu0 %vm323_vm0, %v621_v8  ;;  %v612_v11 = vld [vmem:[%s685_s16 + $0x18] sm:$0xff]   ;;  %v613_v13 = vld [vmem:[%s685_s16 + $0x60] sm:$0xff]   ;;  %v616_v17 = vld [vmem:[%s685_s16 + $0x28] sm:$0xff]  }
  0x15   : > { %574 = vmatprep.subr.msk.bf16.mxu0 %vm323_vm0, %v607_v2  ;;  %v337_v12 = vsel %vm323_vm0, %v612_v11, 0  ;;  %v614_v14 = vld [vmem:[%s685_s16 + $0x20] sm:$0xff]   ;;  %v343_v18 = vsel %vm323_vm0, %v616_v17, 0  ;;  %v617_v19 = vld [vmem:[%s685_s16 + $0x70] sm:$0xff]   ;;  %v619_v22 = vld [vmem:[%s685_s16 + $0x78] sm:$0xff]  }
  0x16   : > { %v340_v15 = vsel %vm323_vm0, %v614_v14, 0  ;;  %v618_v20 = vld [vmem:[%s685_s16 + $0x30] sm:$0xff]   ;;  %v620_v23 = vld [vmem:[%s685_s16 + $0x38] sm:$0xff]  }
  0x17   : > { %v346_v21 = vsel %vm323_vm0, %v618_v20, 0  ;;  %v349_v24 = vsel %vm323_vm0, %v620_v23, 0 }
  0x1c   : > { %558 = vmatpush3.bf16.xpose.msra.mxu0 %v331_v5 }
  0x1d   : > { %575 = vmatprep.subr.msk.bf16.mxu0 %vm323_vm0, %v609_v6 }
  0x24   : > { %560 = vmatpush3.bf16.xpose.msra.mxu0 %v334_v9 }
  0x25   : > { %576 = vmatprep.subr.msk.bf16.mxu0 %vm323_vm0, %v611_v10 }
  0x2c   : > { %562 = vmatpush3.bf16.xpose.msra.mxu0 %v337_v12 }
  0x2d   : > { %577 = vmatprep.subr.msk.bf16.mxu0 %vm323_vm0, %v613_v13 }
  0x34   : > { %564 = vmatpush3.bf16.xpose.msra.mxu0 %v340_v15 }
  0x35   : > { %578 = vmatprep.subr.msk.bf16.mxu0 %vm323_vm0, %v615_v16 }
  0x3c   : > { %566 = vmatpush3.bf16.xpose.msra.mxu0 %v343_v18 }
  0x3d   : > { %579 = vmatprep.subr.msk.bf16.mxu0 %vm323_vm0, %v617_v19 }
  0x44   : > { %568 = vmatpush3.bf16.xpose.msra.mxu0 %v346_v21 }
  0x45   : > { %580 = vmatprep.subr.msk.bf16.mxu0 %vm323_vm0, %v619_v22 }
  0x4c   : > { %570 = vmatpush3.bf16.xpose.msra.mxu0 %v349_v24 }
  0x53   : > { %572 = vmatmul.mubr.msk.bf16.vlgmr.msra.gmra.mrb[0].mxu0 %vm323_vm0, %v621_v8 }
 0x126   : > { %v409_v25 = vpop.f32.mrb[0].mxu0 }
 0x127   : > { %418 = vst [vmem:[%s201_s24] sm:$0xff] %v409_v25  ;;  %v411_v26 = vpop.f32.mrb[1].mxu0 }
 0x128   : > { %419 = vst [vmem:[%s201_s24 + $0x8] sm:$0xff] %v411_v26  ;;  %v413_v27 = vpop.f32.mrb[2].mxu0 }
 0x129   : > { %420 = vst [vmem:[%s201_s24 + $0x10] sm:$0xff] %v413_v27  ;;  %v415_v28 = vpop.f32.mrb[3].mxu0 }
 0x12a   : > { %421 = vst [vmem:[%s201_s24 + $0x18] sm:$0xff] %v415_v28 }
 0x12b PF: > { %s12_s11 = sadd.s32 1, %s644_s11   ;;  %s741_s9 = smov %s640_s10 }
 0x12c   : > { %p9_p5 = scmp.ge.s32.totalorder %s12_s11, 4   ;;  %s742_s10 = smov %s744_s12 }
 0x12e   :  { %11 = sbr.rel (!%p9_p5) target bundleno = 2 (0x2), region = 61 }

// kernel: medsam_forward.47
= control target key start
LH: loop header
LB: loop body
LE: loop exit
PB: predicated region body
PF: predicated region fallthrough
CT: control target
= control target key end

     0   :  { %8 = vsyncpa [#allocation3], 0  ;;  %s979_s0 = inlined_call_operand.vmem [shape: bf16[2,16,16], index: 0, kind: input, shape index: {}]   ;;  %s980_s1 = inlined_call_operand.vmem [shape: bf16[64,16], index: 1, kind: input, shape index: {}, may-alias: {1,2}]   ;;  %s981_s2 = inlined_call_operand.vmem [shape: bf16[64,16], index: 2, kind: input, shape index: {}, may-alias: {1,2}]   ;;  %s982_s3 = inlined_call_operand.hbm [shape: f32[2,64,64], index: 3, kind: output, shape index: {}]  }
   0x1   :  { %10 = vsyncpa [#allocation3 + $0x1], 0  ;;  %s812_s12 = smov 0   ;;  %s814_s13 = smov 0  }
   0x2   :  { %s816_s14 = smov 0   ;;  %s818_s15 = smov 0  }
   0x3   :  { %s820_s16 = smov 0   ;;  %s822_s17 = smov 0  }
   0x4 LB: > { %s555_s18 = sadd.s32 4294967295, %s787_s17   ;;  %s556_s19 = sadd.s32 4294967294, %s787_s17   ;;  %s787_s17 = sphi %s822_s17, %s16_s17   ;;  %s783_s16 = sphi %s820_s16, %s989_s16   ;;  %s779_s15 = sphi %s818_s15, %s988_s15   ;;  %s775_s14 = sphi %s816_s14, %s987_s14   ;;  %s771_s13 = sphi %s814_s13, %s986_s13   ;;  %s767_s12 = sphi %s812_s12, %s985_s12  }
   0x5   : > { %s28_s20 = sadd.s32 1, %s783_s16  ;;  %s110_s21 = sadd.s32 1, %s775_s14 }
   0x6   : > { %p30_p0 = scmp.ge.s32.totalorder %s28_s20, 2  ;;  %p120_p1 = scmp.ne.s32.totalorder %s775_s14, %s771_s13 }
   0x7   : > { %p121_p2 = scmp.eq.s32.totalorder %s555_s18, 1  ;;  %p126_p3 = scmp.ne.s32.totalorder %s771_s13, %s767_s12 }
   0x8   : > { %s991_s20 = smov (%p30_p0, %s28_s20), 0  ;;  %p127_p5 = scmp.eq.s32.totalorder %s556_s19, 1 }
   0x9   : > { %p852_p4 = por %p121_p2, %p120_p1  ;;  %s105_s23 = ssub.s32 %s783_s16, %s991_s20 }
   0xa   : > { %p560_p6 = scmp.ge.s32.totalorder %s787_s17, 1  ;;  %p108_p7 = scmp.eq.s32.totalorder %s105_s23, 0 }
   0xb   : > { %p859_p8 = por %p127_p5, %p126_p3  ;;  %p165_p9 = scmp.lt.s32.totalorder %s787_s17, 3 }
   0xc   : > { %s865_s25 = scalar_select %p108_p7, %s775_s14, %s110_s21  }
   0xd   : > { %p166_p10 = pnand %p560_p6, %p165_p9 }
   0xe   : > { %p194_p11 = scmp.lt.s32.totalorder (!%p166_p10), %s779_s15, 1  ;;  %v701_v0 = vld [vmem:[%s980_s1] sm:$0xff] (!%p166_p10)   ;;  %vm243_vm0 = vcmask (!%p166_p10), 130048   ;;  %v706_v2 = vld [vmem:[%s981_s2 + $0x8] sm:$0xff] (!%p166_p10)   ;;  %v703_v6 = vld [vmem:[%s980_s1 + $0x10] sm:$0xff] (!%p166_p10)   ;;  %s191_s30 = sand.u32 (!%p166_p10), 1, %s771_s13  }
   0xf   : > { %169 = sbr.rel (%p166_p10) target bundleno = 487 (0x1e7), region = 32  ;;  %603 = vmatprep.mubr.msk.bf16.mxu0 (!%p166_p10), %vm243_vm0, %v701_v0  ;;  %v705_v1 = vld [vmem:[%s981_s2] sm:$0xff] (!%p166_p10)   ;;  %v702_v5 = vld [vmem:[%s980_s1 + $0x8] sm:$0xff] (!%p166_p10)   ;;  %v369_v7 = vsel (!%p166_p10), %vm243_vm0, %v706_v2, 0  ;;  %v707_v8 = vld [vmem:[%s981_s2 + $0x10] sm:$0xff] (!%p166_p10)   ;;  %s561_s4 = sshll.u32 (!%p166_p10), %s191_s30, 6 }
  0x10   : > { %v366_v4 = vsel (!%p166_p10), %vm243_vm0, %v705_v1, 0  ;;  %636 = vmatprep.subr.msk.bf16.mxu1 (!%p166_p10), %vm243_vm0, %v705_v1  ;;  %v704_v9 = vld [vmem:[%s980_s1 + $0x18] sm:$0xff] (!%p166_p10)   ;;  %v372_v10 = vsel (!%p166_p10), %vm243_vm0, %v707_v8, 0  ;;  %vm442_vm1 = vcmask (!%p166_p10), 523264   ;;  %s193_s5 = scalar_lea.vmem (!%p166_p10), [#allocation2], %s561_s4  ;;  %s587_s6 = sshll.u32 (!%p166_p10), %s779_s15, 10 }
  0x11   : > { %631 = vmatpush3.bf16.xpose.msra.mxu1 (!%p166_p10), %v366_v4  ;;  %v708_v11 = vld [vmem:[%s981_s2 + $0x18] sm:$0xff] (!%p166_p10)   ;;  %s926_s10 = scalar_lea.hbm (!%p166_p10), %s982_s3, %s587_s6  ;;  %s789_s18 = smov (!%p166_p10), [#allocation2]  }
  0x12   : > { %638 = vmatprep.subr.msk.bf16.mxu1 (!%p166_p10), %vm243_vm0, %v706_v2  ;;  %v375_v12 = vsel (!%p166_p10), %vm243_vm0, %v708_v11, 0  ;;  %s713_s19 = sshll.u32 (!%p166_p10), %s789_s18, 4  ;;  %s714_s19 = int_to_ptr.vmem [resolvable:$false] %s713_s19 }
  0x13   : > { %s715_s21 = scalar_lea.vmem (!%p166_p10), %s714_s19, 2048 }
  0x16   : > { %s195_s28 = scalar_select %p194_p11, %s779_s15, 1 }
  0x17   : > { %s933_s15 = scalar_lea.sflag [#allocation3], %s191_s30 }
  0x18   : > { %s586_s29 = sshll.u32 %s195_s28, 3 }
  0x19   : > { %s198_s7 = scalar_lea.vmem %s979_s0, %s586_s29  ;;  %632 = vmatpush3.bf16.xpose.msra.mxu1 %v369_v7 }
  0x1a   : > { %v700_v3 = vld [vmem:[%s198_s7] sm:$0xff]   ;;  %640 = vmatprep.subr.msk.bf16.mxu1 %vm243_vm0, %v707_v8  ;;  %s467_s7 = sshll.u32 %s193_s5, 4  ;;  %s928_s7 = int_to_ptr.vmem [resolvable:$true] %s467_s7 }
  0x1b   : > { %601 = vmatprep.subr.bf16.mxu0 %v700_v3  ;;  %s709_s11 = scalar_lea.vmem %s928_s7, 1024  ;;  %p716_p1 = scmp.lt.s32.totalorder %s928_s7, %s714_s19 }
  0x1c   : > { %602 = vmatpush3.bf16.msra.mxu0 %v700_v3  ;;  %p710_p12 = scmp.ne.s32.totalorder %s928_s7, %s709_s11  ;;  %p717_p2 = scmp.lt.s32.totalorder %s715_s21, %s709_s11 }
  0x1d   : > { %635 = vmatprep.subr.msk.bf16.mxu0 %vm243_vm0, %v705_v1 }
  0x1e   : > { %p711_p13 = pnand %p710_p12, %p852_p4  ;;  %p718_p3 = por %p717_p2, %p716_p1 }
  0x1f   : > { %604 = vmatmul.mubr.msk.bf16.vlgmr.msra.gmra.mrb[0].mxu0 %vm243_vm0, %v702_v5 }
  0x20   : > { %607 = vmatprep.mubr.msk.bf16.mxu0 %vm243_vm0, %v703_v6  ;;  %p712_p0 = pneg %p711_p13 }
  0x21   : > { %633 = vmatpush3.bf16.xpose.msra.mxu1 %v372_v10 }
  0x22   : > { %642 = vmatprep.subr.msk.bf16.mxu1 %vm243_vm0, %v708_v11  ;;  %p719_p5 = pnand %p718_p3, %p712_p0 }
  0x25   : > { %612 = vmatpush3.bf16.xpose.msra.mxu0 %v366_v4 }
  0x26   : > { %637 = vmatprep.subr.msk.bf16.mxu0 %vm243_vm0, %v706_v2 }
  0x27   : > { %608 = vmatmul.mubr.msk.bf16.gmra.mrb[4].mxu0 %vm243_vm0, %v704_v9 }
  0x29   : > { %634 = vmatpush3.bf16.xpose.msra.mxu1 %v375_v12 }
  0x2d   : > { %614 = vmatpush3.bf16.xpose.msra.mxu0 %v369_v7 }
  0x2e   : > { %639 = vmatprep.subr.msk.bf16.mxu0 %vm243_vm0, %v707_v8 }
  0x35   : > { %616 = vmatpush3.bf16.xpose.msra.mxu0 %v372_v10 }
  0x36   : > { %641 = vmatprep.subr.msk.bf16.mxu0 %vm243_vm0, %v708_v11 }
  0x3d   : > { %618 = vmatpush3.bf16.xpose.msra.mxu0 %v375_v12 }
  0xf2   : > { %v605_v13 = vpop.f32.mrb[0].mxu0 }
  0xf3   : > { %v290_v14 = vpop.f32.mrb[1].mxu0 }
  0xf4   : > { %v606_v15 = vpop.f32.mrb[2].mxu0 }
  0xf5   : > { %v322_v16 = vpack.c.bf16 %v606_v15, %v605_v13  ;;  %v293_v17 = vpop.f32.mrb[3].mxu0 }
  0xf6   : > { %v321_v18 = vpack.c.bf16 %v293_v17, %v290_v14 }
  0xf8   : > { %619 = vmatprep.mubr.msk.bf16.mxu0 %vm243_vm0, %v321_v18 }
  0xf9   : > { %620 = vmatmul.mubr.msk.bf16.vlgmr.msra.gmra.mrb[8].mxu0 %vm243_vm0, %v322_v16 }
  0xfa   : > { %v609_v19 = vpop.f32.mrb[4].mxu0 }
  0xfb   : > { %v306_v20 = vpop.f32.mrb[5].mxu0 }
  0xfc   : > { %v610_v21 = vpop.f32.mrb[6].mxu0 }
  0xfd   : > { %v324_v22 = vpack.c.bf16 %v610_v21, %v609_v19  ;;  %v309_v23 = vpop.f32.mrb[7].mxu0 }
  0xfe   : > { %v323_v24 = vpack.c.bf16 %v309_v23, %v306_v20 }
 0x100   : > { %623 = vmatprep.mubr.msk.bf16.mxu1 %vm243_vm0, %v323_v24 }
 0x101   : > { %624 = vmatmul.mubr.msk.bf16.vlgmr.msra.gmra.mrb[0].mxu1 %vm243_vm0, %v324_v22 }
 0x1cc   : > { %v621_v25 = vpop.f32.mrb[8].mxu0 }
 0x1cd   : > { %445 = vst.msk [vmem:[%s193_s5 + $0x10] sm:$0xff] %vm442_vm1, %v621_v25  ;;  %v411_v26 = vpop.f32.mrb[9].mxu0 }
 0x1ce   : > { %443 = vst.msk [vmem:[%s193_s5] sm:$0xff] %vm442_vm1, %v411_v26  ;;  %v622_v27 = vpop.f32.mrb[10].mxu0 }
 0x1cf   : > { %446 = vst.msk [vmem:[%s193_s5 + $0x18] sm:$0xff] %vm442_vm1, %v622_v27  ;;  %v414_v28 = vpop.f32.mrb[11].mxu0 }
 0x1d0   : > { %444 = vst.msk [vmem:[%s193_s5 + $0x8] sm:$0xff] %vm442_vm1, %v414_v28 }
 0x1d4   : > { %v625_v29 = vpop.f32.mrb[0].mxu1 }
 0x1d5   : > { %449 = vst.msk [vmem:[%s193_s5 + $0x30] sm:$0xff] %vm442_vm1, %v625_v29  ;;  %v427_v30 = vpop.f32.mrb[1].mxu1 }
 0x1d6   : > { %447 = vst.msk [vmem:[%s193_s5 + $0x20] sm:$0xff] %vm442_vm1, %v427_v30  ;;  %v626_v31 = vpop.f32.mrb[2].mxu1 }
 0x1d7   : > { %450 = vst.msk [vmem:[%s193_s5 + $0x38] sm:$0xff] %vm442_vm1, %v626_v31  ;;  %v430_v32 = vpop.f32.mrb[3].mxu1 }
 0x1d8   : > { %448 = vst.msk [vmem:[%s193_s5 + $0x28] sm:$0xff] %vm442_vm1, %v430_v32 }
 0x1d9   : > { %722 = shalt.err (!%p719_p5)
}
 0x1da   : > { %s723_s23 = scalar_lea.hbm %s926_s10, 1024  ;;  %s727_s28 = scalar_lea.hbm %s982_s3, 2048 }
 0x1db   : > { %p724_p6 = scmp.ne.s32.totalorder %s926_s10, %s723_s23  ;;  %p728_p10 = scmp.lt.u32.totalorder %s926_s10, %s982_s3 }
 0x1dc   : > { %p729_p11 = scmp.lt.u32.totalorder %s727_s28, %s723_s23  ;;  %p731_p13 = scmp.lt.u32.totalorder %s723_s23, %s926_s10 }
 0x1dd   : > { %p725_p7 = pnand %p724_p6, %p852_p4 }
 0x1de   : > { %p730_p12 = por %p729_p11, %p728_p10 }
 0x1df   : > { %p726_p9 = pneg %p725_p7 }
 0x1e0   : > { %p732_p0 = por %p731_p13, %p730_p12 }
 0x1e2   : > { %p733_p1 = pnand %p732_p0, %p726_p9 }
 0x1e4   : > { %736 = shalt.err (!%p733_p1)
}
 0x1e5   : > { %s790_s4 = smov 128   ;;  %s791_s5 = smov 8  }
 0x1e6   : > { %643 = dma.vmem_to_hbm [thread:$0]  (%p852_p4), %s928_s7, 1024, %s926_s10, %s933_s15, %s790_s4, %s790_s4, %s791_s5  }
 0x1e7 PF: > { %p649_p2 = scmp.ge.s32.totalorder %s787_s17, 2  ;;  %s482_s6 = sand.u32 1, %s767_s12  }
 0x1e8   : > { %s483_s8 = scalar_lea.sflag [#allocation3], %s482_s6 }
 0x1e9   : > { %p646_p3 = pnand %p649_p2, %p859_p8 }
 0x1eb   : > { %762 = dma.done.wait (!%p646_p3), %s483_s8, 1024  }
 0x1ec   : > { %764 = vsyncadd (!%p646_p3), %s483_s8, 4294966272  ;;  %s16_s17 = sadd.s32 1, %s787_s17   ;;  %s985_s12 = smov %s771_s13 }
 0x1ed   : > { %p13_p5 = scmp.ge.s32.totalorder %s16_s17, 4   ;;  %s986_s13 = smov %s775_s14 }
 0x1ee   : > { %s987_s14 = smov %s865_s25  ;;  %s988_s15 = smov %s783_s16 }
 0x1ef   : > { %s989_s16 = smov %s991_s20  ;;  %15 = sbr.rel (!%p13_p5) target bundleno = 4 (0x4), region = 70 }
 0x1f6   :  { %488 = vsyncpa [#allocation3], 1 }
 0x1f7   :  { %490 = vsyncpa [#allocation3 + $0x1], 1 }

</bundles_post_ra>
